<compile_context>
chip_gen: v6e
topology: v6e:2x2x1
jax: 0.10.0
libtpu: 0.0.40
codegen_flags: <defaults>
</compile_context>

<pallas_src>
import jax
import jax.numpy as jnp
from jax import lax
from jax.experimental import pallas as pl
from jax.experimental.pallas import tpu as pltpu

# ------------------------- model hyper-parameters -------------------------
B = 2                 # batch
S = 16                # sequence length (num patches + cls, small synthetic)
H = 128               # hidden_size
NUM_HEADS = 4
HEAD_DIM = H // NUM_HEADS
INTERMEDIATE = 256    # intermediate_size
NUM_LAYERS = 2        # num_hidden_layers
LN_EPS = 1e-12        # layer_norm_eps (HF ViT default)
RESIDUAL_EPS = 1e-6   # config.residual_eps


# ----------------------------- shared math ---------------------------------
def _layernorm(x, gamma, beta):
    mu = jnp.mean(x, axis=-1, keepdims=True)
    xc = x - mu
    var = jnp.mean(xc * xc, axis=-1, keepdims=True)
    return xc * lax.rsqrt(var + LN_EPS) * gamma + beta


def _erf(x):
    # Abramowitz & Stegun 7.1.26 (|err| < 1.5e-7); only exp/abs needed.
    sgn = jnp.where(x >= 0.0, 1.0, -1.0)
    a = jnp.abs(x)
    t = 1.0 / (1.0 + 0.3275911 * a)
    poly = t * (0.254829592 + t * (-0.284496736 + t * (1.421413741
               + t * (-1.453152027 + t * 1.061405429))))
    return sgn * (1.0 - poly * jnp.exp(-a * a))


def _gelu_exact(x):
    return 0.5 * x * (1.0 + _erf(x * 0.7071067811865476))


def _connect_ref(x, f_x):
    # Orthogonal residual update (default "ortho" mode).
    # TODO(synk): other config.residual_kwargs `connect` variants not implemented.
    dot = jnp.sum(x * f_x, axis=-1, keepdims=True)
    sq = jnp.sum(x * x, axis=-1, keepdims=True)
    return x + f_x - (dot / (sq + RESIDUAL_EPS)) * x


def _connect_kernel(x, f_x):
    # Same as _connect_ref but the divide goes to the EUP.
    dot = jnp.sum(x * f_x, axis=-1, keepdims=True)
    sq = jnp.sum(x * x, axis=-1, keepdims=True)
    coef = dot * pl.reciprocal(sq + RESIDUAL_EPS, approx=True)
    return x + f_x - coef * x


# ------------------------------ Pallas kernel -------------------------------
def ortho_vit_stack_kernel(
    x_ref,
    ln1_g_ref, ln1_b_ref,
    wq_ref, bq_ref, wk_ref, bk_ref, wv_ref, bv_ref,
    wo_ref, bo_ref,
    ln2_g_ref, ln2_b_ref,
    wi_ref, bi_ref, wd_ref, bd_ref,
    out_ref,
    h_ref,                                  # VMEM scratch: resident hidden state
):
    l = pl.program_id(1)

    # Layer 0 of each batch block: load the encoder input into the resident
    # hidden-state scratch.  Later layers read the previous layer's output
    # directly from VMEM (no HBM round-trip between layers).
    @pl.when(l == 0)
    def _():
        h_ref[...] = x_ref[0].astype(jnp.float32)

    x = h_ref[...]                                              # (S, H) f32

    # ---- layernorm_before ----
    normed = _layernorm(x, ln1_g_ref[0], ln1_b_ref[0])

    # ---- multi-head self-attention ----
    # Per-head weights come from static column slices of the weight refs
    # (lane-dense loads); output projection is accumulated per head over
    # sublane row-slices of wo -> no lane concatenate, no activation slicing.
    wo = wo_ref[0].astype(jnp.float32)                          # (H, H)
    scale = 1.0 / (HEAD_DIM ** 0.5)
    attn_out = jnp.zeros((S, H), jnp.float32)
    for h in range(NUM_HEADS):                                  # static unroll
        sl = slice(h * HEAD_DIM, (h + 1) * HEAD_DIM)
        qh = jnp.dot(normed, wq_ref[0, :, sl].astype(jnp.float32),
                     preferred_element_type=jnp.float32) + bq_ref[0, :, sl]
        kh = jnp.dot(normed, wk_ref[0, :, sl].astype(jnp.float32),
                     preferred_element_type=jnp.float32) + bk_ref[0, :, sl]
        vh = jnp.dot(normed, wv_ref[0, :, sl].astype(jnp.float32),
                     preferred_element_type=jnp.float32) + bv_ref[0, :, sl]
        # q @ k^T without materializing a transpose.
        scores = lax.dot_general(
            qh, kh, dimension_numbers=(((1,), (1,)), ((), ())),
            preferred_element_type=jnp.float32) * scale
        scores = scores - jnp.max(scores, axis=-1, keepdims=True)
        p = jnp.exp(scores)
        p = p * pl.reciprocal(jnp.sum(p, axis=-1, keepdims=True), approx=True)
        ctx_h = jnp.dot(p, vh, preferred_element_type=jnp.float32)   # (S, HD)
        attn_out = attn_out + jnp.dot(ctx_h, wo[sl, :],
                                      preferred_element_type=jnp.float32)
    attn_out = attn_out + bo_ref[0]

    # ---- ortho residual connect (attention branch) ----
    h1 = _connect_kernel(x, attn_out)

    # ---- layernorm_after + MLP ----
    normed2 = _layernorm(h1, ln2_g_ref[0], ln2_b_ref[0])
    inter = _gelu_exact(jnp.dot(normed2, wi_ref[0].astype(jnp.float32),
                                preferred_element_type=jnp.float32) + bi_ref[0])
    mlp_out = jnp.dot(inter, wd_ref[0].astype(jnp.float32),
                      preferred_element_type=jnp.float32) + bd_ref[0]

    # ---- ortho residual connect (MLP branch) ----
    out = _connect_kernel(h1, mlp_out)
    h_ref[...] = out                                    # stays resident in VMEM

    @pl.when(l == NUM_LAYERS - 1)
    def _():
        out_ref[0] = out.astype(out_ref.dtype)


def _param_spec(p):
    # Each stacked param (NUM_LAYERS, r, c): pick the layer block, ignore batch.
    return pl.BlockSpec((1,) + p.shape[1:], lambda b, l: (l, 0, 0))


def ortho_vit_encoder(x, stacked_params):
    in_specs = [pl.BlockSpec((1, S, H), lambda b, l: (b, 0, 0))]
    in_specs += [_param_spec(p) for p in stacked_params]
    return pl.pallas_call(
        ortho_vit_stack_kernel,
        out_shape=jax.ShapeDtypeStruct(x.shape, x.dtype),
        grid=(B, NUM_LAYERS),
        in_specs=in_specs,
        out_specs=pl.BlockSpec((1, S, H), lambda b, l: (b, 0, 0)),
        scratch_shapes=[pltpu.VMEM((S, H), jnp.float32)],
        compiler_params=pltpu.CompilerParams(
            dimension_semantics=("parallel", "arbitrary")),
    )(x, *stacked_params)


# ------------------------- pure-JAX reference -------------------------------
def ortho_vit_encoder_ref(x, params):
    (ln1_g, ln1_b, wq, bq, wk, bk, wv, bv, wo, bo,
     ln2_g, ln2_b, wi, bi, wd, bd) = params
    f32 = jnp.float32
    h = x
    for l in range(NUM_LAYERS):
        normed = _layernorm(h, ln1_g[l], ln1_b[l])
        q = normed @ wq[l].astype(f32) + bq[l]
        k = normed @ wk[l].astype(f32) + bk[l]
        v = normed @ wv[l].astype(f32) + bv[l]

        def split(t):  # (B, S, H) -> (B, NH, S, HD)
            return t.reshape(B, S, NUM_HEADS, HEAD_DIM).transpose(0, 2, 1, 3)

        qh, kh, vh = split(q), split(k), split(v)
        scores = jnp.einsum('bhqd,bhkd->bhqk', qh, kh) / (HEAD_DIM ** 0.5)
        probs = jax.nn.softmax(scores, axis=-1)
        ctx = jnp.einsum('bhqk,bhkd->bhqd', probs, vh)
        ctx = ctx.transpose(0, 2, 1, 3).reshape(B, S, H)
        attn_out = ctx @ wo[l].astype(f32) + bo[l]

        h1 = _connect_ref(h, attn_out)
        normed2 = _layernorm(h1, ln2_g[l], ln2_b[l])
        inter = _gelu_exact(normed2 @ wi[l].astype(f32) + bi[l])
        mlp_out = inter @ wd[l].astype(f32) + bd[l]
        h = _connect_ref(h1, mlp_out)
    return h


# ------------------------- deterministic parameter init ---------------------
def init_stacked_params(key):
    ks = jax.random.split(key, 12)

    def W(k, fin, fout):
        # bf16 weights in HBM (halves weight DMA); f32 accumulation in-kernel.
        w = jax.random.normal(k, (NUM_LAYERS, fin, fout), jnp.float32) * 0.02
        return w.astype(jnp.bfloat16)

    def vec(k, n):
        return jax.random.normal(k, (NUM_LAYERS, 1, n), jnp.float32) * 0.02

    ln1_g = jnp.ones((NUM_LAYERS, 1, H), jnp.float32)
    ln1_b = jnp.zeros((NUM_LAYERS, 1, H), jnp.float32)
    ln2_g = jnp.ones((NUM_LAYERS, 1, H), jnp.float32)
    ln2_b = jnp.zeros((NUM_LAYERS, 1, H), jnp.float32)
    wq, bq = W(ks[0], H, H), vec(ks[1], H)
    wk, bk = W(ks[2], H, H), vec(ks[3], H)
    wv, bv = W(ks[4], H, H), vec(ks[5], H)
    wo, bo = W(ks[6], H, H), vec(ks[7], H)
    wi, bi = W(ks[8], H, INTERMEDIATE), vec(ks[9], INTERMEDIATE)
    wd, bd = W(ks[10], INTERMEDIATE, H), vec(ks[11], H)
    return (ln1_g, ln1_b, wq, bq, wk, bk, wv, bv, wo, bo,
            ln2_g, ln2_b, wi, bi, wd, bd)


if __name__ == "__main__":
    key = jax.random.PRNGKey(0)
    kx, kp = jax.random.split(key)
    x = jax.random.normal(kx, (B, S, H), jnp.float32)
    params = init_stacked_params(kp)

    out = jax.block_until_ready(ortho_vit_encoder(x, params))
    ref = jax.block_until_ready(ortho_vit_encoder_ref(x, params))

    assert out.shape == (B, S, H) and out.dtype == jnp.float32
    max_err = float(jnp.max(jnp.abs(out - ref)))
    assert jnp.allclose(out, ref, rtol=2e-2, atol=2e-2), (
        f"max abs err = {max_err}")
    print("KERNEL_OK")
</pallas_src>

<mosaic_0001>
module attributes {stable_mosaic.version = 11 : i64} {
  func.func @ortho_vit_stack_kernel(%arg0: i32, %arg1: i32, %arg2: memref<1x16x128xf32, #tpu.memory_space<vmem>>, %arg3: memref<1x1x128xf32, #tpu.memory_space<vmem>>, %arg4: memref<1x1x128xf32, #tpu.memory_space<vmem>>, %arg5: memref<1x128x128xbf16, #tpu.memory_space<vmem>>, %arg6: memref<1x1x128xf32, #tpu.memory_space<vmem>>, %arg7: memref<1x128x128xbf16, #tpu.memory_space<vmem>>, %arg8: memref<1x1x128xf32, #tpu.memory_space<vmem>>, %arg9: memref<1x128x128xbf16, #tpu.memory_space<vmem>>, %arg10: memref<1x1x128xf32, #tpu.memory_space<vmem>>, %arg11: memref<1x128x128xbf16, #tpu.memory_space<vmem>>, %arg12: memref<1x1x128xf32, #tpu.memory_space<vmem>>, %arg13: memref<1x1x128xf32, #tpu.memory_space<vmem>>, %arg14: memref<1x1x128xf32, #tpu.memory_space<vmem>>, %arg15: memref<1x128x256xbf16, #tpu.memory_space<vmem>>, %arg16: memref<1x1x256xf32, #tpu.memory_space<vmem>>, %arg17: memref<1x256x128xbf16, #tpu.memory_space<vmem>>, %arg18: memref<1x1x128xf32, #tpu.memory_space<vmem>>, %arg19: memref<1x16x128xf32, #tpu.memory_space<vmem>>, %arg20: memref<16x128xf32, #tpu.memory_space<vmem>>) attributes {dimension_semantics = [#tpu.dimension_semantics<parallel>, #tpu.dimension_semantics<arbitrary>], iteration_bounds = array<i64: 2, 2>, scalar_prefetch = 0 : i64, scratch_operands = 1 : i64, tpu.core_type = #tpu.core_type<tc>, window_params = [{transform_indices = @transform_0, window_bounds = array<i64: 1, 16, 128>}, {transform_indices = @transform_1, window_bounds = array<i64: 1, 1, 128>}, {transform_indices = @transform_2, window_bounds = array<i64: 1, 1, 128>}, {transform_indices = @transform_3, window_bounds = array<i64: 1, 128, 128>}, {transform_indices = @transform_4, window_bounds = array<i64: 1, 1, 128>}, {transform_indices = @transform_5, window_bounds = array<i64: 1, 128, 128>}, {transform_indices = @transform_6, window_bounds = array<i64: 1, 1, 128>}, {transform_indices = @transform_7, window_bounds = array<i64: 1, 128, 128>}, {transform_indices = @transform_8, window_bounds = array<i64: 1, 1, 128>}, {transform_indices = @transform_9, window_bounds = array<i64: 1, 128, 128>}, {transform_indices = @transform_10, window_bounds = array<i64: 1, 1, 128>}, {transform_indices = @transform_11, window_bounds = array<i64: 1, 1, 128>}, {transform_indices = @transform_12, window_bounds = array<i64: 1, 1, 128>}, {transform_indices = @transform_13, window_bounds = array<i64: 1, 128, 256>}, {transform_indices = @transform_14, window_bounds = array<i64: 1, 1, 256>}, {transform_indices = @transform_15, window_bounds = array<i64: 1, 256, 128>}, {transform_indices = @transform_16, window_bounds = array<i64: 1, 1, 128>}, {transform_indices = @transform_17, window_bounds = array<i64: 1, 16, 128>}]} {
    %c0_i32 = arith.constant 0 : i32
    %0 = arith.cmpi eq, %arg1, %c0_i32 : i32
    %1 = arith.extui %0 : i1 to i32
    %c0_i32_0 = arith.constant 0 : i32
    %2 = arith.cmpi ne, %1, %c0_i32_0 : i32
    scf.if %2 {
      %c0_174 = arith.constant 0 : index
      %c0_175 = arith.constant 0 : index
      %c0_176 = arith.constant 0 : index
      %313 = vector.load %arg2[%c0_174, %c0_175, %c0_176] : memref<1x16x128xf32, #tpu.memory_space<vmem>>, vector<1x16x128xf32>
      %314 = vector.shape_cast %313 : vector<1x16x128xf32> to vector<16x128xf32>
      %c0_177 = arith.constant 0 : index
      %c0_178 = arith.constant 0 : index
      %315 = vector.load %arg20[%c0_177, %c0_178] : memref<16x128xf32, #tpu.memory_space<vmem>>, vector<16x128xf32>
      tpu.vector_store %arg20[%c0_177, %c0_178], %314 {strides = array<i32>} : memref<16x128xf32, #tpu.memory_space<vmem>>, vector<16x128xf32>,
    } else {
    }
    %c0 = arith.constant 0 : index
    %c0_1 = arith.constant 0 : index
    %3 = vector.load %arg20[%c0, %c0_1] : memref<16x128xf32, #tpu.memory_space<vmem>>, vector<16x128xf32>
    %c0_2 = arith.constant 0 : index
    %c0_3 = arith.constant 0 : index
    %c0_4 = arith.constant 0 : index
    %4 = vector.load %arg3[%c0_2, %c0_3, %c0_4] : memref<1x1x128xf32, #tpu.memory_space<vmem>>, vector<1x1x128xf32>
    %5 = vector.shape_cast %4 : vector<1x1x128xf32> to vector<1x128xf32>
    %c0_5 = arith.constant 0 : index
    %c0_6 = arith.constant 0 : index
    %c0_7 = arith.constant 0 : index
    %6 = vector.load %arg4[%c0_5, %c0_6, %c0_7] : memref<1x1x128xf32, #tpu.memory_space<vmem>>, vector<1x1x128xf32>
    %7 = vector.shape_cast %6 : vector<1x1x128xf32> to vector<1x128xf32>
    %cst = arith.constant dense<0.000000e+00> : vector<16xf32>
    %8 = vector.multi_reduction <add>, %3, %cst [1] : vector<16x128xf32> to vector<16xf32>
    %9 = vector.shape_cast %8 : vector<16xf32> to vector<16x1xf32>
    %cst_8 = arith.constant 1.280000e+02 : f32
    %10 = vector.broadcast %cst_8 : f32 to vector<16x1xf32>
    %11 = arith.divf %9, %10 : vector<16x1xf32>
    %12 = vector.broadcast %11 : vector<16x1xf32> to vector<16x128xf32>
    %13 = arith.subf %3, %12 : vector<16x128xf32>
    %14 = arith.mulf %13, %13 : vector<16x128xf32>
    %cst_9 = arith.constant dense<0.000000e+00> : vector<16xf32>
    %15 = vector.multi_reduction <add>, %14, %cst_9 [1] : vector<16x128xf32> to vector<16xf32>
    %16 = vector.shape_cast %15 : vector<16xf32> to vector<16x1xf32>
    %cst_10 = arith.constant 1.280000e+02 : f32
    %17 = vector.broadcast %cst_10 : f32 to vector<16x1xf32>
    %18 = arith.divf %16, %17 : vector<16x1xf32>
    %cst_11 = arith.constant 9.99999996E-13 : f32
    %19 = vector.broadcast %cst_11 : f32 to vector<16x1xf32>
    %20 = arith.addf %18, %19 : vector<16x1xf32>
    %21 = math.rsqrt %20 : vector<16x1xf32>
    %22 = vector.broadcast %21 : vector<16x1xf32> to vector<16x128xf32>
    %23 = arith.mulf %13, %22 : vector<16x128xf32>
    %24 = vector.broadcast %5 : vector<1x128xf32> to vector<16x128xf32>
    %25 = arith.mulf %23, %24 : vector<16x128xf32>
    %26 = vector.broadcast %7 : vector<1x128xf32> to vector<16x128xf32>
    %27 = arith.addf %25, %26 : vector<16x128xf32>
    %c0_12 = arith.constant 0 : index
    %c0_13 = arith.constant 0 : index
    %c0_14 = arith.constant 0 : index
    %28 = vector.load %arg11[%c0_12, %c0_13, %c0_14] : memref<1x128x128xbf16, #tpu.memory_space<vmem>>, vector<1x128x128xbf16>
    %29 = vector.shape_cast %28 : vector<1x128x128xbf16> to vector<128x128xbf16>
    %30 = arith.extf %29 : vector<128x128xbf16> to vector<128x128xf32>
    %cst_15 = arith.constant 0.000000e+00 : f32
    %31 = vector.broadcast %cst_15 : f32 to vector<16x128xf32>
    %c0_16 = arith.constant 0 : index
    %c0_17 = arith.constant 0 : index
    %c0_18 = arith.constant 0 : index
    %32 = vector.load %arg5[%c0_16, %c0_17, %c0_18] : memref<1x128x128xbf16, #tpu.memory_space<vmem>>, vector<1x128x32xbf16>
    %33 = vector.shape_cast %32 : vector<1x128x32xbf16> to vector<128x32xbf16>
    %34 = arith.extf %33 : vector<128x32xbf16> to vector<128x32xf32>
    %cst_19 = arith.constant dense<0.000000e+00> : vector<16x32xf32>
    %35 = tpu.matmul %27, %34, %cst_19 {dimension_numbers = #tpu.dot_dimension_numbers<[1], [0], [0], [1], [0, 0, 1, 1], [], []>} : vector<16x128xf32>, vector<128x32xf32>, vector<16x32xf32> -> vector<16x32xf32>
    %c0_20 = arith.constant 0 : index
    %c0_21 = arith.constant 0 : index
    %c0_22 = arith.constant 0 : index
    %36 = vector.load %arg6[%c0_20, %c0_21, %c0_22] : memref<1x1x128xf32, #tpu.memory_space<vmem>>, vector<1x1x32xf32>
    %37 = vector.shape_cast %36 : vector<1x1x32xf32> to vector<1x32xf32>
    %38 = vector.broadcast %37 : vector<1x32xf32> to vector<16x32xf32>
    %39 = arith.addf %35, %38 : vector<16x32xf32>
    %c0_23 = arith.constant 0 : index
    %c0_24 = arith.constant 0 : index
    %c0_25 = arith.constant 0 : index
    %40 = vector.load %arg7[%c0_23, %c0_24, %c0_25] : memref<1x128x128xbf16, #tpu.memory_space<vmem>>, vector<1x128x32xbf16>
    %41 = vector.shape_cast %40 : vector<1x128x32xbf16> to vector<128x32xbf16>
    %42 = arith.extf %41 : vector<128x32xbf16> to vector<128x32xf32>
    %cst_26 = arith.constant dense<0.000000e+00> : vector<16x32xf32>
    %43 = tpu.matmul %27, %42, %cst_26 {dimension_numbers = #tpu.dot_dimension_numbers<[1], [0], [0], [1], [0, 0, 1, 1], [], []>} : vector<16x128xf32>, vector<128x32xf32>, vector<16x32xf32> -> vector<16x32xf32>
    %c0_27 = arith.constant 0 : index
    %c0_28 = arith.constant 0 : index
    %c0_29 = arith.constant 0 : index
    %44 = vector.load %arg8[%c0_27, %c0_28, %c0_29] : memref<1x1x128xf32, #tpu.memory_space<vmem>>, vector<1x1x32xf32>
    %45 = vector.shape_cast %44 : vector<1x1x32xf32> to vector<1x32xf32>
    %46 = vector.broadcast %45 : vector<1x32xf32> to vector<16x32xf32>
    %47 = arith.addf %43, %46 : vector<16x32xf32>
    %c0_30 = arith.constant 0 : index
    %c0_31 = arith.constant 0 : index
    %c0_32 = arith.constant 0 : index
    %48 = vector.load %arg9[%c0_30, %c0_31, %c0_32] : memref<1x128x128xbf16, #tpu.memory_space<vmem>>, vector<1x128x32xbf16>
    %49 = vector.shape_cast %48 : vector<1x128x32xbf16> to vector<128x32xbf16>
    %50 = arith.extf %49 : vector<128x32xbf16> to vector<128x32xf32>
    %cst_33 = arith.constant dense<0.000000e+00> : vector<16x32xf32>
    %51 = tpu.matmul %27, %50, %cst_33 {dimension_numbers = #tpu.dot_dimension_numbers<[1], [0], [0], [1], [0, 0, 1, 1], [], []>} : vector<16x128xf32>, vector<128x32xf32>, vector<16x32xf32> -> vector<16x32xf32>
    %c0_34 = arith.constant 0 : index
    %c0_35 = arith.constant 0 : index
    %c0_36 = arith.constant 0 : index
    %52 = vector.load %arg10[%c0_34, %c0_35, %c0_36] : memref<1x1x128xf32, #tpu.memory_space<vmem>>, vector<1x1x32xf32>
    %53 = vector.shape_cast %52 : vector<1x1x32xf32> to vector<1x32xf32>
    %54 = vector.broadcast %53 : vector<1x32xf32> to vector<16x32xf32>
    %55 = arith.addf %51, %54 : vector<16x32xf32>
    %cst_37 = arith.constant dense<0.000000e+00> : vector<16x16xf32>
    %56 = tpu.matmul %39, %47, %cst_37 {dimension_numbers = #tpu.dot_dimension_numbers<[1], [1], [0], [0], [0, 0, 1, 0], [], []>} : vector<16x32xf32>, vector<16x32xf32>, vector<16x16xf32> -> vector<16x16xf32>
    %cst_38 = arith.constant 0.176776692 : f32
    %57 = vector.broadcast %cst_38 : f32 to vector<16x16xf32>
    %58 = arith.mulf %56, %57 : vector<16x16xf32>
    %cst_39 = arith.constant dense<0xFF800000> : vector<16xf32>
    %59 = vector.multi_reduction <maximumf>, %58, %cst_39 [1] : vector<16x16xf32> to vector<16xf32>
    %60 = vector.shape_cast %59 : vector<16xf32> to vector<16x1xf32>
    %61 = vector.broadcast %60 : vector<16x1xf32> to vector<16x16xf32>
    %62 = arith.subf %58, %61 : vector<16x16xf32>
    %63 = math.exp %62 : vector<16x16xf32>
    %cst_40 = arith.constant dense<0.000000e+00> : vector<16xf32>
    %64 = vector.multi_reduction <add>, %63, %cst_40 [1] : vector<16x16xf32> to vector<16xf32>
    %65 = vector.shape_cast %64 : vector<16xf32> to vector<16x1xf32>
    %66 = tpu.reciprocal %65 {approx = true} : vector<16x1xf32> -> vector<16x1xf32>
    %67 = vector.broadcast %66 : vector<16x1xf32> to vector<16x16xf32>
    %68 = arith.mulf %63, %67 : vector<16x16xf32>
    %cst_41 = arith.constant dense<0.000000e+00> : vector<16x32xf32>
    %69 = tpu.matmul %68, %55, %cst_41 {dimension_numbers = #tpu.dot_dimension_numbers<[1], [0], [0], [1], [0, 0, 1, 1], [], []>} : vector<16x16xf32>, vector<16x32xf32>, vector<16x32xf32> -> vector<16x32xf32>
    %70 = vector.extract_strided_slice %30 {offsets = [0, 0], sizes = [32, 128], strides = [1, 1]} : vector<128x128xf32> to vector<32x128xf32>
    %cst_42 = arith.constant dense<0.000000e+00> : vector<16x128xf32>
    %71 = tpu.matmul %69, %70, %cst_42 {dimension_numbers = #tpu.dot_dimension_numbers<[1], [0], [0], [1], [0, 0, 1, 1], [], []>} : vector<16x32xf32>, vector<32x128xf32>, vector<16x128xf32> -> vector<16x128xf32>
    %72 = arith.addf %31, %71 : vector<16x128xf32>
    %c0_43 = arith.constant 0 : index
    %c0_44 = arith.constant 0 : index
    %c32 = arith.constant 32 : index
    %73 = vector.load %arg5[%c0_43, %c0_44, %c32] : memref<1x128x128xbf16, #tpu.memory_space<vmem>>, vector<1x128x32xbf16>
    %74 = vector.shape_cast %73 : vector<1x128x32xbf16> to vector<128x32xbf16>
    %75 = arith.extf %74 : vector<128x32xbf16> to vector<128x32xf32>
    %cst_45 = arith.constant dense<0.000000e+00> : vector<16x32xf32>
    %76 = tpu.matmul %27, %75, %cst_45 {dimension_numbers = #tpu.dot_dimension_numbers<[1], [0], [0], [1], [0, 0, 1, 1], [], []>} : vector<16x128xf32>, vector<128x32xf32>, vector<16x32xf32> -> vector<16x32xf32>
    %c0_46 = arith.constant 0 : index
    %c0_47 = arith.constant 0 : index
    %c32_48 = arith.constant 32 : index
    %77 = vector.load %arg6[%c0_46, %c0_47, %c32_48] : memref<1x1x128xf32, #tpu.memory_space<vmem>>, vector<1x1x32xf32>
    %78 = vector.shape_cast %77 : vector<1x1x32xf32> to vector<1x32xf32>
    %79 = vector.broadcast %78 : vector<1x32xf32> to vector<16x32xf32>
    %80 = arith.addf %76, %79 : vector<16x32xf32>
    %c0_49 = arith.constant 0 : index
    %c0_50 = arith.constant 0 : index
    %c32_51 = arith.constant 32 : index
    %81 = vector.load %arg7[%c0_49, %c0_50, %c32_51] : memref<1x128x128xbf16, #tpu.memory_space<vmem>>, vector<1x128x32xbf16>
    %82 = vector.shape_cast %81 : vector<1x128x32xbf16> to vector<128x32xbf16>
    %83 = arith.extf %82 : vector<128x32xbf16> to vector<128x32xf32>
    %cst_52 = arith.constant dense<0.000000e+00> : vector<16x32xf32>
    %84 = tpu.matmul %27, %83, %cst_52 {dimension_numbers = #tpu.dot_dimension_numbers<[1], [0], [0], [1], [0, 0, 1, 1], [], []>} : vector<16x128xf32>, vector<128x32xf32>, vector<16x32xf32> -> vector<16x32xf32>
    %c0_53 = arith.constant 0 : index
    %c0_54 = arith.constant 0 : index
    %c32_55 = arith.constant 32 : index
    %85 = vector.load %arg8[%c0_53, %c0_54, %c32_55] : memref<1x1x128xf32, #tpu.memory_space<vmem>>, vector<1x1x32xf32>
    %86 = vector.shape_cast %85 : vector<1x1x32xf32> to vector<1x32xf32>
    %87 = vector.broadcast %86 : vector<1x32xf32> to vector<16x32xf32>
    %88 = arith.addf %84, %87 : vector<16x32xf32>
    %c0_56 = arith.constant 0 : index
    %c0_57 = arith.constant 0 : index
    %c32_58 = arith.constant 32 : index
    %89 = vector.load %arg9[%c0_56, %c0_57, %c32_58] : memref<1x128x128xbf16, #tpu.memory_space<vmem>>, vector<1x128x32xbf16>
    %90 = vector.shape_cast %89 : vector<1x128x32xbf16> to vector<128x32xbf16>
    %91 = arith.extf %90 : vector<128x32xbf16> to vector<128x32xf32>
    %cst_59 = arith.constant dense<0.000000e+00> : vector<16x32xf32>
    %92 = tpu.matmul %27, %91, %cst_59 {dimension_numbers = #tpu.dot_dimension_numbers<[1], [0], [0], [1], [0, 0, 1, 1], [], []>} : vector<16x128xf32>, vector<128x32xf32>, vector<16x32xf32> -> vector<16x32xf32>
    %c0_60 = arith.constant 0 : index
    %c0_61 = arith.constant 0 : index
    %c32_62 = arith.constant 32 : index
    %93 = vector.load %arg10[%c0_60, %c0_61, %c32_62] : memref<1x1x128xf32, #tpu.memory_space<vmem>>, vector<1x1x32xf32>
    %94 = vector.shape_cast %93 : vector<1x1x32xf32> to vector<1x32xf32>
    %95 = vector.broadcast %94 : vector<1x32xf32> to vector<16x32xf32>
    %96 = arith.addf %92, %95 : vector<16x32xf32>
    %cst_63 = arith.constant dense<0.000000e+00> : vector<16x16xf32>
    %97 = tpu.matmul %80, %88, %cst_63 {dimension_numbers = #tpu.dot_dimension_numbers<[1], [1], [0], [0], [0, 0, 1, 0], [], []>} : vector<16x32xf32>, vector<16x32xf32>, vector<16x16xf32> -> vector<16x16xf32>
    %cst_64 = arith.constant 0.176776692 : f32
    %98 = vector.broadcast %cst_64 : f32 to vector<16x16xf32>
    %99 = arith.mulf %97, %98 : vector<16x16xf32>
    %cst_65 = arith.constant dense<0xFF800000> : vector<16xf32>
    %100 = vector.multi_reduction <maximumf>, %99, %cst_65 [1] : vector<16x16xf32> to vector<16xf32>
    %101 = vector.shape_cast %100 : vector<16xf32> to vector<16x1xf32>
    %102 = vector.broadcast %101 : vector<16x1xf32> to vector<16x16xf32>
    %103 = arith.subf %99, %102 : vector<16x16xf32>
    %104 = math.exp %103 : vector<16x16xf32>
    %cst_66 = arith.constant dense<0.000000e+00> : vector<16xf32>
    %105 = vector.multi_reduction <add>, %104, %cst_66 [1] : vector<16x16xf32> to vector<16xf32>
    %106 = vector.shape_cast %105 : vector<16xf32> to vector<16x1xf32>
    %107 = tpu.reciprocal %106 {approx = true} : vector<16x1xf32> -> vector<16x1xf32>
    %108 = vector.broadcast %107 : vector<16x1xf32> to vector<16x16xf32>
    %109 = arith.mulf %104, %108 : vector<16x16xf32>
    %cst_67 = arith.constant dense<0.000000e+00> : vector<16x32xf32>
    %110 = tpu.matmul %109, %96, %cst_67 {dimension_numbers = #tpu.dot_dimension_numbers<[1], [0], [0], [1], [0, 0, 1, 1], [], []>} : vector<16x16xf32>, vector<16x32xf32>, vector<16x32xf32> -> vector<16x32xf32>
    %111 = vector.extract_strided_slice %30 {offsets = [32, 0], sizes = [32, 128], strides = [1, 1]} : vector<128x128xf32> to vector<32x128xf32>
    %cst_68 = arith.constant dense<0.000000e+00> : vector<16x128xf32>
    %112 = tpu.matmul %110, %111, %cst_68 {dimension_numbers = #tpu.dot_dimension_numbers<[1], [0], [0], [1], [0, 0, 1, 1], [], []>} : vector<16x32xf32>, vector<32x128xf32>, vector<16x128xf32> -> vector<16x128xf32>
    %113 = arith.addf %72, %112 : vector<16x128xf32>
    %c0_69 = arith.constant 0 : index
    %c0_70 = arith.constant 0 : index
    %c64 = arith.constant 64 : index
    %114 = vector.load %arg5[%c0_69, %c0_70, %c64] : memref<1x128x128xbf16, #tpu.memory_space<vmem>>, vector<1x128x32xbf16>
    %115 = vector.shape_cast %114 : vector<1x128x32xbf16> to vector<128x32xbf16>
    %116 = arith.extf %115 : vector<128x32xbf16> to vector<128x32xf32>
    %cst_71 = arith.constant dense<0.000000e+00> : vector<16x32xf32>
    %117 = tpu.matmul %27, %116, %cst_71 {dimension_numbers = #tpu.dot_dimension_numbers<[1], [0], [0], [1], [0, 0, 1, 1], [], []>} : vector<16x128xf32>, vector<128x32xf32>, vector<16x32xf32> -> vector<16x32xf32>
    %c0_72 = arith.constant 0 : index
    %c0_73 = arith.constant 0 : index
    %c64_74 = arith.constant 64 : index
    %118 = vector.load %arg6[%c0_72, %c0_73, %c64_74] : memref<1x1x128xf32, #tpu.memory_space<vmem>>, vector<1x1x32xf32>
    %119 = vector.shape_cast %118 : vector<1x1x32xf32> to vector<1x32xf32>
    %120 = vector.broadcast %119 : vector<1x32xf32> to vector<16x32xf32>
    %121 = arith.addf %117, %120 : vector<16x32xf32>
    %c0_75 = arith.constant 0 : index
    %c0_76 = arith.constant 0 : index
    %c64_77 = arith.constant 64 : index
    %122 = vector.load %arg7[%c0_75, %c0_76, %c64_77] : memref<1x128x128xbf16, #tpu.memory_space<vmem>>, vector<1x128x32xbf16>
    %123 = vector.shape_cast %122 : vector<1x128x32xbf16> to vector<128x32xbf16>
    %124 = arith.extf %123 : vector<128x32xbf16> to vector<128x32xf32>
    %cst_78 = arith.constant dense<0.000000e+00> : vector<16x32xf32>
    %125 = tpu.matmul %27, %124, %cst_78 {dimension_numbers = #tpu.dot_dimension_numbers<[1], [0], [0], [1], [0, 0, 1, 1], [], []>} : vector<16x128xf32>, vector<128x32xf32>, vector<16x32xf32> -> vector<16x32xf32>
    %c0_79 = arith.constant 0 : index
    %c0_80 = arith.constant 0 : index
    %c64_81 = arith.constant 64 : index
    %126 = vector.load %arg8[%c0_79, %c0_80, %c64_81] : memref<1x1x128xf32, #tpu.memory_space<vmem>>, vector<1x1x32xf32>
    %127 = vector.shape_cast %126 : vector<1x1x32xf32> to vector<1x32xf32>
    %128 = vector.broadcast %127 : vector<1x32xf32> to vector<16x32xf32>
    %129 = arith.addf %125, %128 : vector<16x32xf32>
    %c0_82 = arith.constant 0 : index
    %c0_83 = arith.constant 0 : index
    %c64_84 = arith.constant 64 : index
    %130 = vector.load %arg9[%c0_82, %c0_83, %c64_84] : memref<1x128x128xbf16, #tpu.memory_space<vmem>>, vector<1x128x32xbf16>
    %131 = vector.shape_cast %130 : vector<1x128x32xbf16> to vector<128x32xbf16>
    %132 = arith.extf %131 : vector<128x32xbf16> to vector<128x32xf32>
    %cst_85 = arith.constant dense<0.000000e+00> : vector<16x32xf32>
    %133 = tpu.matmul %27, %132, %cst_85 {dimension_numbers = #tpu.dot_dimension_numbers<[1], [0], [0], [1], [0, 0, 1, 1], [], []>} : vector<16x128xf32>, vector<128x32xf32>, vector<16x32xf32> -> vector<16x32xf32>
    %c0_86 = arith.constant 0 : index
    %c0_87 = arith.constant 0 : index
    %c64_88 = arith.constant 64 : index
    %134 = vector.load %arg10[%c0_86, %c0_87, %c64_88] : memref<1x1x128xf32, #tpu.memory_space<vmem>>, vector<1x1x32xf32>
    %135 = vector.shape_cast %134 : vector<1x1x32xf32> to vector<1x32xf32>
    %136 = vector.broadcast %135 : vector<1x32xf32> to vector<16x32xf32>
    %137 = arith.addf %133, %136 : vector<16x32xf32>
    %cst_89 = arith.constant dense<0.000000e+00> : vector<16x16xf32>
    %138 = tpu.matmul %121, %129, %cst_89 {dimension_numbers = #tpu.dot_dimension_numbers<[1], [1], [0], [0], [0, 0, 1, 0], [], []>} : vector<16x32xf32>, vector<16x32xf32>, vector<16x16xf32> -> vector<16x16xf32>
    %cst_90 = arith.constant 0.176776692 : f32
    %139 = vector.broadcast %cst_90 : f32 to vector<16x16xf32>
    %140 = arith.mulf %138, %139 : vector<16x16xf32>
    %cst_91 = arith.constant dense<0xFF800000> : vector<16xf32>
    %141 = vector.multi_reduction <maximumf>, %140, %cst_91 [1] : vector<16x16xf32> to vector<16xf32>
    %142 = vector.shape_cast %141 : vector<16xf32> to vector<16x1xf32>
    %143 = vector.broadcast %142 : vector<16x1xf32> to vector<16x16xf32>
    %144 = arith.subf %140, %143 : vector<16x16xf32>
    %145 = math.exp %144 : vector<16x16xf32>
    %cst_92 = arith.constant dense<0.000000e+00> : vector<16xf32>
    %146 = vector.multi_reduction <add>, %145, %cst_92 [1] : vector<16x16xf32> to vector<16xf32>
    %147 = vector.shape_cast %146 : vector<16xf32> to vector<16x1xf32>
    %148 = tpu.reciprocal %147 {approx = true} : vector<16x1xf32> -> vector<16x1xf32>
    %149 = vector.broadcast %148 : vector<16x1xf32> to vector<16x16xf32>
    %150 = arith.mulf %145, %149 : vector<16x16xf32>
    %cst_93 = arith.constant dense<0.000000e+00> : vector<16x32xf32>
    %151 = tpu.matmul %150, %137, %cst_93 {dimension_numbers = #tpu.dot_dimension_numbers<[1], [0], [0], [1], [0, 0, 1, 1], [], []>} : vector<16x16xf32>, vector<16x32xf32>, vector<16x32xf32> -> vector<16x32xf32>
    %152 = vector.extract_strided_slice %30 {offsets = [64, 0], sizes = [32, 128], strides = [1, 1]} : vector<128x128xf32> to vector<32x128xf32>
    %cst_94 = arith.constant dense<0.000000e+00> : vector<16x128xf32>
    %153 = tpu.matmul %151, %152, %cst_94 {dimension_numbers = #tpu.dot_dimension_numbers<[1], [0], [0], [1], [0, 0, 1, 1], [], []>} : vector<16x32xf32>, vector<32x128xf32>, vector<16x128xf32> -> vector<16x128xf32>
    %154 = arith.addf %113, %153 : vector<16x128xf32>
    %c0_95 = arith.constant 0 : index
    %c0_96 = arith.constant 0 : index
    %c96 = arith.constant 96 : index
    %155 = vector.load %arg5[%c0_95, %c0_96, %c96] : memref<1x128x128xbf16, #tpu.memory_space<vmem>>, vector<1x128x32xbf16>
    %156 = vector.shape_cast %155 : vector<1x128x32xbf16> to vector<128x32xbf16>
    %157 = arith.extf %156 : vector<128x32xbf16> to vector<128x32xf32>
    %cst_97 = arith.constant dense<0.000000e+00> : vector<16x32xf32>
    %158 = tpu.matmul %27, %157, %cst_97 {dimension_numbers = #tpu.dot_dimension_numbers<[1], [0], [0], [1], [0, 0, 1, 1], [], []>} : vector<16x128xf32>, vector<128x32xf32>, vector<16x32xf32> -> vector<16x32xf32>
    %c0_98 = arith.constant 0 : index
    %c0_99 = arith.constant 0 : index
    %c96_100 = arith.constant 96 : index
    %159 = vector.load %arg6[%c0_98, %c0_99, %c96_100] : memref<1x1x128xf32, #tpu.memory_space<vmem>>, vector<1x1x32xf32>
    %160 = vector.shape_cast %159 : vector<1x1x32xf32> to vector<1x32xf32>
    %161 = vector.broadcast %160 : vector<1x32xf32> to vector<16x32xf32>
    %162 = arith.addf %158, %161 : vector<16x32xf32>
    %c0_101 = arith.constant 0 : index
    %c0_102 = arith.constant 0 : index
    %c96_103 = arith.constant 96 : index
    %163 = vector.load %arg7[%c0_101, %c0_102, %c96_103] : memref<1x128x128xbf16, #tpu.memory_space<vmem>>, vector<1x128x32xbf16>
    %164 = vector.shape_cast %163 : vector<1x128x32xbf16> to vector<128x32xbf16>
    %165 = arith.extf %164 : vector<128x32xbf16> to vector<128x32xf32>
    %cst_104 = arith.constant dense<0.000000e+00> : vector<16x32xf32>
    %166 = tpu.matmul %27, %165, %cst_104 {dimension_numbers = #tpu.dot_dimension_numbers<[1], [0], [0], [1], [0, 0, 1, 1], [], []>} : vector<16x128xf32>, vector<128x32xf32>, vector<16x32xf32> -> vector<16x32xf32>
    %c0_105 = arith.constant 0 : index
    %c0_106 = arith.constant 0 : index
    %c96_107 = arith.constant 96 : index
    %167 = vector.load %arg8[%c0_105, %c0_106, %c96_107] : memref<1x1x128xf32, #tpu.memory_space<vmem>>, vector<1x1x32xf32>
    %168 = vector.shape_cast %167 : vector<1x1x32xf32> to vector<1x32xf32>
    %169 = vector.broadcast %168 : vector<1x32xf32> to vector<16x32xf32>
    %170 = arith.addf %166, %169 : vector<16x32xf32>
    %c0_108 = arith.constant 0 : index
    %c0_109 = arith.constant 0 : index
    %c96_110 = arith.constant 96 : index
    %171 = vector.load %arg9[%c0_108, %c0_109, %c96_110] : memref<1x128x128xbf16, #tpu.memory_space<vmem>>, vector<1x128x32xbf16>
    %172 = vector.shape_cast %171 : vector<1x128x32xbf16> to vector<128x32xbf16>
    %173 = arith.extf %172 : vector<128x32xbf16> to vector<128x32xf32>
    %cst_111 = arith.constant dense<0.000000e+00> : vector<16x32xf32>
    %174 = tpu.matmul %27, %173, %cst_111 {dimension_numbers = #tpu.dot_dimension_numbers<[1], [0], [0], [1], [0, 0, 1, 1], [], []>} : vector<16x128xf32>, vector<128x32xf32>, vector<16x32xf32> -> vector<16x32xf32>
    %c0_112 = arith.constant 0 : index
    %c0_113 = arith.constant 0 : index
    %c96_114 = arith.constant 96 : index
    %175 = vector.load %arg10[%c0_112, %c0_113, %c96_114] : memref<1x1x128xf32, #tpu.memory_space<vmem>>, vector<1x1x32xf32>
    %176 = vector.shape_cast %175 : vector<1x1x32xf32> to vector<1x32xf32>
    %177 = vector.broadcast %176 : vector<1x32xf32> to vector<16x32xf32>
    %178 = arith.addf %174, %177 : vector<16x32xf32>
    %cst_115 = arith.constant dense<0.000000e+00> : vector<16x16xf32>
    %179 = tpu.matmul %162, %170, %cst_115 {dimension_numbers = #tpu.dot_dimension_numbers<[1], [1], [0], [0], [0, 0, 1, 0], [], []>} : vector<16x32xf32>, vector<16x32xf32>, vector<16x16xf32> -> vector<16x16xf32>
    %cst_116 = arith.constant 0.176776692 : f32
    %180 = vector.broadcast %cst_116 : f32 to vector<16x16xf32>
    %181 = arith.mulf %179, %180 : vector<16x16xf32>
    %cst_117 = arith.constant dense<0xFF800000> : vector<16xf32>
    %182 = vector.multi_reduction <maximumf>, %181, %cst_117 [1] : vector<16x16xf32> to vector<16xf32>
    %183 = vector.shape_cast %182 : vector<16xf32> to vector<16x1xf32>
    %184 = vector.broadcast %183 : vector<16x1xf32> to vector<16x16xf32>
    %185 = arith.subf %181, %184 : vector<16x16xf32>
    %186 = math.exp %185 : vector<16x16xf32>
    %cst_118 = arith.constant dense<0.000000e+00> : vector<16xf32>
    %187 = vector.multi_reduction <add>, %186, %cst_118 [1] : vector<16x16xf32> to vector<16xf32>
    %188 = vector.shape_cast %187 : vector<16xf32> to vector<16x1xf32>
    %189 = tpu.reciprocal %188 {approx = true} : vector<16x1xf32> -> vector<16x1xf32>
    %190 = vector.broadcast %189 : vector<16x1xf32> to vector<16x16xf32>
    %191 = arith.mulf %186, %190 : vector<16x16xf32>
    %cst_119 = arith.constant dense<0.000000e+00> : vector<16x32xf32>
    %192 = tpu.matmul %191, %178, %cst_119 {dimension_numbers = #tpu.dot_dimension_numbers<[1], [0], [0], [1], [0, 0, 1, 1], [], []>} : vector<16x16xf32>, vector<16x32xf32>, vector<16x32xf32> -> vector<16x32xf32>
    %193 = vector.extract_strided_slice %30 {offsets = [96, 0], sizes = [32, 128], strides = [1, 1]} : vector<128x128xf32> to vector<32x128xf32>
    %cst_120 = arith.constant dense<0.000000e+00> : vector<16x128xf32>
    %194 = tpu.matmul %192, %193, %cst_120 {dimension_numbers = #tpu.dot_dimension_numbers<[1], [0], [0], [1], [0, 0, 1, 1], [], []>} : vector<16x32xf32>, vector<32x128xf32>, vector<16x128xf32> -> vector<16x128xf32>
    %195 = arith.addf %154, %194 : vector<16x128xf32>
    %c0_121 = arith.constant 0 : index
    %c0_122 = arith.constant 0 : index
    %c0_123 = arith.constant 0 : index
    %196 = vector.load %arg12[%c0_121, %c0_122, %c0_123] : memref<1x1x128xf32, #tpu.memory_space<vmem>>, vector<1x1x128xf32>
    %197 = vector.shape_cast %196 : vector<1x1x128xf32> to vector<1x128xf32>
    %198 = vector.broadcast %197 : vector<1x128xf32> to vector<16x128xf32>
    %199 = arith.addf %195, %198 : vector<16x128xf32>
    %200 = arith.mulf %3, %199 : vector<16x128xf32>
    %cst_124 = arith.constant dense<0.000000e+00> : vector<16xf32>
    %201 = vector.multi_reduction <add>, %200, %cst_124 [1] : vector<16x128xf32> to vector<16xf32>
    %202 = vector.shape_cast %201 : vector<16xf32> to vector<16x1xf32>
    %203 = arith.mulf %3, %3 : vector<16x128xf32>
    %cst_125 = arith.constant dense<0.000000e+00> : vector<16xf32>
    %204 = vector.multi_reduction <add>, %203, %cst_125 [1] : vector<16x128xf32> to vector<16xf32>
    %205 = vector.shape_cast %204 : vector<16xf32> to vector<16x1xf32>
    %cst_126 = arith.constant 9.99999997E-7 : f32
    %206 = vector.broadcast %cst_126 : f32 to vector<16x1xf32>
    %207 = arith.addf %205, %206 : vector<16x1xf32>
    %208 = tpu.reciprocal %207 {approx = true} : vector<16x1xf32> -> vector<16x1xf32>
    %209 = arith.mulf %202, %208 : vector<16x1xf32>
    %210 = arith.addf %3, %199 : vector<16x128xf32>
    %211 = vector.broadcast %209 : vector<16x1xf32> to vector<16x128xf32>
    %212 = arith.mulf %211, %3 : vector<16x128xf32>
    %213 = arith.subf %210, %212 : vector<16x128xf32>
    %c0_127 = arith.constant 0 : index
    %c0_128 = arith.constant 0 : index
    %c0_129 = arith.constant 0 : index
    %214 = vector.load %arg13[%c0_127, %c0_128, %c0_129] : memref<1x1x128xf32, #tpu.memory_space<vmem>>, vector<1x1x128xf32>
    %215 = vector.shape_cast %214 : vector<1x1x128xf32> to vector<1x128xf32>
    %c0_130 = arith.constant 0 : index
    %c0_131 = arith.constant 0 : index
    %c0_132 = arith.constant 0 : index
    %216 = vector.load %arg14[%c0_130, %c0_131, %c0_132] : memref<1x1x128xf32, #tpu.memory_space<vmem>>, vector<1x1x128xf32>
    %217 = vector.shape_cast %216 : vector<1x1x128xf32> to vector<1x128xf32>
    %cst_133 = arith.constant dense<0.000000e+00> : vector<16xf32>
    %218 = vector.multi_reduction <add>, %213, %cst_133 [1] : vector<16x128xf32> to vector<16xf32>
    %219 = vector.shape_cast %218 : vector<16xf32> to vector<16x1xf32>
    %cst_134 = arith.constant 1.280000e+02 : f32
    %220 = vector.broadcast %cst_134 : f32 to vector<16x1xf32>
    %221 = arith.divf %219, %220 : vector<16x1xf32>
    %222 = vector.broadcast %221 : vector<16x1xf32> to vector<16x128xf32>
    %223 = arith.subf %213, %222 : vector<16x128xf32>
    %224 = arith.mulf %223, %223 : vector<16x128xf32>
    %cst_135 = arith.constant dense<0.000000e+00> : vector<16xf32>
    %225 = vector.multi_reduction <add>, %224, %cst_135 [1] : vector<16x128xf32> to vector<16xf32>
    %226 = vector.shape_cast %225 : vector<16xf32> to vector<16x1xf32>
    %cst_136 = arith.constant 1.280000e+02 : f32
    %227 = vector.broadcast %cst_136 : f32 to vector<16x1xf32>
    %228 = arith.divf %226, %227 : vector<16x1xf32>
    %cst_137 = arith.constant 9.99999996E-13 : f32
    %229 = vector.broadcast %cst_137 : f32 to vector<16x1xf32>
    %230 = arith.addf %228, %229 : vector<16x1xf32>
    %231 = math.rsqrt %230 : vector<16x1xf32>
    %232 = vector.broadcast %231 : vector<16x1xf32> to vector<16x128xf32>
    %233 = arith.mulf %223, %232 : vector<16x128xf32>
    %234 = vector.broadcast %215 : vector<1x128xf32> to vector<16x128xf32>
    %235 = arith.mulf %233, %234 : vector<16x128xf32>
    %236 = vector.broadcast %217 : vector<1x128xf32> to vector<16x128xf32>
    %237 = arith.addf %235, %236 : vector<16x128xf32>
    %c0_138 = arith.constant 0 : index
    %c0_139 = arith.constant 0 : index
    %c0_140 = arith.constant 0 : index
    %238 = vector.load %arg15[%c0_138, %c0_139, %c0_140] : memref<1x128x256xbf16, #tpu.memory_space<vmem>>, vector<1x128x256xbf16>
    %239 = vector.shape_cast %238 : vector<1x128x256xbf16> to vector<128x256xbf16>
    %240 = arith.extf %239 : vector<128x256xbf16> to vector<128x256xf32>
    %cst_141 = arith.constant dense<0.000000e+00> : vector<16x256xf32>
    %241 = tpu.matmul %237, %240, %cst_141 {dimension_numbers = #tpu.dot_dimension_numbers<[1], [0], [0], [1], [0, 0, 1, 1], [], []>} : vector<16x128xf32>, vector<128x256xf32>, vector<16x256xf32> -> vector<16x256xf32>
    %c0_142 = arith.constant 0 : index
    %c0_143 = arith.constant 0 : index
    %c0_144 = arith.constant 0 : index
    %242 = vector.load %arg16[%c0_142, %c0_143, %c0_144] : memref<1x1x256xf32, #tpu.memory_space<vmem>>, vector<1x1x256xf32>
    %243 = vector.shape_cast %242 : vector<1x1x256xf32> to vector<1x256xf32>
    %244 = vector.broadcast %243 : vector<1x256xf32> to vector<16x256xf32>
    %245 = arith.addf %241, %244 : vector<16x256xf32>
    %cst_145 = arith.constant 5.000000e-01 : f32
    %246 = vector.broadcast %cst_145 : f32 to vector<16x256xf32>
    %247 = arith.mulf %246, %245 : vector<16x256xf32>
    %cst_146 = arith.constant 0.707106769 : f32
    %248 = vector.broadcast %cst_146 : f32 to vector<16x256xf32>
    %249 = arith.mulf %245, %248 : vector<16x256xf32>
    %cst_147 = arith.constant 0.000000e+00 : f32
    %250 = vector.broadcast %cst_147 : f32 to vector<16x256xf32>
    %251 = arith.cmpf oge, %249, %250 : vector<16x256xf32>
    %cst_148 = arith.constant 1.000000e+00 : f32
    %cst_149 = arith.constant -1.000000e+00 : f32
    %252 = vector.broadcast %cst_148 : f32 to vector<16x256xf32>
    %253 = vector.broadcast %cst_149 : f32 to vector<16x256xf32>
    %254 = arith.select %251, %252, %253 : vector<16x256xi1>, vector<16x256xf32>
    %255 = math.absf %249 : vector<16x256xf32>
    %cst_150 = arith.constant 0.327591091 : f32
    %256 = vector.broadcast %cst_150 : f32 to vector<16x256xf32>
    %257 = arith.mulf %256, %255 : vector<16x256xf32>
    %cst_151 = arith.constant 1.000000e+00 : f32
    %258 = vector.broadcast %cst_151 : f32 to vector<16x256xf32>
    %259 = arith.addf %258, %257 : vector<16x256xf32>
    %cst_152 = arith.constant 1.000000e+00 : f32
    %260 = vector.broadcast %cst_152 : f32 to vector<16x256xf32>
    %261 = arith.divf %260, %259 : vector<16x256xf32>
    %cst_153 = arith.constant 1.06140542 : f32
    %262 = vector.broadcast %cst_153 : f32 to vector<16x256xf32>
    %263 = arith.mulf %261, %262 : vector<16x256xf32>
    %cst_154 = arith.constant -1.45315206 : f32
    %264 = vector.broadcast %cst_154 : f32 to vector<16x256xf32>
    %265 = arith.addf %264, %263 : vector<16x256xf32>
    %266 = arith.mulf %261, %265 : vector<16x256xf32>
    %cst_155 = arith.constant 1.42141378 : f32
    %267 = vector.broadcast %cst_155 : f32 to vector<16x256xf32>
    %268 = arith.addf %267, %266 : vector<16x256xf32>
    %269 = arith.mulf %261, %268 : vector<16x256xf32>
    %cst_156 = arith.constant -0.284496725 : f32
    %270 = vector.broadcast %cst_156 : f32 to vector<16x256xf32>
    %271 = arith.addf %270, %269 : vector<16x256xf32>
    %272 = arith.mulf %261, %271 : vector<16x256xf32>
    %cst_157 = arith.constant 0.254829586 : f32
    %273 = vector.broadcast %cst_157 : f32 to vector<16x256xf32>
    %274 = arith.addf %273, %272 : vector<16x256xf32>
    %275 = arith.mulf %261, %274 : vector<16x256xf32>
    %cst_158 = arith.constant 0.000000e+00 : f32
    %276 = vector.broadcast %cst_158 : f32 to vector<16x256xf32>
    %277 = arith.subf %276, %255 : vector<16x256xf32>
    %278 = arith.mulf %277, %255 : vector<16x256xf32>
    %279 = math.exp %278 : vector<16x256xf32>
    %280 = arith.mulf %275, %279 : vector<16x256xf32>
    %cst_159 = arith.constant 1.000000e+00 : f32
    %281 = vector.broadcast %cst_159 : f32 to vector<16x256xf32>
    %282 = arith.subf %281, %280 : vector<16x256xf32>
    %283 = arith.mulf %254, %282 : vector<16x256xf32>
    %cst_160 = arith.constant 1.000000e+00 : f32
    %284 = vector.broadcast %cst_160 : f32 to vector<16x256xf32>
    %285 = arith.addf %284, %283 : vector<16x256xf32>
    %286 = arith.mulf %247, %285 : vector<16x256xf32>
    %c0_161 = arith.constant 0 : index
    %c0_162 = arith.constant 0 : index
    %c0_163 = arith.constant 0 : index
    %287 = vector.load %arg17[%c0_161, %c0_162, %c0_163] : memref<1x256x128xbf16, #tpu.memory_space<vmem>>, vector<1x256x128xbf16>
    %288 = vector.shape_cast %287 : vector<1x256x128xbf16> to vector<256x128xbf16>
    %289 = arith.extf %288 : vector<256x128xbf16> to vector<256x128xf32>
    %cst_164 = arith.constant dense<0.000000e+00> : vector<16x128xf32>
    %290 = tpu.matmul %286, %289, %cst_164 {dimension_numbers = #tpu.dot_dimension_numbers<[1], [0], [0], [1], [0, 0, 1, 1], [], []>} : vector<16x256xf32>, vector<256x128xf32>, vector<16x128xf32> -> vector<16x128xf32>
    %c0_165 = arith.constant 0 : index
    %c0_166 = arith.constant 0 : index
    %c0_167 = arith.constant 0 : index
    %291 = vector.load %arg18[%c0_165, %c0_166, %c0_167] : memref<1x1x128xf32, #tpu.memory_space<vmem>>, vector<1x1x128xf32>
    %292 = vector.shape_cast %291 : vector<1x1x128xf32> to vector<1x128xf32>
    %293 = vector.broadcast %292 : vector<1x128xf32> to vector<16x128xf32>
    %294 = arith.addf %290, %293 : vector<16x128xf32>
    %295 = arith.mulf %213, %294 : vector<16x128xf32>
    %cst_168 = arith.constant dense<0.000000e+00> : vector<16xf32>
    %296 = vector.multi_reduction <add>, %295, %cst_168 [1] : vector<16x128xf32> to vector<16xf32>
    %297 = vector.shape_cast %296 : vector<16xf32> to vector<16x1xf32>
    %298 = arith.mulf %213, %213 : vector<16x128xf32>
    %cst_169 = arith.constant dense<0.000000e+00> : vector<16xf32>
    %299 = vector.multi_reduction <add>, %298, %cst_169 [1] : vector<16x128xf32> to vector<16xf32>
    %300 = vector.shape_cast %299 : vector<16xf32> to vector<16x1xf32>
    %cst_170 = arith.constant 9.99999997E-7 : f32
    %301 = vector.broadcast %cst_170 : f32 to vector<16x1xf32>
    %302 = arith.addf %300, %301 : vector<16x1xf32>
    %303 = tpu.reciprocal %302 {approx = true} : vector<16x1xf32> -> vector<16x1xf32>
    %304 = arith.mulf %297, %303 : vector<16x1xf32>
    %305 = arith.addf %213, %294 : vector<16x128xf32>
    %306 = vector.broadcast %304 : vector<16x1xf32> to vector<16x128xf32>
    %307 = arith.mulf %306, %213 : vector<16x128xf32>
    %308 = arith.subf %305, %307 : vector<16x128xf32>
    %c0_171 = arith.constant 0 : index
    %c0_172 = arith.constant 0 : index
    %309 = vector.load %arg20[%c0_171, %c0_172] : memref<16x128xf32, #tpu.memory_space<vmem>>, vector<16x128xf32>
    tpu.vector_store %arg20[%c0_171, %c0_172], %308 {strides = array<i32>} : memref<16x128xf32, #tpu.memory_space<vmem>>, vector<16x128xf32>,
    %c1_i32 = arith.constant 1 : i32
    %310 = arith.cmpi eq, %arg1, %c1_i32 : i32
    %311 = arith.extui %310 : i1 to i32
    %c0_i32_173 = arith.constant 0 : i32
    %312 = arith.cmpi ne, %311, %c0_i32_173 : i32
    scf.if %312 {
      %c0_174 = arith.constant 0 : index
      %c0_175 = arith.constant 0 : index
      %c0_176 = arith.constant 0 : index
      %313 = vector.load %arg19[%c0_174, %c0_175, %c0_176] : memref<1x16x128xf32, #tpu.memory_space<vmem>>, vector<1x16x128xf32>
      %314 = vector.shape_cast %313 : vector<1x16x128xf32> to vector<16x128xf32>
      %315 = vector.shape_cast %308 : vector<16x128xf32> to vector<1x16x128xf32>
      tpu.vector_store %arg19[%c0_174, %c0_175, %c0_176], %315 {strides = array<i32>} : memref<1x16x128xf32, #tpu.memory_space<vmem>>, vector<1x16x128xf32>,
    } else {
    }
    return
  }
  func.func @transform_0(%arg0: i32, %arg1: i32) -> (i32, i32, i32) {
    %c0_i32 = arith.constant 0 : i32
    %c0_i32_0 = arith.constant 0 : i32
    %c0_i32_1 = arith.constant 0 : i32
    return %arg0, %c0_i32, %c0_i32_0 : i32, i32, i32
  }
  func.func @transform_1(%arg0: i32, %arg1: i32) -> (i32, i32, i32) {
    %c0_i32 = arith.constant 0 : i32
    %c0_i32_0 = arith.constant 0 : i32
    %c0_i32_1 = arith.constant 0 : i32
    return %arg1, %c0_i32, %c0_i32_0 : i32, i32, i32
  }
  func.func @transform_2(%arg0: i32, %arg1: i32) -> (i32, i32, i32) {
    %c0_i32 = arith.constant 0 : i32
    %c0_i32_0 = arith.constant 0 : i32
    %c0_i32_1 = arith.constant 0 : i32
    return %arg1, %c0_i32, %c0_i32_0 : i32, i32, i32
  }
  func.func @transform_3(%arg0: i32, %arg1: i32) -> (i32, i32, i32) {
    %c0_i32 = arith.constant 0 : i32
    %c0_i32_0 = arith.constant 0 : i32
    %c0_i32_1 = arith.constant 0 : i32
    return %arg1, %c0_i32, %c0_i32_0 : i32, i32, i32
  }
  func.func @transform_4(%arg0: i32, %arg1: i32) -> (i32, i32, i32) {
    %c0_i32 = arith.constant 0 : i32
    %c0_i32_0 = arith.constant 0 : i32
    %c0_i32_1 = arith.constant 0 : i32
    return %arg1, %c0_i32, %c0_i32_0 : i32, i32, i32
  }
  func.func @transform_5(%arg0: i32, %arg1: i32) -> (i32, i32, i32) {
    %c0_i32 = arith.constant 0 : i32
    %c0_i32_0 = arith.constant 0 : i32
    %c0_i32_1 = arith.constant 0 : i32
    return %arg1, %c0_i32, %c0_i32_0 : i32, i32, i32
  }
  func.func @transform_6(%arg0: i32, %arg1: i32) -> (i32, i32, i32) {
    %c0_i32 = arith.constant 0 : i32
    %c0_i32_0 = arith.constant 0 : i32
    %c0_i32_1 = arith.constant 0 : i32
    return %arg1, %c0_i32, %c0_i32_0 : i32, i32, i32
  }
  func.func @transform_7(%arg0: i32, %arg1: i32) -> (i32, i32, i32) {
    %c0_i32 = arith.constant 0 : i32
    %c0_i32_0 = arith.constant 0 : i32
    %c0_i32_1 = arith.constant 0 : i32
    return %arg1, %c0_i32, %c0_i32_0 : i32, i32, i32
  }
  func.func @transform_8(%arg0: i32, %arg1: i32) -> (i32, i32, i32) {
    %c0_i32 = arith.constant 0 : i32
    %c0_i32_0 = arith.constant 0 : i32
    %c0_i32_1 = arith.constant 0 : i32
    return %arg1, %c0_i32, %c0_i32_0 : i32, i32, i32
  }
  func.func @transform_9(%arg0: i32, %arg1: i32) -> (i32, i32, i32) {
    %c0_i32 = arith.constant 0 : i32
    %c0_i32_0 = arith.constant 0 : i32
    %c0_i32_1 = arith.constant 0 : i32
    return %arg1, %c0_i32, %c0_i32_0 : i32, i32, i32
  }
  func.func @transform_10(%arg0: i32, %arg1: i32) -> (i32, i32, i32) {
    %c0_i32 = arith.constant 0 : i32
    %c0_i32_0 = arith.constant 0 : i32
    %c0_i32_1 = arith.constant 0 : i32
    return %arg1, %c0_i32, %c0_i32_0 : i32, i32, i32
  }
  func.func @transform_11(%arg0: i32, %arg1: i32) -> (i32, i32, i32) {
    %c0_i32 = arith.constant 0 : i32
    %c0_i32_0 = arith.constant 0 : i32
    %c0_i32_1 = arith.constant 0 : i32
    return %arg1, %c0_i32, %c0_i32_0 : i32, i32, i32
  }
  func.func @transform_12(%arg0: i32, %arg1: i32) -> (i32, i32, i32) {
    %c0_i32 = arith.constant 0 : i32
    %c0_i32_0 = arith.constant 0 : i32
    %c0_i32_1 = arith.constant 0 : i32
    return %arg1, %c0_i32, %c0_i32_0 : i32, i32, i32
  }
  func.func @transform_13(%arg0: i32, %arg1: i32) -> (i32, i32, i32) {
    %c0_i32 = arith.constant 0 : i32
    %c0_i32_0 = arith.constant 0 : i32
    %c0_i32_1 = arith.constant 0 : i32
    return %arg1, %c0_i32, %c0_i32_0 : i32, i32, i32
  }
  func.func @transform_14(%arg0: i32, %arg1: i32) -> (i32, i32, i32) {
    %c0_i32 = arith.constant 0 : i32
    %c0_i32_0 = arith.constant 0 : i32
    %c0_i32_1 = arith.constant 0 : i32
    return %arg1, %c0_i32, %c0_i32_0 : i32, i32, i32
  }
  func.func @transform_15(%arg0: i32, %arg1: i32) -> (i32, i32, i32) {
    %c0_i32 = arith.constant 0 : i32
    %c0_i32_0 = arith.constant 0 : i32
    %c0_i32_1 = arith.constant 0 : i32
    return %arg1, %c0_i32, %c0_i32_0 : i32, i32, i32
  }
  func.func @transform_16(%arg0: i32, %arg1: i32) -> (i32, i32, i32) {
    %c0_i32 = arith.constant 0 : i32
    %c0_i32_0 = arith.constant 0 : i32
    %c0_i32_1 = arith.constant 0 : i32
    return %arg1, %c0_i32, %c0_i32_0 : i32, i32, i32
  }
  func.func @transform_17(%arg0: i32, %arg1: i32) -> (i32, i32, i32) {
    %c0_i32 = arith.constant 0 : i32
    %c0_i32_0 = arith.constant 0 : i32
    %c0_i32_1 = arith.constant 0 : i32
    return %arg0, %c0_i32, %c0_i32_0 : i32, i32, i32
  }
}

</mosaic_0001>

<bundles_post_ra>
// kernel: tpu_custom_call.1
= control target key start
LH: loop header
LB: loop body
LE: loop exit
PB: predicated region body
PF: predicated region fallthrough
CT: control target
= control target key end

     0   :  { %s8017_s0 = inlined_call_operand.hbm [shape: f32[2,16,128], index: 0, kind: input, shape index: {}]   ;;  %s8018_s1 = inlined_call_operand.hbm [shape: f32[2,1,128], index: 1, kind: input, shape index: {}]   ;;  %s8019_s2 = inlined_call_operand.vmem [shape: f32[2,1,128], index: 2, kind: input, shape index: {}]   ;;  %s8020_s3 = inlined_call_operand.hbm [shape: bf16[2,128,128], index: 3, kind: input, shape index: {}]   ;;  %s8021_s4 = inlined_call_operand.hbm [shape: f32[2,1,128], index: 4, kind: input, shape index: {}]   ;;  %s8022_s5 = inlined_call_operand.hbm [shape: bf16[2,128,128], index: 5, kind: input, shape index: {}]   ;;  %s8023_s6 = inlined_call_operand.vmem [shape: f32[2,1,128], index: 6, kind: input, shape index: {}]   ;;  %s8024_s7 = inlined_call_operand.hbm [shape: bf16[2,128,128], index: 7, kind: input, shape index: {}]   ;;  %s8025_s8 = inlined_call_operand.vmem [shape: f32[2,1,128], index: 8, kind: input, shape index: {}]   ;;  %s8026_s9 = inlined_call_operand.hbm [shape: bf16[2,128,128], index: 9, kind: input, shape index: {}]   ;;  %s8027_s10 = inlined_call_operand.vmem [shape: f32[2,1,128], index: 10, kind: input, shape index: {}]   ;;  %s8028_s11 = inlined_call_operand.vmem [shape: f32[2,1,128], index: 11, kind: input, shape index: {}]   ;;  %s8029_s12 = inlined_call_operand.vmem [shape: f32[2,1,128], index: 12, kind: input, shape index: {}]   ;;  %s8030_s13 = inlined_call_operand.hbm [shape: bf16[2,128,256], index: 13, kind: input, shape index: {}]   ;;  %s8031_s14 = inlined_call_operand.vmem [shape: f32[2,1,256], index: 14, kind: input, shape index: {}]   ;;  %s8032_s15 = inlined_call_operand.hbm [shape: bf16[2,256,128], index: 15, kind: input, shape index: {}]   ;;  %s8033_s16 = inlined_call_operand.vmem [shape: f32[2,1,128], index: 16, kind: input, shape index: {}]   ;;  %s8034_s17 = inlined_call_operand.hbm [shape: f32[2,16,128], index: 17, kind: output, shape index: {}]  }
   0x1   :  { %8085 = sst [smem:[#allocation49_spill]] %s8017_s0 }
   0x2   :  { %8086 = sst [smem:[#allocation50_spill]] %s8018_s1 }
   0x3   :  { %8087 = sst [smem:[#allocation51_spill]] %s8019_s2 }
   0x4   :  { %8088 = sst [smem:[#allocation52_spill]] %s8020_s3 }
   0x5   :  { %8089 = sst [smem:[#allocation53_spill]] %s8021_s4 }
   0x6   :  { %8090 = sst [smem:[#allocation54_spill]] %s8022_s5 }
   0x7   :  { %8091 = sst [smem:[#allocation55_spill]] %s8023_s6 }
   0x8   :  { %8092 = sst [smem:[#allocation56_spill]] %s8024_s7 }
   0x9   :  { %8093 = sst [smem:[#allocation57_spill]] %s8025_s8 }
   0xa   :  { %8094 = sst [smem:[#allocation58_spill]] %s8026_s9 }
   0xb   :  { %8095 = sst [smem:[#allocation59_spill]] %s8027_s10 }
   0xc   :  { %8096 = sst [smem:[#allocation60_spill]] %s8028_s11 }
   0xd   :  { %8097 = sst [smem:[#allocation61_spill]] %s8029_s12 }
   0xe   :  { %8098 = sst [smem:[#allocation62_spill]] %s8030_s13 }
   0xf   :  { %8099 = sst [smem:[#allocation63_spill]] %s8031_s14 }
  0x10   :  { %8100 = sst [smem:[#allocation64_spill]] %s8032_s15 }
  0x11   :  { %8101 = sst [smem:[#allocation65_spill]] %s8033_s16 }
  0x12   :  { %8102 = sst [smem:[#allocation66_spill]] %s8034_s17 }
  0x13   :  { %22 = vsyncpa [#allocation4], 0 }
  0x14   :  { %24 = vsyncpa [#allocation4 + $0x1], 0 }
  0x15   :  { %25 = vsyncpa [#allocation7], 0 }
  0x16   :  { %27 = vsyncpa [#allocation7 + $0x1], 0 }
  0x17   :  { %28 = vsyncpa [#allocation10], 0 }
  0x18   :  { %30 = vsyncpa [#allocation10 + $0x1], 0 }
  0x19   :  { %31 = vsyncpa [#allocation13], 0 }
  0x1a   :  { %33 = vsyncpa [#allocation13 + $0x1], 0 }
  0x1b   :  { %34 = vsyncpa [#allocation16], 0 }
  0x1c   :  { %36 = vsyncpa [#allocation16 + $0x1], 0 }
  0x1d   :  { %37 = vsyncpa [#allocation5], 0 }
  0x1e   :  { %39 = vsyncpa [#allocation5 + $0x1], 0  ;;  %s6636_s24 = smov 0   ;;  %s6638_s25 = smov 0  }
  0x1f   :  { %s6640_s26 = smov 0   ;;  %s6642_s27 = smov 0  }
  0x20   :  { %s6644_s28 = smov 0   ;;  %s6646_s29 = smov 0  }
  0x21   :  { %s6648_s0 = smov 0   ;;  %s6650_s30 = smov 0  }
  0x22   :  { %s6652_s18 = smov 0   ;;  %s6654_s19 = smov 0  }
  0x23   :  { %s6656_s1 = smov 0  }
  0x24 LB: > { %8103 = sst [smem:[#allocation25_spill]] %s6487_s25  ;;  %s6690_s20 = sadd.s32 4294967295, %s6523_s1   ;;  %s6523_s1 = sphi %s6656_s1, %s45_s1   ;;  %s6519_s19 = sphi %s6654_s19, %s8208_s19   ;;  %s6515_s18 = sphi %s6652_s18, %s8207_s18   ;;  %s6511_s30 = sphi %s6650_s30, %s8206_s30   ;;  %s6507_s0 = sphi %s6648_s0, %s8205_s0   ;;  %s6503_s29 = sphi %s6646_s29, %s8204_s29   ;;  %s6499_s28 = sphi %s6644_s28, %s8203_s28   ;;  %s6495_s27 = sphi %s6642_s27, %s8202_s27   ;;  %s6491_s26 = sphi %s6640_s26, %s8201_s26   ;;  %s6487_s25 = sphi %s6638_s25, %s8200_s25   ;;  %s6483_s24 = sphi %s6636_s24, %s8199_s24  }
  0x25   : > { %8104 = sst [smem:[#allocation26_spill]] %s6491_s26  ;;  %s54_s21 = sadd.s32 1, %s6515_s18 }
  0x26   : > { %8105 = sst [smem:[#allocation27_spill]] %s6495_s27  ;;  %p6693_p0 = scmp.ge.s32.totalorder %s54_s21, 2 }
  0x27   : > { %8106 = sst [smem:[#allocation28_spill]] %s6499_s28  ;;  %p72_p1 = scmp.eq.s32.totalorder %s6523_s1, 0 }
  0x28   : > { %8107 = sst [smem:[#allocation29_spill]] %s6503_s29  ;;  %p8039_p2 = scmp.eq.s32.totalorder %s6690_s20, 0 }
  0x29   : > { %8108 = sst [smem:[#allocation30_spill]] %s6507_s0  ;;  %s90_s23 = sadd.s32 1, %s6491_s26 }
  0x2a   : > { %8109 = sst [smem:[#allocation31_spill]] %s6511_s30  ;;  %s8210_s21 = smov (%p6693_p0, %s54_s21), 0 }
  0x2b   : > { %8110 = sst [smem:[#allocation32_spill]] %s6515_s18  ;;  %p97_p3 = scmp.ne.s32.totalorder %s6491_s26, %s6487_s25 }
  0x2c   : > { %8111 = sst [smem:[#allocation33_spill]] %s6519_s19  ;;  %p103_p4 = scmp.ne.s32.totalorder %s6487_s25, %s6483_s24 }
  0x2d   : > { %8112 = sst [smem:[#allocation34_spill]] %s6523_s1  ;;  %s87_s17 = ssub.s32 %s6515_s18, %s8210_s21 }
  0x2e   : > { %8114 = sst [smem:[#allocation35_spill]] %s8210_s21  ;;  %p88_p5 = scmp.eq.s32.totalorder %s87_s17, 0 }
  0x2f   : > { %p99_p6 = por %p97_p3, %p72_p1  ;;  %p6713_p7 = por %p103_p4, %p8039_p2 }
  0x30   : > { %p8038_p8 = scmp.lt.s32.totalorder %s6523_s1, 4  ;;  %s6722_s16 = sand.u32 1, %s6523_s1  }
  0x31   : > { %s8115_s30 = scalar_select %p6713_p7, 1, 0 }
  0x32   : > { %s6719_s14 = scalar_select %p88_p5, %s6491_s26, %s90_s23  }
  0x33   : > { %8116 = sst [smem:[#allocation36_spill]] %s8115_s30  ;;  %s6725_s12 = sand.u32 1, %s6491_s26  }
  0x34   : > { %8117 = sst [smem:[#allocation37_spill]] %s6719_s14  ;;  %s4537_s24 = sshll.u32 %s6515_s18, 4 }
  0x35   : > { %s567_s21 = scalar_lea.vmem [#allocation6], %s6725_s12  ;;  %s8118_s8 = sld [smem:[#allocation50_spill]] }
  0x36   : > { %s574_s17 = sshll.u32 %s567_s21, 4  ;;  %p6734_p9 = pnand %p8038_p8, %p99_p6  ;;  %s575_s17 = int_to_ptr.vmem [resolvable:$true] %s574_s17 }
  0x37   : > { %s6739_s23 = sshll.u32 %s6725_s12, 6  ;;  %p4557_p10 = scmp.ge.s32.totalorder %s6523_s1, 1 }
  0x38   : > { %8120 = sst [smem:[#allocation38_spill]] %s6739_s23  ;;  %p771_p11 = scmp.lt.s32.totalorder %s6523_s1, 5 }
  0x39   : > { %s8046_s14 = scalar_lea.sflag [#allocation7], %s6722_s16  ;;  %p6746_p12 = pneg %p6734_p9 }
  0x3a   : > { %s6148_s10 = scalar_lea.vmem %s575_s17, 16 }
  0x3b   : > { %s572_s6 = scalar_lea.hbm %s8118_s8, %s4537_s24  ;;  %p6149_p13 = scmp.ne.s32.totalorder %s575_s17, %s6148_s10 }
  0x3c   : > { %s6525_s8 = smov [#allocation6]  }
  0x3d   : > { %p6151_p3 = pnand %p6149_p13, %p6746_p12  ;;  %s6153_s11 = sshll.u32 %s6525_s8, 4  ;;  %s6154_s11 = int_to_ptr.vmem [resolvable:$false] %s6153_s11 }
  0x3e   : > { %s6155_s21 = scalar_lea.vmem %s6154_s11, 32  ;;  %p6156_p5 = scmp.lt.s32.totalorder %s575_s17, %s6154_s11 }
  0x3f   : > { %p6152_p4 = pneg %p6151_p3  ;;  %p6157_p6 = scmp.lt.s32.totalorder %s6155_s21, %s6148_s10 }
  0x41   : > { %p6158_p8 = por %p6157_p6, %p6156_p5 }
  0x43   : > { %p6159_p2 = pnand %p6158_p8, %p6152_p4 }
  0x45   : > { %6162 = shalt.err (!%p6159_p2)
}
  0x46   : > { %5714 = dma.hbm_to_vmem [thread:$0]  (!%p6734_p9), %s572_s6, 16, %s575_s17, %s8046_s14  }
  0x47   : > { %p6760_p13 = pnand %p4557_p10, %p771_p11  ;;  %s8124_s4 = sld [smem:[#allocation53_spill]] }
  0x48   : > { %s611_s0 = scalar_lea.vmem [#allocation9], %s6725_s12  ;;  %s6769_s25 = sshll.u32 %s6515_s18, 10 }
  0x49   : > { %s8122_s8 = scalar_select %p6760_p13, 1, 0 }
  0x4a   : > { %s618_s30 = sshll.u32 %s611_s0, 4  ;;  %8125 = sst [smem:[#allocation40_spill]] %s6769_s25  ;;  %s619_s30 = int_to_ptr.vmem [resolvable:$true] %s618_s30 }
  0x4b   : > { %8123 = sst [smem:[#allocation39_spill]] %s8122_s8  ;;  %s8048_s9 = scalar_lea.sflag [#allocation10], %s6722_s16 }
  0x4c   : > { %s6176_s5 = scalar_lea.vmem %s619_s30, 16  ;;  %s6526_s6 = smov [#allocation9]  }
  0x4d   : > { %s616_s21 = scalar_lea.hbm %s8124_s4, %s4537_s24  ;;  %p6177_p2 = scmp.ne.s32.totalorder %s619_s30, %s6176_s5 }
  0x4e   : > { %s6181_s17 = sshll.u32 %s6526_s6, 4  ;;  %s6182_s17 = int_to_ptr.vmem [resolvable:$false] %s6181_s17 }
  0x4f   : > { %p6179_p8 = pnand %p6177_p2, %p6746_p12  ;;  %s6183_s14 = scalar_lea.vmem %s6182_s17, 32 }
  0x50   : > { %p6184_p10 = scmp.lt.s32.totalorder %s619_s30, %s6182_s17  ;;  %p6185_p11 = scmp.lt.s32.totalorder %s6183_s14, %s6176_s5 }
  0x51   : > { %p6180_p3 = pneg %p6179_p8 }
  0x52   : > { %p6186_p4 = por %p6185_p11, %p6184_p10 }
  0x54   : > { %p6187_p5 = pnand %p6186_p4, %p6180_p3 }
  0x56   : > { %6190 = shalt.err (!%p6187_p5)
}
  0x57   : > { %5720 = dma.hbm_to_vmem [thread:$0]  (!%p6734_p9), %s616_s21, 16, %s619_s30, %s8048_s9  }
  0x58   : > { %s8126_s7 = sld [smem:[#allocation56_spill]]  ;;  %s656_s11 = scalar_lea.vmem [#allocation12], %s6739_s23 }
  0x59   : > { %s663_s6 = sshll.u32 %s656_s11, 4  ;;  %s8056_s5 = scalar_lea.sflag [#allocation13], %s6722_s16  ;;  %s664_s6 = int_to_ptr.vmem [resolvable:$true] %s663_s6 }
  0x5a   : > { %s6204_s14 = scalar_lea.vmem %s664_s6, 1024  ;;  %s6527_s17 = smov [#allocation12]  }
  0x5b   : > { %p6205_p6 = scmp.ne.s32.totalorder %s664_s6, %s6204_s14  ;;  %s6209_s4 = sshll.u32 %s6527_s17, 4  ;;  %s6210_s4 = int_to_ptr.vmem [resolvable:$false] %s6209_s4 }
  0x5c   : > { %s6211_s8 = scalar_lea.vmem %s6210_s4, 2048  ;;  %p6212_p3 = scmp.lt.s32.totalorder %s664_s6, %s6210_s4 }
  0x5d   : > { %p6207_p2 = pnand %p6205_p6, %p6746_p12  ;;  %p6213_p10 = scmp.lt.s32.totalorder %s6211_s8, %s6204_s14 }
  0x5e   : > { %s662_s10 = scalar_lea.hbm %s8126_s7, %s6769_s25 }
  0x5f   : > { %p6208_p8 = pneg %p6207_p2  ;;  %p6214_p11 = por %p6213_p10, %p6212_p3 }
  0x61   : > { %p6215_p4 = pnand %p6214_p11, %p6208_p8 }
  0x63   : > { %6218 = shalt.err (!%p6215_p4)
}
  0x64   : > { %s8057_s30 = smov 64   ;;  %s8059_s21 = smov 4  }
  0x65   : > { %5726 = dma.hbm_to_vmem [thread:$0]  (!%p6734_p9), %s662_s10, 1024, %s664_s6, %s8056_s5, %s8057_s30, %s8057_s30, %s8059_s21  }
  0x66   : > { %s4551_s0 = sshll.u32 %s6725_s12, 7  ;;  %s4620_s4 = sshll.u32 %s6515_s18, 11 }
  0x67   : > { %s8127_s13 = sld [smem:[#allocation62_spill]]  ;;  %s722_s14 = scalar_lea.vmem [#allocation15], %s4551_s0 }
  0x68   : > { %s729_s17 = sshll.u32 %s722_s14, 4  ;;  %s8055_s9 = scalar_lea.sflag [#allocation16], %s6722_s16  ;;  %s730_s17 = int_to_ptr.vmem [resolvable:$true] %s729_s17 }
  0x69   : > { %s6232_s7 = scalar_lea.vmem %s730_s17, 2048  ;;  %s6530_s23 = smov [#allocation15]  }
  0x6a   : > { %p6233_p5 = scmp.ne.s32.totalorder %s730_s17, %s6232_s7  ;;  %s6237_s3 = sshll.u32 %s6530_s23, 4  ;;  %s6238_s3 = int_to_ptr.vmem [resolvable:$false] %s6237_s3 }
  0x6b   : > { %s6239_s25 = scalar_lea.vmem %s6238_s3, 4096  ;;  %p6240_p8 = scmp.lt.s32.totalorder %s730_s17, %s6238_s3 }
  0x6c   : > { %p6235_p6 = pnand %p6233_p5, %p6746_p12  ;;  %p6241_p3 = scmp.lt.s32.totalorder %s6239_s25, %s6232_s7 }
  0x6d   : > { %s728_s11 = scalar_lea.hbm %s8127_s13, %s4620_s4 }
  0x6e   : > { %p6236_p2 = pneg %p6235_p6  ;;  %p6242_p10 = por %p6241_p3, %p6240_p8 }
  0x70   : > { %p6243_p11 = pnand %p6242_p10, %p6236_p2 }
  0x72   : > { %6246 = shalt.err (!%p6243_p11)
}
  0x73   : > { %s8061_s12 = smov 128   ;;  %s8062_s3 = smov 8  }
  0x74   : > { %5732 = dma.hbm_to_vmem [thread:$0]  (!%p6734_p9), %s728_s11, 2048, %s730_s17, %s8055_s9, %s8061_s12, %s8061_s12, %s8062_s3  }
  0x75   : > { %s8128_s15 = sld [smem:[#allocation64_spill]]  ;;  %s6813_s10 = scalar_lea.vmem [#allocation17], %s4551_s0 }
  0x76   : > { %s4531_s8 = sadd.s32 4294967294, %s6523_s1   ;;  %s57_s24 = sadd.s32 1, %s6519_s19 }
  0x77   : > { %s8212_s24 = smov (!%p6693_p0, %s57_s24), %s6519_s19  ;;  %s64_s14 = sadd.s32 1, %s6503_s29 }
  0x78   : > { %p71_p4 = scmp.ne.s32.totalorder %s6503_s29, %s6499_s28  ;;  %p59_p5 = scmp.ge.s32.totalorder %s8212_s24, 2 }
  0x79   : > { %p77_p6 = scmp.ne.s32.totalorder %s6499_s28, %s6495_s27  ;;  %p517_p8 = scmp.eq.s32.totalorder %s6690_s20, 3 }
  0x7a   : > { %p6828_p2 = por %p72_p1, %p71_p4  ;;  %s8214_s24 = smov (%p59_p5, %s8212_s24), 0 }
  0x7b   : > { %s6811_s23 = scalar_lea.hbm %s8128_s15, %s4620_s4  ;;  %8130 = sst [smem:[#allocation41_spill]] %s8214_s24 }
  0x7c   : > { %p8131_p3 = scmp.eq.s32.totalorder %s6690_s20, 0  ;;  %s8132_s22 = sld [smem:[#allocation40_spill]] }
  0x7d   : > { %p6841_p0 = por %p517_p8, %p71_p4  ;;  %s61_s17 = ssub.s32 %s6519_s19, %s8214_s24 }
  0x7e   : > { %p6837_p10 = por %p8131_p3, %p77_p6  ;;  %p523_p1 = scmp.eq.s32.totalorder %s4531_s8, 3 }
  0x7f   : > { %s8134_s4 = scalar_select %p6841_p0, 1, 0 }
  0x80   : > { %p62_p11 = scmp.eq.s32.totalorder %s61_s17, 0  ;;  %s543_s7 = sand.u32 1, %s6503_s29  }
  0x81   : > { %8135 = sst [smem:[#allocation40_spill]] %s8134_s4  ;;  %p6848_p7 = por %p523_p1, %p77_p6 }
  0x82   : > { %s6853_s9 = scalar_select %p62_p11, %s6503_s29, %s64_s14  }
  0x83   : > { %s8136_s25 = scalar_select %p6848_p7, 1, 0 }
  0x84   : > { %8138 = sst [smem:[#allocation43_spill]] %s6853_s9  ;;  %s4534_s5 = sshll.u32 %s543_s7, 4 }
  0x85   : > { %8137 = sst [smem:[#allocation42_spill]] %s8136_s25  ;;  %s4615_s6 = sshll.u32 %s6519_s19, 8 }
  0x86   : > { %s8139_s12 = sld [smem:[#allocation49_spill]]  ;;  %s547_s13 = scalar_lea.vmem [#allocation3], %s4534_s5 }
  0x87   : > { %s554_s15 = sshll.u32 %s547_s13, 4  ;;  %p8140_p4 = scmp.lt.s32.totalorder %s6523_s1, 4  ;;  %s555_s15 = int_to_ptr.vmem [resolvable:$true] %s554_s15 }
  0x88   : > { %s8142_s14 = sld [smem:[#allocation52_spill]]  ;;  %s544_s9 = scalar_lea.sflag [#allocation4], %s543_s7 }
  0x89   : > { %p6863_p5 = pnand %p8140_p4, %p6828_p2  ;;  %s6260_s19 = scalar_lea.vmem %s555_s15, 256 }
  0x8a   : > { %p6261_p8 = scmp.ne.s32.totalorder %s555_s15, %s6260_s19  ;;  %s6533_s13 = smov [#allocation3]  }
  0x8b   : > { %p6249_p6 = pneg %p6863_p5  ;;  %s6265_s5 = sshll.u32 %s6533_s13, 4  ;;  %s6266_s5 = int_to_ptr.vmem [resolvable:$false] %s6265_s5 }
  0x8c   : > { %s553_s3 = scalar_lea.hbm %s8139_s12, %s4615_s6  ;;  %s6267_s30 = scalar_lea.vmem %s6266_s5, 512 }
  0x8d   : > { %p6263_p3 = pnand %p6261_p8, %p6249_p6  ;;  %p6268_p2 = scmp.lt.s32.totalorder %s555_s15, %s6266_s5 }
  0x8e   : > { %p6269_p11 = scmp.lt.s32.totalorder %s6267_s30, %s6260_s19 }
  0x8f   : > { %p6264_p1 = pneg %p6263_p3 }
  0x90   : > { %p6270_p4 = por %p6269_p11, %p6268_p2 }
  0x92   : > { %p6271_p7 = pnand %p6270_p4, %p6264_p1 }
  0x94   : > { %6274 = shalt.err (!%p6271_p7)
}
  0x95   : > { %s8143_s21 = smov 8   ;;  %s8144_s12 = smov 128  }
  0x96   : > { %s8145_s6 = sld [smem:[#allocation38_spill]]  ;;  %s6534_s8 = smov [#allocation8]  }
  0x97   : > { %5711 = dma.hbm_to_vmem [thread:$0]  (!%p6863_p5), %s553_s3, 256, %s555_s15, %s544_s9, %s8144_s12, %s8144_s12, %s8143_s21  }
  0x98   : > { %s8146_s13 = sld [smem:[#allocation54_spill]]  ;;  %s6293_s30 = sshll.u32 %s6534_s8, 4  ;;  %s6294_s30 = int_to_ptr.vmem [resolvable:$false] %s6293_s30 }
  0x99   : > { %s6295_s18 = scalar_lea.vmem %s6294_s30, 2048 }
  0x9c   : > { %s591_s24 = scalar_lea.vmem [#allocation8], %s8145_s6 }
  0x9d   : > { %s598_s11 = sshll.u32 %s591_s24, 4  ;;  %s599_s11 = int_to_ptr.vmem [resolvable:$true] %s598_s11 }
  0x9e   : > { %s6288_s19 = scalar_lea.vmem %s599_s11, 1024  ;;  %p6296_p3 = scmp.lt.s32.totalorder %s599_s11, %s6294_s30 }
  0x9f   : > { %p6289_p6 = scmp.ne.s32.totalorder %s599_s11, %s6288_s19  ;;  %p6297_p1 = scmp.lt.s32.totalorder %s6295_s18, %s6288_s19 }
  0xa1   : > { %p6291_p7 = pnand %p6289_p6, %p6746_p12  ;;  %p6298_p2 = por %p6297_p1, %p6296_p3 }
  0xa3   : > { %p6292_p8 = pneg %p6291_p7 }
  0xa5   : > { %p6299_p5 = pnand %p6298_p2, %p6292_p8 }
  0xa7   : > { %6302 = shalt.err (!%p6299_p5)
}
  0xa8   : > { %s8147_s9 = smov 4   ;;  %s8148_s15 = smov 64  }
  0xa9   : > { %s8149_s3 = scalar_lea.sflag [#allocation7], %s6722_s16  ;;  %s8150_s24 = scalar_lea.hbm %s8142_s14, %s8132_s22 }
  0xaa   : > { %5717 = dma.hbm_to_vmem [thread:$0]  (!%p6734_p9), %s8150_s24, 1024, %s599_s11, %s8149_s3, %s8148_s15, %s8148_s15, %s8147_s9  }
  0xab   : > { %s629_s18 = scalar_lea.vmem [#allocation11], %s8145_s6  ;;  %s8151_s8 = sld [smem:[#allocation58_spill]] }
  0xac   : > { %s636_s7 = sshll.u32 %s629_s18, 4  ;;  %s6535_s29 = smov [#allocation11]   ;;  %s637_s7 = int_to_ptr.vmem [resolvable:$true] %s636_s7 }
  0xad   : > { %s6316_s5 = scalar_lea.vmem %s637_s7, 1024  ;;  %s6321_s21 = sshll.u32 %s6535_s29, 4  ;;  %s6322_s21 = int_to_ptr.vmem [resolvable:$false] %s6321_s21 }
  0xae   : > { %p6317_p11 = scmp.ne.s32.totalorder %s637_s7, %s6316_s5  ;;  %s6323_s12 = scalar_lea.vmem %s6322_s21, 2048 }
  0xaf   : > { %p6324_p7 = scmp.lt.s32.totalorder %s637_s7, %s6322_s21  ;;  %p6325_p8 = scmp.lt.s32.totalorder %s6323_s12, %s6316_s5 }
  0xb0   : > { %p6319_p4 = pnand %p6317_p11, %p6746_p12 }
  0xb1   : > { %s689_s30 = scalar_lea.hbm %s8151_s8, %s8132_s22  ;;  %p6326_p3 = por %p6325_p8, %p6324_p7 }
  0xb2   : > { %p6320_p6 = pneg %p6319_p4 }
  0xb4   : > { %p6327_p1 = pnand %p6326_p3, %p6320_p6 }
  0xb6   : > { %6330 = shalt.err (!%p6327_p1)
}
  0xb7   : > { %s8152_s11 = scalar_lea.sflag [#allocation10], %s6722_s16  ;;  %s8153_s18 = scalar_lea.hbm %s8146_s13, %s8132_s22 }
  0xb8   : > { %5723 = dma.hbm_to_vmem [thread:$0]  (!%p6734_p9), %s8153_s18, 1024, %s637_s7, %s8152_s11, %s8148_s15, %s8148_s15, %s8147_s9  }
  0xb9   : > { %s8154_s29 = sshll.u32 %s6813_s10, 4  ;;  %s683_s5 = scalar_lea.vmem [#allocation14], %s8145_s6  ;;  %s6918_s29 = int_to_ptr.vmem [resolvable:$true] %s8154_s29 }
  0xba   : > { %s690_s17 = sshll.u32 %s683_s5, 4  ;;  %s6536_s21 = smov [#allocation14]   ;;  %s691_s17 = int_to_ptr.vmem [resolvable:$true] %s690_s17 }
  0xbb   : > { %s6344_s19 = scalar_lea.vmem %s691_s17, 1024  ;;  %s6349_s12 = sshll.u32 %s6536_s21, 4  ;;  %s6350_s12 = int_to_ptr.vmem [resolvable:$false] %s6349_s12 }
  0xbc   : > { %p6345_p2 = scmp.ne.s32.totalorder %s691_s17, %s6344_s19  ;;  %s6351_s3 = scalar_lea.vmem %s6350_s12, 2048 }
  0xbd   : > { %p6352_p4 = scmp.lt.s32.totalorder %s691_s17, %s6350_s12  ;;  %p6353_p6 = scmp.lt.s32.totalorder %s6351_s3, %s6344_s19 }
  0xbe   : > { %p6347_p5 = pnand %p6345_p2, %p6746_p12 }
  0xbf   : > { %p6354_p7 = por %p6353_p6, %p6352_p4 }
  0xc0   : > { %p6348_p11 = pneg %p6347_p5 }
  0xc2   : > { %p6355_p8 = pnand %p6354_p7, %p6348_p11 }
  0xc4   : > { %6358 = shalt.err (!%p6355_p8)
}
  0xc5   : > { %s8155_s10 = scalar_lea.sflag [#allocation13], %s6722_s16  ;;  %s6372_s11 = scalar_lea.vmem %s6918_s29, 2048 }
  0xc6   : > { %5729 = dma.hbm_to_vmem [thread:$0]  (!%p6734_p9), %s689_s30, 1024, %s691_s17, %s8155_s10, %s8148_s15, %s8148_s15, %s8147_s9  }
  0xc7   : > { %p6373_p3 = scmp.ne.s32.totalorder %s6918_s29, %s6372_s11  ;;  %s6537_s24 = smov [#allocation17]  }
  0xc8   : > { %s6377_s18 = sshll.u32 %s6537_s24, 4  ;;  %s6378_s18 = int_to_ptr.vmem [resolvable:$false] %s6377_s18 }
  0xc9   : > { %p6375_p1 = pnand %p6373_p3, %p6746_p12  ;;  %s6379_s5 = scalar_lea.vmem %s6378_s18, 4096 }
  0xca   : > { %p6380_p5 = scmp.lt.s32.totalorder %s6918_s29, %s6378_s18  ;;  %p6381_p11 = scmp.lt.s32.totalorder %s6379_s5, %s6372_s11 }
  0xcb   : > { %p6376_p2 = pneg %p6375_p1 }
  0xcc   : > { %p6382_p4 = por %p6381_p11, %p6380_p5 }
  0xce   : > { %p6383_p6 = pnand %p6382_p4, %p6376_p2 }
  0xd0   : > { %6386 = shalt.err (!%p6383_p6)
}
  0xd1   : > { %s8156_s22 = scalar_lea.sflag [#allocation16], %s6722_s16  ;;  %775 = sbr.rel (%p6760_p13) target bundleno = 5384 (0x1508), region = 88 }
  0xd2   : > { %5735 = dma.hbm_to_vmem [thread:$0]  (!%p6734_p9), %s6811_s23, 2048, %s6918_s29, %s8156_s22, %s8148_s15, %s8148_s15, %s8147_s9  }
  0xd6   : > { %s6952_s30 = sand.u32 1, %s6499_s28  }
  0xd7   : > { %s8067_s17 = sshll.u32 %s6952_s30, 4  ;;  %s778_s2 = scalar_lea.sflag [#allocation4], %s6952_s30 }
  0xd8   : > { %s6958_s19 = scalar_lea.vmem [#allocation3], %s8067_s17 }
  0xd9   : > { %6458 = dma.done.wait (%p6837_p10), %s778_s2, 256  }
  0xda   : > { %6460 = vsyncadd (%p6837_p10), %s778_s2, 4294967040  ;;  %s8158_s16 = sld [smem:[#allocation25_spill]]  ;;  %s786_s9 = sand.u32 1, %s6690_s20  }
  0xdb   : > { %s8159_s23 = sld [smem:[#allocation36_spill]]  ;;  %s787_s29 = scalar_lea.sflag [#allocation7], %s786_s9 }
  0xe0   : > { %s6966_s15 = sand.u32 1, %s8158_s16  }
  0xe1   : > { %p8160_p9 = scmp.ne.s32.totalorder %s8159_s23, 0 }
  0xe3   : > { %6462 = dma.done.wait (%p8160_p9), %s787_s29, 1040  }
  0xe4   : > { %6464 = vsyncadd (%p8160_p9), %s787_s29, 4294966256  ;;  %s4559_s12 = sshll.u32 %s6966_s15, 6  ;;  %s804_s3 = scalar_lea.sflag [#allocation10], %s786_s9 }
  0xe5   : > { %s6974_s0 = scalar_lea.vmem [#allocation8], %s4559_s12 }
  0xe6   : > { %6466 = dma.done.wait (%p8160_p9), %s804_s3, 1040  }
  0xe7   : > { %6468 = vsyncadd (%p8160_p9), %s804_s3, 4294966256  ;;  %s6981_s20 = scalar_lea.vmem [#allocation11], %s4559_s12  ;;  %s821_s6 = scalar_lea.sflag [#allocation13], %s786_s9 }
  0xe8   : > { %s6983_s7 = scalar_lea.vmem [#allocation12], %s4559_s12 }
  0xe9   : > { %6470 = dma.done.wait (%p8160_p9), %s821_s6, 2048  }
  0xea   : > { %6472 = vsyncadd (%p8160_p9), %s821_s6, 4294965248  ;;  %s4563_s11 = sshll.u32 %s6966_s15, 7  ;;  %s6990_s24 = scalar_lea.vmem [#allocation14], %s4559_s12 }
  0xeb   : > { %8161 = sst [smem:[#allocation44_spill]] %s6990_s24  ;;  %s839_s18 = scalar_lea.sflag [#allocation16], %s786_s9 }
  0xec   : > { %s6992_s5 = scalar_lea.vmem [#allocation15], %s4563_s11 }
  0xed   : > { %8162 = sst [smem:[#allocation45_spill]] %s6992_s5 }
  0xee   : > { %6474 = dma.done.wait (%p8160_p9), %s839_s18, 4096  }
  0xef   : > { %6476 = vsyncadd (%p8160_p9), %s839_s18, 4294963200  ;;  %s8163_s22 = sld [smem:[#allocation30_spill]]  ;;  %s7040_s8 = scalar_lea.vmem [#allocation17], %s4563_s11 }
  0xf0   : > { %s8165_s3 = sld [smem:[#allocation55_spill]]  ;;  %s8173_s2 = sshll.u32 %s6952_s30, 4 }
  0xf1   : > { %s8166_s21 = sld [smem:[#allocation57_spill]] }
  0xf2   : > { %s8168_s16 = sld [smem:[#allocation59_spill]] }
  0xf3   : > { %s8169_s25 = sld [smem:[#allocation60_spill]] }
  0xf4   : > { %s8170_s9 = sld [smem:[#allocation61_spill]] }
  0xf5   : > { %p965_p12 = scmp.lt.s32.totalorder %s8163_s22, 1  ;;  %s8171_s5 = sld [smem:[#allocation65_spill]] }
  0xf6   : > { %s8172_s18 = sld [smem:[#allocation63_spill]]  ;;  %p4567_p13 = scmp.ne.s32.totalorder %s8163_s22, 0 }
  0xf7   : > { %s7000_s26 = scalar_select %p965_p12, %s8163_s22, 1 }
  0xf9   : > { %s7010_s6 = scalar_lea.vmem %s8165_s3, %s7000_s26  ;;  %s7016_s17 = scalar_lea.vmem %s8166_s21, %s7000_s26 }
  0xfa   : > { %8167 = sst [smem:[#allocation46_spill]] %s7016_s17  ;;  %s976_s13 = scalar_lea.vmem %s8168_s16, %s7000_s26 }
  0xfb   : > { %s979_s27 = scalar_lea.vmem %s8169_s25, %s7000_s26  ;;  %s982_s4 = scalar_lea.vmem %s8170_s9, %s7000_s26 }
  0xfc   : > { %s4566_s23 = sshll.u32 %s7000_s26, 1  ;;  %s989_s24 = scalar_lea.vmem %s8171_s5, %s7000_s26 }
  0xfd   : > { %s7038_s17 = scalar_lea.vmem %s8172_s18, %s4566_s23  ;;  %s7044_s16 = scalar_lea.vmem [#allocation18], %s8173_s2 }
  0xfe   : > { %993 = sbr.rel (%p4567_p13) target bundleno = 261 (0x105), region = 128 }
 0x103   : > { %v994_v0 = vld [vmem:[%s6958_s19] sm:$0xff]  ;;  %v995_v1 = vld [vmem:[%s6958_s19 + $0x8] sm:$0xff] }
 0x104   : > { %996 = vst [vmem:[#allocation2] sm:$0xff] %v994_v0  ;;  %997 = vst [vmem:[#allocation2 + $0x8] sm:$0xff] %v995_v1 }
 0x105 PF: > { %v4828_v4 = vld [vmem:[%s6974_s0 + $0x38] sm:$0xff]   ;;  %v4827_v6 = vld [vmem:[%s6974_s0 + $0x30] sm:$0xff]   ;;  %v4826_v24 = vld [vmem:[%s6974_s0 + $0x28] sm:$0xff]   ;;  %s8174_s28 = scalar_lea.vmem [#allocation6], %s6966_s15  ;;  %s8175_s14 = sld [smem:[#allocation51_spill]]  ;;  %vm1415_vm0 = vcmask 261120  }
 0x106   : > { %v4835_v5 = vld [vmem:[%s6981_s20 + $0x38] sm:$0xff]   ;;  %v7052_v7 = vunpack.c.h.bf16 %v4828_v4  ;;  %v7056_v9 = vunpack.c.l.bf16 %v4828_v4  ;;  %v7062_v11 = vunpack.c.h.bf16 %v4827_v6  ;;  %v4834_v20 = vld [vmem:[%s6981_s20 + $0x30] sm:$0xff]   ;;  %v7083_v22 = vunpack.c.l.bf16 %v4827_v6  ;;  %v4833_v26 = vld [vmem:[%s6981_s20 + $0x28] sm:$0xff]   ;;  %s8183_s11 = sld [smem:[#allocation44_spill]]  ;;  %s6539_s5 = smov 64  }
 0x107   : > { %v7054_v8 = vunpack.c.h.bf16 %v4835_v5  ;;  %v7058_v10 = vunpack.c.l.bf16 %v4835_v5  ;;  %v7081_v21 = vunpack.c.h.bf16 %v4834_v20  ;;  %v7086_v23 = vunpack.c.l.bf16 %v4834_v20  ;;  %v4825_v30 = vld [vmem:[%s6974_s0 + $0x20] sm:$0xff]   ;;  %v4824_v36 = vld [vmem:[%s6974_s0 + $0x18] sm:$0xff]   ;;  %v4823_v42 = vld [vmem:[%s6974_s0 + $0x10] sm:$0xff]   ;;  %s6540_s22 = smov 32   ;;  %s8186_s23 = sld [smem:[#allocation45_spill]] }
 0x108   : > { %5168 = vmatprep.subr.mxu0 %v7052_v7  ;;  %v7091_v25 = vunpack.c.h.bf16 %v4826_v24  ;;  %v7096_v27 = vunpack.c.h.bf16 %v4833_v26  ;;  %v7100_v28 = vunpack.c.l.bf16 %v4826_v24  ;;  %v7104_v29 = vunpack.c.l.bf16 %v4833_v26  ;;  %v4832_v32 = vld [vmem:[%s6981_s20 + $0x20] sm:$0xff]   ;;  %v4831_v38 = vld [vmem:[%s6981_s20 + $0x18] sm:$0xff]   ;;  %v4830_v44 = vld [vmem:[%s6981_s20 + $0x10] sm:$0xff]  }
 0x109   : > { %5203 = vmatprep.subr.mxu1 %v7054_v8  ;;  %5169 = vmatpush3.msra.mxu0 %v7052_v7  ;;  %v7109_v31 = vunpack.c.h.bf16 %v4825_v30  ;;  %v7114_v33 = vunpack.c.h.bf16 %v4832_v32  ;;  %v7118_v34 = vunpack.c.l.bf16 %v4825_v30  ;;  %v7122_v35 = vunpack.c.l.bf16 %v4832_v32  ;;  %v4822_v48 = vld [vmem:[%s6974_s0 + $0x8] sm:$0xff]   ;;  %v4656_v54 = vld [vmem:[%s6974_s0] sm:$0xff]   ;;  %v4841_v20 = vld [vmem:[%s6983_s7 + $0x30] sm:$0xff]   ;;  %s8179_s0 = sld [smem:[#allocation46_spill]] }
 0x10a   : > { %5204 = vmatpush3.msra.mxu1 %v7054_v8  ;;  %5170 = vmatprep.subr.mxu0 %v7056_v9  ;;  %v7127_v37 = vunpack.c.h.bf16 %v4824_v36  ;;  %v7132_v39 = vunpack.c.h.bf16 %v4831_v38  ;;  %v7136_v40 = vunpack.c.l.bf16 %v4824_v36  ;;  %v7140_v41 = vunpack.c.l.bf16 %v4831_v38  ;;  %v4829_v50 = vld [vmem:[%s6981_s20 + $0x8] sm:$0xff]   ;;  %v4688_v56 = vld [vmem:[%s6981_s20] sm:$0xff]   ;;  %v4842_v60 = vld [vmem:[%s6983_s7 + $0x38] sm:$0xff]   ;;  %s8180_s20 = scalar_lea.vmem [#allocation9], %s6966_s15 }
 0x10b   : > { %v998_v2 = vld [vmem:[#allocation2] sm:$0xff]  ;;  %v999_v3 = vld [vmem:[#allocation2 + $0x8] sm:$0xff]  ;;  %5205 = vmatprep.subr.mxu1 %v7058_v10  ;;  %5171 = vmatpush3.msra.mxu0 %v7056_v9  ;;  %v7145_v43 = vunpack.c.h.bf16 %v4823_v42  ;;  %v7150_v45 = vunpack.c.h.bf16 %v4830_v44  ;;  %v7154_v46 = vunpack.c.l.bf16 %v4823_v42  ;;  %v7158_v47 = vunpack.c.l.bf16 %v4830_v44  ;;  %s8176_s19 = scalar_lea.vmem %s8175_s14, %s7000_s26  ;;  %v4839_v36 = vld [vmem:[%s6983_s7 + $0x20] sm:$0xff]   ;;  %s8184_s9 = smov %s8180_s20 }
 0x10c   : > { %1002 = vadd.xlane.f32.xlu0 %v998_v2  ;;  %5206 = vmatpush3.msra.mxu1 %v7058_v10  ;;  %v7163_v49 = vunpack.c.h.bf16 %v4822_v48  ;;  %v7168_v51 = vunpack.c.h.bf16 %v4829_v50  ;;  %v7172_v52 = vunpack.c.l.bf16 %v4822_v48  ;;  %v7176_v53 = vunpack.c.l.bf16 %v4829_v50  ;;  %v4568_v5 = vld [vmem:[%s8174_s28] ss:$0 sm:$0xff]  ;;  %v4838_v44 = vld [vmem:[%s6983_s7 + $0x18] sm:$0xff]  }
 0x10d   : > { %5172 = vmatprep.subr.mxu0 %v7062_v11  ;;  %5207 = vmatprep.subr.mxu1 %v7081_v21  ;;  %v7181_v55 = vunpack.c.h.bf16 %v4656_v54  ;;  %v7186_v57 = vunpack.c.h.bf16 %v4688_v56  ;;  %v7190_v58 = vunpack.c.l.bf16 %v4656_v54  ;;  %v7194_v59 = vunpack.c.l.bf16 %v4688_v56  ;;  %v4837_v54 = vld [vmem:[%s6983_s7 + $0x10] sm:$0xff]  }
 0x10e   : > { %5173 = vmatpush3.msra.mxu0 %v7062_v11  ;;  %5208 = vmatpush3.msra.mxu1 %v7081_v21  ;;  %v7199_v61 = vunpack.c.h.bf16 %v4842_v60  ;;  %v7221_v24 = vunpack.c.l.bf16 %v4842_v60  ;;  %v7225_v26 = vunpack.c.h.bf16 %v4841_v20  ;;  %v7231_v30 = vunpack.c.l.bf16 %v4841_v20 }
 0x10f   : > { %5174 = vmatprep.subr.mxu0 %v7083_v22  ;;  %5209 = vmatprep.subr.mxu1 %v7086_v23  ;;  %v7244_v42 = vunpack.c.h.bf16 %v4839_v36  ;;  %v7249_v48 = vunpack.c.l.bf16 %v4839_v36  ;;  %v7253_v50 = vunpack.c.h.bf16 %v4838_v44  ;;  %v7258_v56 = vunpack.c.l.bf16 %v4838_v44  ;;  %v7311_v44 = vld [vmem:[%s8179_s0] ss:$0 sm:$0xff] }
 0x110   : > { %1004 = vadd.xlane.f32.xlu0 %v999_v3  ;;  %5175 = vmatpush3.msra.mxu0 %v7083_v22  ;;  %v7262_v60 = vunpack.c.h.bf16 %v4837_v54  ;;  %vm1505_vm1 = vcmask 130048  }
 0x111   : > { %5176 = vmatprep.subr.mxu0 %v7091_v25  ;;  %5210 = vmatpush3.msra.mxu1 %v7086_v23 }
 0x112   : > { %5177 = vmatpush3.msra.mxu0 %v7091_v25  ;;  %5211 = vmatprep.subr.mxu1 %v7096_v27 }
 0x113   : > { %5178 = vmatprep.subr.mxu0 %v7100_v28  ;;  %5212 = vmatpush3.msra.mxu1 %v7096_v27 }
 0x114   : > { %5179 = vmatpush3.msra.mxu0 %v7100_v28  ;;  %5213 = vmatprep.subr.mxu1 %v7104_v29 }
 0x115   : > { %5180 = vmatprep.subr.mxu0 %v7109_v31  ;;  %5214 = vmatpush3.msra.mxu1 %v7104_v29 }
 0x116   : > { %5181 = vmatpush3.msra.mxu0 %v7109_v31  ;;  %5215 = vmatprep.subr.mxu1 %v7114_v33 }
 0x117   : > { %5182 = vmatprep.subr.mxu0 %v7118_v34  ;;  %5216 = vmatpush3.msra.mxu1 %v7114_v33 }
 0x118   : > { %5183 = vmatpush3.msra.mxu0 %v7118_v34  ;;  %5217 = vmatprep.subr.mxu1 %v7122_v35 }
 0x119   : > { %5184 = vmatprep.subr.mxu0 %v7127_v37  ;;  %5218 = vmatpush3.msra.mxu1 %v7122_v35 }
 0x11a   : > { %5185 = vmatpush3.msra.mxu0 %v7127_v37  ;;  %5219 = vmatprep.subr.mxu1 %v7132_v39 }
 0x11b   : > { %5186 = vmatprep.subr.mxu0 %v7136_v40  ;;  %5220 = vmatpush3.msra.mxu1 %v7132_v39 }
 0x11c   : > { %5187 = vmatpush3.msra.mxu0 %v7136_v40  ;;  %5221 = vmatprep.subr.mxu1 %v7140_v41 }
 0x11d   : > { %5188 = vmatprep.subr.mxu0 %v7145_v43  ;;  %5222 = vmatpush3.msra.mxu1 %v7140_v41 }
 0x11e   : > { %5189 = vmatpush3.msra.mxu0 %v7145_v43  ;;  %5223 = vmatprep.subr.mxu1 %v7150_v45 }
 0x11f   : > { %5190 = vmatprep.subr.mxu0 %v7154_v46  ;;  %5224 = vmatpush3.msra.mxu1 %v7150_v45 }
 0x120   : > { %5191 = vmatpush3.msra.mxu0 %v7154_v46  ;;  %5225 = vmatprep.subr.mxu1 %v7158_v47 }
 0x121   : > { %5192 = vmatprep.subr.mxu0 %v7163_v49  ;;  %5226 = vmatpush3.msra.mxu1 %v7158_v47 }
 0x122   : > { %5193 = vmatpush3.msra.mxu0 %v7163_v49  ;;  %5227 = vmatprep.subr.mxu1 %v7168_v51 }
 0x123   : > { %5194 = vmatprep.subr.mxu0 %v7172_v52  ;;  %5228 = vmatpush3.msra.mxu1 %v7168_v51 }
 0x124   : > { %5195 = vmatpush3.msra.mxu0 %v7172_v52  ;;  %5229 = vmatprep.subr.mxu1 %v7176_v53 }
 0x125   : > { %5196 = vmatprep.subr.mxu0 %v7181_v55  ;;  %5230 = vmatpush3.msra.mxu1 %v7176_v53 }
 0x126   : > { %5197 = vmatpush3.msra.mxu0 %v7181_v55  ;;  %5231 = vmatprep.subr.mxu1 %v7186_v57 }
 0x127   : > { %5198 = vmatprep.subr.mxu0 %v7190_v58  ;;  %5232 = vmatpush3.msra.mxu1 %v7186_v57 }
 0x128   : > { %5199 = vmatpush3.msra.mxu0 %v7190_v58  ;;  %5233 = vmatprep.subr.mxu1 %v7194_v59 }
 0x129   : > { %5234 = vmatpush3.msra.mxu1 %v7194_v59  ;;  %5238 = vmatprep.subr.mxu0 %v7199_v61 }
 0x195   : > { %v1003_v12 = vpop.xlane.xlu0 %1002 }
 0x196   : > { %v1007_v13 = vmul.f32 0.0078125, %v1003_v12  ;;  %v4569_v12 = vld [vmem:[%s8176_s19] ss:$0 sm:$0xff] }
 0x198   : > { %v7072_v14 = vsub.f32 %v998_v2, %v1007_v13 }
 0x199   : > { %v1005_v15 = vpop.xlane.xlu0 %1004 }
 0x19a   : > { %v1008_v16 = vmul.f32 0.0078125, %v1005_v15  ;;  %v1011_v17 = vmul.f32 %v7072_v14, %v7072_v14 }
 0x19c   : > { %1013 = vadd.xlane.f32.xlu1 %v1011_v17  ;;  %v7076_v18 = vsub.f32 %v999_v3, %v1008_v16 }
 0x19e   : > { %v1012_v19 = vmul.f32 %v7076_v18, %v7076_v18 }
 0x1a0   : > { %1015 = vadd.xlane.f32.xlu1 %v1012_v19 }
 0x225   : > { %v1014_v62 = vpop.xlane.xlu1 %1013 }
 0x226   : > { %v1017_v63 = vmul.f32 0.0078125, %v1014_v62  ;;  %v4836_v62 = vld [vmem:[%s6983_s7 + $0x8] sm:$0xff]  }
 0x228   : > { %v1019_v0 = vadd.f32 1e-12, %v1017_v63  ;;  %v7267_v63 = vunpack.c.l.bf16 %v4837_v54 }
 0x229   : > { %v1016_v1 = vpop.xlane.xlu1 %1015 }
 0x22a   : > { %6066 = vrsqrt.f32 %v1019_v0  ;;  %v1018_v2 = vmul.f32 0.0078125, %v1016_v1  ;;  %v7271_v0 = vunpack.c.h.bf16 %v4836_v62  ;;  %v4720_v1 = vld [vmem:[%s6983_s7] sm:$0xff]  }
 0x22c   : > { %v1020_v3 = vadd.f32 1e-12, %v1018_v2  ;;  %v7276_v2 = vunpack.c.l.bf16 %v4836_v62 }
 0x22e   : > { %6068 = vrsqrt.f32 %v1020_v3  ;;  %v7280_v3 = vunpack.c.h.bf16 %v4720_v1 }
 0x237   : > { %v6067_v4 = vpop.eup %6066 }
 0x238   : > { %v1023_v6 = vmul.f32 %v6067_v4, %v7072_v14  ;;  %v7284_v4 = vunpack.c.l.bf16 %v4720_v1 }
 0x23a   : > { %v1031_v13 = vmul.f32 %v4568_v5, %v1023_v6 }
 0x23b   : > { %v6069_v15 = vpop.eup %6068 }
 0x23c   : > { %v7213_v16 = vadd.f32 %v4569_v12, %v1031_v13  ;;  %v1024_v17 = vmul.f32 %v6069_v15, %v7076_v18  ;;  %v4840_v18 = vld [vmem:[%s6983_s7 + $0x28] sm:$0xff]   ;;  %s6538_s7 = smov 96  }
 0x23d   : > { %v7235_v32 = vunpack.c.h.bf16 %v4840_v18  ;;  %v7240_v38 = vunpack.c.l.bf16 %v4840_v18  ;;  %v7299_v15 = vld [vmem:[%s8180_s20] ss:$0 sm:$0xff] }
 0x23e   : > { %8177 = vst [vmem:[#allocation47_spill] sm:$0xff] %v7213_v16  ;;  %v1032_v19 = vmul.f32 %v4568_v5, %v1024_v17  ;;  %5200 = vmatprep.mubr.f32.mxu0 %v7213_v16  ;;  %5235 = vmatprep.mubr.f32.mxu1 %v7213_v16  ;;  %v7294_v5 = vld [vmem:[%s7010_s6] ss:$0 sm:$0xff] }
 0x240   : > { %v7219_v14 = vadd.f32 %v4569_v12, %v1032_v19 }
 0x242   : > { %8178 = vst [vmem:[#allocation48_spill] sm:$0xff] %v7219_v14  ;;  %5201 = vmatmul.mubr.f32.vlgmr.msra.gmra.mxu0 %v7219_v14  ;;  %5236 = vmatmul.mubr.f32.vlgmr.msra.gmra.mxu1 %v7219_v14 }
 0x243   : > { %5239 = vmatpush3.msra.mxu0 %v7199_v61  ;;  %5270 = vmatprep.mubr.f32.mxu0 %v7213_v16 }
 0x244   : > { %5240 = vmatprep.subr.mxu0 %v7221_v24 }
 0x245   : > { %5241 = vmatpush3.msra.mxu0 %v7221_v24 }
 0x246   : > { %5242 = vmatprep.subr.mxu0 %v7225_v26 }
 0x247   : > { %5243 = vmatpush3.msra.mxu0 %v7225_v26 }
 0x248   : > { %5244 = vmatprep.subr.mxu0 %v7231_v30 }
 0x249   : > { %5245 = vmatpush3.msra.mxu0 %v7231_v30 }
 0x24a   : > { %5246 = vmatprep.subr.mxu0 %v7235_v32 }
 0x24b   : > { %5247 = vmatpush3.msra.mxu0 %v7235_v32 }
 0x24c   : > { %5248 = vmatprep.subr.mxu0 %v7240_v38 }
 0x24d   : > { %5249 = vmatpush3.msra.mxu0 %v7240_v38 }
 0x24e   : > { %5250 = vmatprep.subr.mxu0 %v7244_v42 }
 0x24f   : > { %5251 = vmatpush3.msra.mxu0 %v7244_v42 }
 0x250   : > { %5252 = vmatprep.subr.mxu0 %v7249_v48 }
 0x251   : > { %5253 = vmatpush3.msra.mxu0 %v7249_v48 }
 0x252   : > { %5254 = vmatprep.subr.mxu0 %v7253_v50 }
 0x253   : > { %5255 = vmatpush3.msra.mxu0 %v7253_v50 }
 0x254   : > { %5256 = vmatprep.subr.mxu0 %v7258_v56 }
 0x255   : > { %5257 = vmatpush3.msra.mxu0 %v7258_v56 }
 0x256   : > { %5258 = vmatprep.subr.mxu0 %v7262_v60 }
 0x257   : > { %5259 = vmatpush3.msra.mxu0 %v7262_v60 }
 0x258   : > { %5260 = vmatprep.subr.mxu0 %v7267_v63 }
 0x259   : > { %5261 = vmatpush3.msra.mxu0 %v7267_v63 }
 0x25a   : > { %5262 = vmatprep.subr.mxu0 %v7271_v0 }
 0x25b   : > { %5263 = vmatpush3.msra.mxu0 %v7271_v0 }
 0x25c   : > { %5264 = vmatprep.subr.mxu0 %v7276_v2 }
 0x25d   : > { %5265 = vmatpush3.msra.mxu0 %v7276_v2 }
 0x25e   : > { %5266 = vmatprep.subr.mxu0 %v7280_v3 }
 0x25f   : > { %5267 = vmatpush3.msra.mxu0 %v7280_v3 }
 0x260   : > { %5268 = vmatprep.subr.mxu0 %v7284_v4 }
 0x261   : > { %5269 = vmatpush3.msra.mxu0 %v7284_v4 }
 0x262   : > { %5271 = vmatmul.mubr.f32.vlgmr.msra.gmra.mxu0 %v7219_v14 }
 0x263   : > { %5354 = vmatprep.mubr.f32.mxu0 %v7213_v16 }
 0x302   : > { %v5202_v6 = vpop.f32.mrf.mxu0  ;;  %v5237_v12 = vpop.f32.mrf.mxu1 }
 0x303   : > { %v1298_v13 = vadd.f32 %v5237_v12, %v7294_v5  ;;  %v1184_v36 = vadd.f32 %v5202_v6, %v7299_v15 }
 0x304   : > { %v1178_v17 = vpop.f32.mrf.mxu0  ;;  %v1292_v19 = vpop.f32.mrf.mxu1 }
 0x305   : > { %v1179_v20 = vadd.f32 %v7299_v15, %v1178_v17  ;;  %v1293_v18 = vadd.f32 %v7294_v5, %v1292_v19  ;;  %5273 = vmatprep.subr.msk.mxu1 %vm1415_vm0, %v1298_v13 }
 0x306   : > { %5274 = vmatpush3.xpose.msk.msra.mxu1 %vm1415_vm0, %v1298_v13 }
 0x307   : > { %5275 = vmatprep.subr.msk.mxu1 %vm1415_vm0, %v1293_v18  ;;  %5277 = vmatprep.mubr.msk.f32.mxu1 %vm1415_vm0, %v1179_v20 }
 0x30a   : > { %5276 = vmatpush3.xpose.msk.msra.mxu1 %vm1415_vm0, %v1293_v18 }
 0x30d   : > { %5278 = vmatmul.mubr.msk.f32.vlgmr.msra.gmra.mxu1 %vm1415_vm0, %v1184_v36 }
 0x322   : > { %v5272_v54 = vpop.f32.mrf.mxu0 }
 0x323   : > { %v1412_v62 = vadd.f32 %v5272_v54, %v7311_v44 }
 0x324   : > { %v1406_v1 = vpop.f32.mrf.mxu0 }
 0x325   : > { %v1407_v12 = vadd.f32 %v7311_v44, %v1406_v1  ;;  %5280 = vmatprep.subr.mxu1 %v1412_v62 }
 0x326   : > { %5281 = vmatpush3.msra.mxu1 %v1412_v62 }
 0x327   : > { %5282 = vmatprep.subr.mxu1 %v1407_v12 }
 0x328   : > { %5283 = vmatpush3.msra.mxu1 %v1407_v12 }
 0x3cd   : > { %v5279_v13 = vpop.f32.mrf.mxu1 }
 0x3ce   : > { %v1504_v17 = vmul.f32 0.17677669, %v5279_v13 }
 0x3cf   : > { %v1494_v19 = vpop.f32.mrf.mxu1 }
 0x3d0   : > { %v1503_v20 = vmul.f32 0.17677669, %v1494_v19  ;;  %v1509_v6 = vsel %vm1505_vm1, %v1504_v17, -inf }
 0x3d1   : > { %1510 = vmax.xlane.f32.xlu1 %v1509_v6 }
 0x3d2   : > { %v1506_v18 = vsel %vm1505_vm1, %v1503_v20, -inf }
 0x3d3   : > { %1507 = vmax.xlane.f32.xlu0 %v1506_v18 }
 0x45a   : > { %v1511_v36 = vpop.xlane.xlu1 %1510 }
 0x45b   : > { %v1513_v54 = vsub.f32 %v1504_v17, %v1511_v36  ;;  %v7327_v17 = vpack.i.bf16 %v7052_v7, %v7081_v21  ;;  %v7349_v7 = vpack.i.bf16 %v7083_v22, %v7104_v29  ;;  %v7379_v21 = vpack.i.bf16 %v7127_v37, %v7150_v45 }
 0x45c   : > { %v1508_v14 = vpop.xlane.xlu0 %1507  ;;  %v7385_v22 = vpack.i.bf16 %v7136_v40, %v7158_v47 }
 0x45d   : > { %v1516_v16 = vmul.f32 1.442695, %v1513_v54  ;;  %v1512_v1 = vsub.f32 %v1503_v20, %v1508_v14  ;;  %v7337_v14 = vpack.i.bf16 %v7058_v10, %v7054_v8  ;;  %v7343_v20 = vpack.i.bf16 %v7062_v11, %v7096_v27 }
 0x45e   : > { %v7355_v8 = vpack.i.bf16 %v7091_v25, %v7114_v33  ;;  %v7367_v10 = vpack.i.bf16 %v7109_v31, %v7132_v39  ;;  %v7373_v11 = vpack.i.bf16 %v7118_v34, %v7140_v41  ;;  %v7397_v25 = vpack.i.bf16 %v7154_v46, %v7176_v53 }
 0x45f   : > { %6070 = vpow2.f32 %v1516_v16  ;;  %v1514_v62 = vmul.f32 1.442695, %v1512_v1  ;;  %v7333_v16 = vpack.i.bf16 %v7056_v9, %v7086_v23  ;;  %v7361_v9 = vpack.i.bf16 %v7100_v28, %v7122_v35 }
 0x460   : > { %v7391_v23 = vpack.i.bf16 %v7145_v43, %v7168_v51  ;;  %v7403_v27 = vpack.i.bf16 %v7163_v49, %v7186_v57  ;;  %v7409_v28 = vpack.i.bf16 %v7172_v52, %v7194_v59 }
 0x461   : > { %6072 = vpow2.f32 %v1514_v62 }
 0x46c   : > { %v7317_v12 = vpop.eup %6070 }
 0x46d   : > { %v1521_v13 = vsel %vm1505_vm1, %v7317_v12, 0.0 }
 0x46e   : > { %v7321_v19 = vpop.eup %6072  ;;  %1522 = vadd.xlane.f32.xlu1 %v1521_v13 }
 0x46f   : > { %v1518_v6 = vsel %vm1505_vm1, %v7321_v19, 0.0 }
 0x470   : > { %1519 = vadd.xlane.f32.xlu0 %v1518_v6 }
 0x47f   : > { %5847 = vrot.lane.b32.xlu1 %v7327_v17, %s6538_s7 }
 0x483   : > { %5852 = vrot.lane.b32.xlu1 %v7333_v16, %s6538_s7 }
 0x486   : > { %5842 = vrot.lane.b32.xlu0 %v7337_v14, %s6538_s7 }
 0x487   : > { %5857 = vrot.lane.b32.xlu1 %v7343_v20, %s6538_s7 }
 0x48a   : > { %5862 = vrot.lane.b32.xlu0 %v7349_v7, %s6538_s7 }
 0x48b   : > { %5867 = vrot.lane.b32.xlu1 %v7355_v8, %s6538_s7 }
 0x48e   : > { %5872 = vrot.lane.b32.xlu0 %v7361_v9, %s6538_s7 }
 0x48f   : > { %5877 = vrot.lane.b32.xlu1 %v7367_v10, %s6538_s7 }
 0x492   : > { %5882 = vrot.lane.b32.xlu0 %v7373_v11, %s6538_s7 }
 0x493   : > { %5887 = vrot.lane.b32.xlu1 %v7379_v21, %s6538_s7 }
 0x496   : > { %5892 = vrot.lane.b32.xlu0 %v7385_v22, %s6538_s7 }
 0x497   : > { %5897 = vrot.lane.b32.xlu1 %v7391_v23, %s6538_s7 }
 0x49a   : > { %5902 = vrot.lane.b32.xlu0 %v7397_v25, %s6538_s7 }
 0x49b   : > { %5907 = vrot.lane.b32.xlu1 %v7403_v27, %s6538_s7 }
 0x49e   : > { %5912 = vrot.lane.b32.xlu0 %v7409_v28, %s6538_s7 }
 0x49f   : > { %1627 = vrot.lane.b32.xlu1 %v7181_v55, %s6538_s7 }
 0x4a2   : > { %1625 = vrot.lane.b32.xlu0 %v7190_v58, %s6538_s7 }
 0x4a3   : > { %1815 = vrot.lane.b32.xlu1 %v7294_v5, %s6538_s7 }
 0x4a6   : > { %1673 = vrot.lane.b32.xlu0 %v7299_v15, %s6538_s7 }
 0x4a7   : > { %1939 = vrot.lane.b32.xlu1 %v7199_v61, %s6538_s7 }
 0x4aa   : > { %1937 = vrot.lane.b32.xlu0 %v7221_v24, %s6538_s7 }
 0x4ab   : > { %1935 = vrot.lane.b32.xlu1 %v7225_v26, %s6538_s7 }
 0x4ae   : > { %1933 = vrot.lane.b32.xlu0 %v7231_v30, %s6538_s7 }
 0x4af   : > { %1931 = vrot.lane.b32.xlu1 %v7235_v32, %s6538_s7 }
 0x4b2   : > { %1929 = vrot.lane.b32.xlu0 %v7240_v38, %s6538_s7 }
 0x4b3   : > { %1927 = vrot.lane.b32.xlu1 %v7244_v42, %s6538_s7 }
 0x4b6   : > { %1925 = vrot.lane.b32.xlu0 %v7249_v48, %s6538_s7 }
 0x4b7   : > { %1923 = vrot.lane.b32.xlu1 %v7253_v50, %s6538_s7 }
 0x4ba   : > { %1921 = vrot.lane.b32.xlu0 %v7258_v56, %s6538_s7 }
 0x4bb   : > { %1919 = vrot.lane.b32.xlu1 %v7262_v60, %s6538_s7 }
 0x4be   : > { %1917 = vrot.lane.b32.xlu0 %v7267_v63, %s6538_s7 }
 0x4bf   : > { %1915 = vrot.lane.b32.xlu1 %v7271_v0, %s6538_s7 }
 0x4c2   : > { %1913 = vrot.lane.b32.xlu0 %v7276_v2, %s6538_s7 }
 0x4c3   : > { %1911 = vrot.lane.b32.xlu1 %v7280_v3, %s6538_s7 }
 0x4c6   : > { %1909 = vrot.lane.b32.xlu0 %v7284_v4, %s6538_s7 }
 0x4f7   : > { %v1523_v29 = vpop.xlane.xlu1 %1522 }
 0x4f8   : > { %6074 = vrcp.f32 %v1523_v29  ;;  %v8181_v29 = vld [vmem:[#allocation47_spill] sm:$0xff] }
 0x4f9   : > { %v1520_v31 = vpop.xlane.xlu0 %1519 }
 0x4fa   : > { %6076 = vrcp.f32 %v1520_v31 }
 0x4fb   : > { %v5848_v33 = vpop.permute.xlu1 %5847 }
 0x4fc   : > { %v5850_v34 = vunpack.i.h.bf16 %v5848_v33  ;;  %v5849_v41 = vunpack.i.l.bf16 %v5848_v33 }
 0x4fd   : > { %v5843_v35 = vpop.permute.xlu0 %5842 }
 0x4fe   : > { %v5845_v37 = vunpack.i.h.bf16 %v5843_v35  ;;  %v5844_v39 = vunpack.i.l.bf16 %v5843_v35  ;;  %5287 = vmatprep.subr.mxu1 %v5850_v34 }
 0x4ff   : > { %v5853_v40 = vpop.permute.xlu1 %5852 }
 0x500   : > { %5322 = vmatprep.subr.mxu0 %v5844_v39  ;;  %v5854_v45 = vunpack.i.l.bf16 %v5853_v40  ;;  %v5855_v1 = vunpack.i.h.bf16 %v5853_v40 }
 0x501   : > { %5323 = vmatpush3.msra.mxu0 %v5844_v39  ;;  %v5863_v43 = vpop.permute.xlu0 %5862 }
 0x502   : > { %5324 = vmatprep.subr.mxu0 %v5845_v37  ;;  %v5864_v52 = vunpack.i.l.bf16 %v5863_v43  ;;  %v5865_v31 = vunpack.i.h.bf16 %v5863_v43 }
 0x503   : > { %5325 = vmatpush3.msra.mxu0 %v5845_v37  ;;  %v5858_v46 = vpop.permute.xlu1 %5857 }
 0x504   : > { %5326 = vmatprep.subr.mxu0 %v5849_v41  ;;  %v5859_v47 = vunpack.i.l.bf16 %v5858_v46  ;;  %v5860_v62 = vunpack.i.h.bf16 %v5858_v46 }
 0x505   : > { %5327 = vmatpush3.msra.mxu0 %v5849_v41  ;;  %v5873_v49 = vpop.permute.xlu0 %5872  ;;  %v6075_v51 = vpop.eup %6074 }
 0x506   : > { %5328 = vmatprep.subr.mxu0 %v5854_v45  ;;  %v1527_v36 = vmul.f32 %v6075_v51, %v7317_v12  ;;  %v5874_v13 = vunpack.i.l.bf16 %v5873_v49  ;;  %v5875_v39 = vunpack.i.h.bf16 %v5873_v49 }
 0x507   : > { %v6077_v53 = vpop.eup %6076  ;;  %5329 = vmatpush3.msra.mxu0 %v5854_v45  ;;  %v5868_v57 = vpop.permute.xlu1 %5867 }
 0x508   : > { %5330 = vmatprep.subr.mxu0 %v5859_v47  ;;  %v1526_v59 = vmul.f32 %v6077_v53, %v7321_v19  ;;  %v5869_v18 = vunpack.i.l.bf16 %v5868_v57  ;;  %v5870_v12 = vunpack.i.h.bf16 %v5868_v57 }
 0x509   : > { %5331 = vmatpush3.msra.mxu0 %v5859_v47  ;;  %v5883_v54 = vpop.permute.xlu0 %5882 }
 0x50a   : > { %5284 = vmatprep.mubr.msk.f32.mxu1 %vm1505_vm1, %v1526_v59  ;;  %5332 = vmatprep.subr.mxu0 %v5864_v52  ;;  %v5884_v35 = vunpack.i.l.bf16 %v5883_v54  ;;  %v5885_v46 = vunpack.i.h.bf16 %v5883_v54 }
 0x50b   : > { %5285 = vmatmul.mubr.msk.f32.vlgmr.msra.gmra.mxu1 %vm1505_vm1, %v1527_v36  ;;  %5333 = vmatpush3.msra.mxu0 %v5864_v52  ;;  %v5878_v6 = vpop.permute.xlu1 %5877 }
 0x50c   : > { %5288 = vmatpush3.msra.mxu1 %v5850_v34  ;;  %5319 = vmatprep.mubr.f32.mxu1 %v8181_v29  ;;  %v5879_v19 = vunpack.i.l.bf16 %v5878_v6  ;;  %v5880_v41 = vunpack.i.h.bf16 %v5878_v6 }
 0x50d   : > { %5289 = vmatprep.subr.mxu1 %v5855_v1  ;;  %5334 = vmatprep.subr.mxu0 %v5869_v18  ;;  %v5893_v33 = vpop.permute.xlu0 %5892 }
 0x50e   : > { %5290 = vmatpush3.msra.mxu1 %v5855_v1  ;;  %5335 = vmatpush3.msra.mxu0 %v5869_v18  ;;  %v5894_v43 = vunpack.i.l.bf16 %v5893_v33  ;;  %v5895_v57 = vunpack.i.h.bf16 %v5893_v33  ;;  %v8182_v33 = vld [vmem:[#allocation48_spill] sm:$0xff] }
 0x50f   : > { %5291 = vmatprep.subr.mxu1 %v5860_v62  ;;  %5336 = vmatprep.subr.mxu0 %v5874_v13  ;;  %v5888_v37 = vpop.permute.xlu1 %5887 }
 0x510   : > { %5292 = vmatpush3.msra.mxu1 %v5860_v62  ;;  %5337 = vmatpush3.msra.mxu0 %v5874_v13  ;;  %v5889_v34 = vunpack.i.l.bf16 %v5888_v37  ;;  %v5890_v49 = vunpack.i.h.bf16 %v5888_v37 }
 0x511   : > { %5293 = vmatprep.subr.mxu1 %v5865_v31  ;;  %5338 = vmatprep.subr.mxu0 %v5879_v19  ;;  %v5903_v40 = vpop.permute.xlu0 %5902 }
 0x512   : > { %5294 = vmatpush3.msra.mxu1 %v5865_v31  ;;  %5339 = vmatpush3.msra.mxu0 %v5879_v19  ;;  %v5904_v52 = vunpack.i.l.bf16 %v5903_v40  ;;  %v5905_v62 = vunpack.i.h.bf16 %v5903_v40 }
 0x513   : > { %5295 = vmatprep.subr.mxu1 %v5870_v12  ;;  %5340 = vmatprep.subr.mxu0 %v5884_v35  ;;  %v5898_v45 = vpop.permute.xlu1 %5897 }
 0x514   : > { %5296 = vmatpush3.msra.mxu1 %v5870_v12  ;;  %5341 = vmatpush3.msra.mxu0 %v5884_v35  ;;  %v5899_v47 = vunpack.i.l.bf16 %v5898_v45  ;;  %v5900_v36 = vunpack.i.h.bf16 %v5898_v45 }
 0x515   : > { %5297 = vmatprep.subr.mxu1 %v5875_v39  ;;  %5342 = vmatprep.subr.mxu0 %v5889_v34  ;;  %v5913_v51 = vpop.permute.xlu0 %5912 }
 0x516   : > { %5298 = vmatpush3.msra.mxu1 %v5875_v39  ;;  %5343 = vmatpush3.msra.mxu0 %v5889_v34  ;;  %v5914_v54 = vunpack.i.l.bf16 %v5913_v51  ;;  %v5915_v19 = vunpack.i.h.bf16 %v5913_v51 }
 0x517   : > { %5299 = vmatprep.subr.mxu1 %v5880_v41  ;;  %5344 = vmatprep.subr.mxu0 %v5894_v43  ;;  %v5908_v53 = vpop.permute.xlu1 %5907 }
 0x518   : > { %5300 = vmatpush3.msra.mxu1 %v5880_v41  ;;  %5345 = vmatpush3.msra.mxu0 %v5894_v43  ;;  %v5909_v59 = vunpack.i.l.bf16 %v5908_v53  ;;  %v5910_v6 = vunpack.i.h.bf16 %v5908_v53 }
 0x519   : > { %5301 = vmatprep.subr.mxu1 %v5885_v46  ;;  %5346 = vmatprep.subr.mxu0 %v5899_v47  ;;  %v1626_v18 = vpop.permute.xlu0 %1625 }
 0x51a   : > { %5302 = vmatpush3.msra.mxu1 %v5885_v46  ;;  %5347 = vmatpush3.msra.mxu0 %v5899_v47 }
 0x51b   : > { %5303 = vmatprep.subr.mxu1 %v5890_v49  ;;  %5348 = vmatprep.subr.mxu0 %v5904_v52  ;;  %v1628_v1 = vpop.permute.xlu1 %1627 }
 0x51c   : > { %5304 = vmatpush3.msra.mxu1 %v5890_v49  ;;  %5349 = vmatpush3.msra.mxu0 %v5904_v52 }
 0x51d   : > { %5305 = vmatprep.subr.mxu1 %v5895_v57  ;;  %5350 = vmatprep.subr.mxu0 %v5909_v59  ;;  %v7460_v13 = vpop.permute.xlu0 %1673 }
 0x51e   : > { %5306 = vmatpush3.msra.mxu1 %v5895_v57  ;;  %5351 = vmatpush3.msra.mxu0 %v5909_v59  ;;  %v4815_v57 = vld [vmem:[%s8183_s11 + $0x8] sm:$0xff]  }
 0x51f   : > { %5307 = vmatprep.subr.mxu1 %v5900_v36  ;;  %5352 = vmatprep.subr.mxu0 %v5914_v54  ;;  %v7462_v31 = vpop.permute.xlu1 %1815 }
 0x520   : > { %5308 = vmatpush3.msra.mxu1 %v5900_v36  ;;  %5353 = vmatpush3.msra.mxu0 %v5914_v54  ;;  %v4629_v36 = vunpack.c.l.bf16 %v4815_v57  ;;  %v4624_v54 = vld [vmem:[%s8183_s11] sm:$0xff]  }
 0x521   : > { %5309 = vmatprep.subr.mxu1 %v5905_v62  ;;  %5355 = vmatmul.mubr.f32.vlgmr.msra.gmra.mxu0 %v8182_v33  ;;  %v1938_v12 = vpop.permute.xlu0 %1937 }
 0x522   : > { %5310 = vmatpush3.msra.mxu1 %v5905_v62  ;;  %v4625_v62 = vunpack.c.l.bf16 %v4624_v54 }
 0x523   : > { %5311 = vmatprep.subr.mxu1 %v5910_v6  ;;  %v1940_v35 = vpop.permute.xlu1 %1939 }
 0x524   : > { %5312 = vmatpush3.msra.mxu1 %v5910_v6 }
 0x525   : > { %5313 = vmatprep.subr.mxu1 %v5915_v19  ;;  %v1934_v37 = vpop.permute.xlu0 %1933 }
 0x526   : > { %5314 = vmatpush3.msra.mxu1 %v5915_v19 }
 0x527   : > { %5315 = vmatprep.subr.mxu1 %v1628_v1  ;;  %v1936_v39 = vpop.permute.xlu1 %1935 }
 0x528   : > { %5316 = vmatpush3.msra.mxu1 %v1628_v1  ;;  %v4626_v1 = vunpack.c.h.bf16 %v4624_v54 }
 0x529   : > { %5317 = vmatprep.subr.mxu1 %v1626_v18  ;;  %v1930_v34 = vpop.permute.xlu0 %1929 }
 0x52a   : > { %5318 = vmatpush3.msra.mxu1 %v1626_v18  ;;  %v4630_v18 = vunpack.c.h.bf16 %v4815_v57 }
 0x52b   : > { %5320 = vmatmul.mubr.f32.vlgmr.msra.gmra.mxu1 %v8182_v33  ;;  %5357 = vmatprep.subr.mxu1 %v1940_v35  ;;  %v1932_v40 = vpop.permute.xlu1 %1931 }
 0x52c   : > { %5358 = vmatpush3.msra.mxu1 %v1940_v35  ;;  %5389 = vmatprep.mubr.f32.mxu1 %v8181_v29 }
 0x52d   : > { %5359 = vmatprep.subr.mxu1 %v1938_v12  ;;  %v1926_v41 = vpop.permute.xlu0 %1925 }
 0x52e   : > { %5360 = vmatpush3.msra.mxu1 %v1938_v12 }
 0x52f   : > { %5361 = vmatprep.subr.mxu1 %v1936_v39  ;;  %v1928_v43 = vpop.permute.xlu1 %1927 }
 0x530   : > { %5362 = vmatpush3.msra.mxu1 %v1936_v39 }
 0x531   : > { %5363 = vmatprep.subr.mxu1 %v1934_v37  ;;  %v1922_v46 = vpop.permute.xlu0 %1921 }
 0x532   : > { %5364 = vmatpush3.msra.mxu1 %v1934_v37 }
 0x533   : > { %5365 = vmatprep.subr.mxu1 %v1932_v40  ;;  %v1924_v45 = vpop.permute.xlu1 %1923 }
 0x534   : > { %5366 = vmatpush3.msra.mxu1 %v1932_v40 }
 0x535   : > { %5367 = vmatprep.subr.mxu1 %v1930_v34  ;;  %v1918_v51 = vpop.permute.xlu0 %1917 }
 0x536   : > { %5368 = vmatpush3.msra.mxu1 %v1930_v34 }
 0x537   : > { %5369 = vmatprep.subr.mxu1 %v1928_v43  ;;  %v1920_v47 = vpop.permute.xlu1 %1919 }
 0x538   : > { %5370 = vmatpush3.msra.mxu1 %v1928_v43 }
 0x539   : > { %5371 = vmatprep.subr.mxu1 %v1926_v41  ;;  %v1914_v52 = vpop.permute.xlu0 %1913 }
 0x53a   : > { %5372 = vmatpush3.msra.mxu1 %v1926_v41 }
 0x53b   : > { %5373 = vmatprep.subr.mxu1 %v1924_v45  ;;  %v1916_v49 = vpop.permute.xlu1 %1915 }
 0x53c   : > { %5374 = vmatpush3.msra.mxu1 %v1924_v45 }
 0x53d   : > { %5375 = vmatprep.subr.mxu1 %v1922_v46  ;;  %v1910_v59 = vpop.permute.xlu0 %1909 }
 0x53e   : > { %5376 = vmatpush3.msra.mxu1 %v1922_v46 }
 0x53f   : > { %5377 = vmatprep.subr.mxu1 %v1920_v47  ;;  %v1912_v53 = vpop.permute.xlu1 %1911 }
 0x540   : > { %5378 = vmatpush3.msra.mxu1 %v1920_v47 }
 0x541   : > { %5379 = vmatprep.subr.mxu1 %v1918_v51 }
 0x542   : > { %5380 = vmatpush3.msra.mxu1 %v1918_v51 }
 0x543   : > { %5381 = vmatprep.subr.mxu1 %v1916_v49 }
 0x544   : > { %5382 = vmatpush3.msra.mxu1 %v1916_v49 }
 0x545   : > { %5383 = vmatprep.subr.mxu1 %v1914_v52 }
 0x546   : > { %5384 = vmatpush3.msra.mxu1 %v1914_v52 }
 0x547   : > { %5385 = vmatprep.subr.mxu1 %v1912_v53 }
 0x548   : > { %5386 = vmatpush3.msra.mxu1 %v1912_v53 }
 0x549   : > { %5387 = vmatprep.subr.mxu1 %v1910_v59 }
 0x54a   : > { %5388 = vmatpush3.msra.mxu1 %v1910_v59 }
 0x54b   : > { %5390 = vmatmul.mubr.f32.vlgmr.msra.gmra.mxu1 %v8182_v33  ;;  %5417 = vmatprep.subr.mxu1 %v4630_v18 }
 0x54c   : > { %5418 = vmatpush3.msra.mxu1 %v4630_v18 }
 0x54d   : > { %5419 = vmatprep.subr.mxu1 %v4629_v36 }
 0x54e   : > { %5420 = vmatpush3.msra.mxu1 %v4629_v36 }
 0x54f   : > { %5421 = vmatprep.subr.mxu1 %v4626_v1 }
 0x550   : > { %5422 = vmatpush3.msra.mxu1 %v4626_v1 }
 0x551   : > { %5423 = vmatprep.subr.mxu1 %v4625_v62 }
 0x552   : > { %5424 = vmatpush3.msra.mxu1 %v4625_v62 }
 0x5cb   : > { %v5286_v6 = vpop.f32.mrf.mxu1 }
 0x5cd   : > { %v1600_v19 = vpop.f32.mrf.mxu1 }
 0x5ce   : > { %5425 = vmatprep.mubr.msk.f32.mxu1 %vm1415_vm0, %v1600_v19 }
 0x5cf   : > { %5426 = vmatmul.mubr.msk.f32.vlgmr.msra.gmra.mxu1 %vm1415_vm0, %v5286_v6 }
 0x5d0   : > { %5495 = vmatprep.mubr.f32.mxu1 %v8181_v29 }
 0x5e1   : > { %v5356_v12 = vpop.f32.mrf.mxu0 }
 0x5e2   : > { %v1890_v35 = vadd.f32 %v5356_v12, %v7462_v31 }
 0x5e3   : > { %v1884_v37 = vpop.f32.mrf.mxu0 }
 0x5e4   : > { %v1885_v39 = vadd.f32 %v1884_v37, %v7462_v31  ;;  %5392 = vmatprep.subr.msk.mxu0 %vm1415_vm0, %v1890_v35 }
 0x5e5   : > { %5393 = vmatpush3.xpose.msk.msra.mxu0 %vm1415_vm0, %v1890_v35  ;;  %v7540_v35 = vld [vmem:[%s8183_s11 + $0x18] sm:$0xff]  }
 0x5e6   : > { %5394 = vmatprep.subr.msk.mxu0 %vm1415_vm0, %v1885_v39  ;;  %v4638_v37 = vunpack.c.h.bf16 %v7540_v35 }
 0x5e9   : > { %5395 = vmatpush3.xpose.msk.msra.mxu0 %vm1415_vm0, %v1885_v39 }
 0x5eb   : > { %v5321_v34 = vpop.f32.mrf.mxu1 }
 0x5ec   : > { %v1748_v43 = vadd.f32 %v5321_v34, %v7460_v13 }
 0x5ed   : > { %v1742_v40 = vpop.f32.mrf.mxu1 }
 0x5ee   : > { %v1743_v41 = vadd.f32 %v1742_v40, %v7460_v13 }
 0x5f0   : > { %5396 = vmatprep.mubr.msk.f32.mxu0 %vm1415_vm0, %v1743_v41 }
 0x5f1   : > { %5397 = vmatmul.mubr.msk.f32.vlgmr.msra.gmra.mxu0 %vm1415_vm0, %v1748_v43 }
 0x60b   : > { %v5391_v53 = vpop.f32.mrf.mxu1 }
 0x60d   : > { %v2026_v54 = vpop.f32.mrf.mxu1 }
 0x6b1   : > { %v5398_v45 = vpop.f32.mrf.mxu0 }
 0x6b2   : > { %v2123_v31 = vmul.f32 0.17677669, %v5398_v45 }
 0x6b3   : > { %v2113_v46 = vpop.f32.mrf.mxu0 }
 0x6b4   : > { %v2122_v47 = vmul.f32 0.17677669, %v2113_v46  ;;  %v2127_v51 = vsel %vm1505_vm1, %v2123_v31, -inf }
 0x6b5   : > { %2128 = vmax.xlane.f32.xlu0 %v2127_v51 }
 0x6b6   : > { %v2124_v49 = vsel %vm1505_vm1, %v2122_v47, -inf }
 0x6b7   : > { %2125 = vmax.xlane.f32.xlu1 %v2124_v49 }
 0x6c8   : > { %1957 = vrot.lane.b32.xlu1 %v7311_v44, %s6538_s7 }
 0x6cc   : > { %5922 = vrot.lane.b32.xlu1 %v7327_v17, %s6539_s5 }
 0x6d0   : > { %5927 = vrot.lane.b32.xlu1 %v7333_v16, %s6539_s5 }
 0x6d4   : > { %5932 = vrot.lane.b32.xlu1 %v7343_v20, %s6539_s5 }
 0x6d8   : > { %5942 = vrot.lane.b32.xlu1 %v7355_v8, %s6539_s5 }
 0x6dc   : > { %5952 = vrot.lane.b32.xlu1 %v7367_v10, %s6539_s5 }
 0x6e0   : > { %5962 = vrot.lane.b32.xlu1 %v7379_v21, %s6539_s5 }
 0x6e4   : > { %5972 = vrot.lane.b32.xlu1 %v7391_v23, %s6539_s5 }
 0x6e8   : > { %5982 = vrot.lane.b32.xlu1 %v7403_v27, %s6539_s5 }
 0x6ec   : > { %2391 = vrot.lane.b32.xlu1 %v7181_v55, %s6539_s5 }
 0x6f0   : > { %2563 = vrot.lane.b32.xlu1 %v7294_v5, %s6539_s5 }
 0x6f4   : > { %2671 = vrot.lane.b32.xlu1 %v7199_v61, %s6539_s5 }
 0x6f8   : > { %2667 = vrot.lane.b32.xlu1 %v7225_v26, %s6539_s5 }
 0x6fc   : > { %2663 = vrot.lane.b32.xlu1 %v7235_v32, %s6539_s5 }
 0x700   : > { %2659 = vrot.lane.b32.xlu1 %v7244_v42, %s6539_s5 }
 0x704   : > { %2655 = vrot.lane.b32.xlu1 %v7253_v50, %s6539_s5 }
 0x708   : > { %2651 = vrot.lane.b32.xlu1 %v7262_v60, %s6539_s5 }
 0x70c   : > { %2647 = vrot.lane.b32.xlu1 %v7271_v0, %s6539_s5 }
 0x710   : > { %2643 = vrot.lane.b32.xlu1 %v7280_v3, %s6539_s5 }
 0x73e   : > { %v2129_v5 = vpop.xlane.xlu0 %2128 }
 0x73f   : > { %v2131_v44 = vsub.f32 %v2123_v31, %v2129_v5 }
 0x740   : > { %v2126_v13 = vpop.xlane.xlu1 %2125 }
 0x741   : > { %v2130_v52 = vsub.f32 %v2122_v47, %v2126_v13  ;;  %v2134_v57 = vmul.f32 1.442695, %v2131_v44 }
 0x743   : > { %v2132_v59 = vmul.f32 1.442695, %v2130_v52 }
 0x744   : > { %v1958_v18 = vpop.permute.xlu1 %1957 }
 0x745   : > { %6078 = vpow2.f32 %v2132_v59  ;;  %v2032_v36 = vadd.f32 %v5391_v53, %v1958_v18  ;;  %v2027_v1 = vadd.f32 %v2026_v54, %v1958_v18  ;;  %v4816_v18 = vld [vmem:[%s8183_s11 + $0x10] sm:$0xff]  }
 0x746   : > { %6080 = vpow2.f32 %v2134_v57 }
 0x747   : > { %5399 = vmatprep.subr.mxu0 %v2032_v36 }
 0x748   : > { %5400 = vmatpush3.msra.mxu0 %v2032_v36 }
 0x749   : > { %5401 = vmatprep.subr.mxu0 %v2027_v1 }
 0x74a   : > { %5402 = vmatpush3.msra.mxu0 %v2027_v1  ;;  %v4637_v1 = vunpack.c.l.bf16 %v7540_v35 }
 0x74b   : > { %5406 = vmatprep.subr.mxu0 %v4638_v37 }
 0x752   : > { %v6079_v62 = vpop.eup %6078 }
 0x753   : > { %v2136_v6 = vsel %vm1505_vm1, %v6079_v62, 0.0  ;;  %v6081_v19 = vpop.eup %6080 }
 0x754   : > { %2137 = vadd.xlane.f32.xlu0 %v2136_v6  ;;  %v2139_v12 = vsel %vm1505_vm1, %v6081_v19, 0.0 }
 0x758   : > { %2140 = vadd.xlane.f32.xlu0 %v2139_v12 }
 0x76e   : > { %5917 = vrot.lane.b32.xlu0 %v7337_v14, %s6539_s5 }
 0x772   : > { %5937 = vrot.lane.b32.xlu0 %v7349_v7, %s6539_s5 }
 0x776   : > { %5947 = vrot.lane.b32.xlu0 %v7361_v9, %s6539_s5 }
 0x77a   : > { %5957 = vrot.lane.b32.xlu0 %v7373_v11, %s6539_s5 }
 0x77e   : > { %5967 = vrot.lane.b32.xlu0 %v7385_v22, %s6539_s5 }
 0x782   : > { %5977 = vrot.lane.b32.xlu0 %v7397_v25, %s6539_s5 }
 0x786   : > { %5987 = vrot.lane.b32.xlu0 %v7409_v28, %s6539_s5 }
 0x78a   : > { %2389 = vrot.lane.b32.xlu0 %v7190_v58, %s6539_s5 }
 0x78e   : > { %2437 = vrot.lane.b32.xlu0 %v7299_v15, %s6539_s5  ;;  %v7563_v15 = vpop.permute.xlu1 %5922 }
 0x78f   : > { %v5924_v47 = vunpack.i.l.bf16 %v7563_v15 }
 0x792   : > { %2669 = vrot.lane.b32.xlu0 %v7221_v24, %s6539_s5  ;;  %v7565_v39 = vpop.permute.xlu1 %5927 }
 0x793   : > { %v5929_v49 = vunpack.i.l.bf16 %v7565_v39 }
 0x796   : > { %2665 = vrot.lane.b32.xlu0 %v7231_v30, %s6539_s5  ;;  %v7567_v40 = vpop.permute.xlu1 %5932 }
 0x797   : > { %v5934_v13 = vunpack.i.l.bf16 %v7567_v40 }
 0x79a   : > { %2661 = vrot.lane.b32.xlu0 %v7240_v38, %s6539_s5  ;;  %v7569_v45 = vpop.permute.xlu1 %5942 }
 0x79b   : > { %v5944_v36 = vunpack.i.l.bf16 %v7569_v45 }
 0x79e   : > { %2657 = vrot.lane.b32.xlu0 %v7249_v48, %s6539_s5  ;;  %v7575_v44 = vpop.permute.xlu1 %5952 }
 0x7a2   : > { %2653 = vrot.lane.b32.xlu0 %v7258_v56, %s6539_s5 }
 0x7a6   : > { %2649 = vrot.lane.b32.xlu0 %v7267_v63, %s6539_s5 }
 0x7aa   : > { %2645 = vrot.lane.b32.xlu0 %v7276_v2, %s6539_s5 }
 0x7ae   : > { %2641 = vrot.lane.b32.xlu0 %v7284_v4, %s6539_s5 }
 0x7dd   : > { %v2138_v34 = vpop.xlane.xlu0 %2137 }
 0x7de   : > { %6082 = vrcp.f32 %v2138_v34  ;;  %v4634_v34 = vunpack.c.h.bf16 %v4816_v18 }
 0x7e1   : > { %v2141_v41 = vpop.xlane.xlu0 %2140 }
 0x7e2   : > { %6084 = vrcp.f32 %v2141_v41  ;;  %v5954_v41 = vunpack.i.l.bf16 %v7575_v44 }
 0x7e5   : > { %v5918_v43 = vpop.permute.xlu0 %5917 }
 0x7e6   : > { %v5920_v31 = vunpack.i.h.bf16 %v5918_v43  ;;  %v5919_v46 = vunpack.i.l.bf16 %v5918_v43  ;;  %v5925_v43 = vunpack.i.h.bf16 %v7563_v15 }
 0x7e8   : > { %5463 = vmatprep.subr.mxu1 %v5919_v46 }
 0x7e9   : > { %5464 = vmatpush3.msra.mxu1 %v5919_v46  ;;  %v7572_v51 = vpop.permute.xlu0 %5937 }
 0x7ea   : > { %5465 = vmatprep.subr.mxu1 %v5920_v31  ;;  %v5939_v57 = vunpack.i.l.bf16 %v7572_v51 }
 0x7eb   : > { %v6083_v5 = vpop.eup %6082  ;;  %5466 = vmatpush3.msra.mxu1 %v5920_v31 }
 0x7ec   : > { %5467 = vmatprep.subr.mxu1 %v5924_v47  ;;  %v2144_v52 = vmul.f32 %v6083_v5, %v6079_v62  ;;  %v7587_v62 = vpop.permute.xlu1 %5962 }
 0x7ed   : > { %5468 = vmatpush3.msra.mxu1 %v5924_v47  ;;  %v7578_v53 = vpop.permute.xlu0 %5947 }
 0x7ee   : > { %5403 = vmatprep.mubr.msk.f32.mxu0 %vm1505_vm1, %v2144_v52  ;;  %5469 = vmatprep.subr.mxu1 %v5929_v49  ;;  %v5949_v12 = vunpack.i.l.bf16 %v7578_v53 }
 0x7ef   : > { %v6085_v59 = vpop.eup %6084  ;;  %5470 = vmatpush3.msra.mxu1 %v5929_v49 }
 0x7f0   : > { %5471 = vmatprep.subr.mxu1 %v5934_v13  ;;  %v2145_v54 = vmul.f32 %v6085_v59, %v6081_v19  ;;  %v4633_v19 = vunpack.c.l.bf16 %v4816_v18  ;;  %v7596_v46 = vpop.permute.xlu1 %5972 }
 0x7f1   : > { %5472 = vmatpush3.msra.mxu1 %v5934_v13  ;;  %v7585_v6 = vpop.permute.xlu0 %5957  ;;  %v5974_v15 = vunpack.i.l.bf16 %v7596_v46 }
 0x7f2   : > { %5404 = vmatmul.mubr.msk.f32.vlgmr.msra.gmra.mxu0 %vm1505_vm1, %v2145_v54  ;;  %5473 = vmatprep.subr.mxu1 %v5939_v57  ;;  %v5959_v31 = vunpack.i.l.bf16 %v7585_v6  ;;  %v5930_v54 = vunpack.i.h.bf16 %v7565_v39  ;;  %v5955_v39 = vunpack.i.h.bf16 %v7575_v44 }
 0x7f3   : > { %5474 = vmatpush3.msra.mxu1 %v5939_v57  ;;  %5407 = vmatpush3.msra.mxu0 %v4638_v37  ;;  %v5964_v37 = vunpack.i.l.bf16 %v7587_v62 }
 0x7f4   : > { %5475 = vmatprep.subr.mxu1 %v5944_v36  ;;  %5408 = vmatprep.subr.mxu0 %v4637_v1  ;;  %v7603_v5 = vpop.permute.xlu1 %5982 }
 0x7f5   : > { %5476 = vmatpush3.msra.mxu1 %v5944_v36  ;;  %v7592_v35 = vpop.permute.xlu0 %5967  ;;  %5409 = vmatpush3.msra.mxu0 %v4637_v1  ;;  %v5984_v57 = vunpack.i.l.bf16 %v7603_v5  ;;  %v5935_v1 = vunpack.i.h.bf16 %v7567_v40  ;;  %v5960_v40 = vunpack.i.h.bf16 %v7585_v6  ;;  %v5975_v6 = vunpack.i.h.bf16 %v7596_v46 }
 0x7f6   : > { %5477 = vmatprep.subr.mxu1 %v5949_v12  ;;  %5410 = vmatprep.subr.mxu0 %v4634_v34  ;;  %v5969_v49 = vunpack.i.l.bf16 %v7592_v35 }
 0x7f7   : > { %5478 = vmatpush3.msra.mxu1 %v5949_v12  ;;  %5411 = vmatpush3.msra.mxu0 %v4634_v34  ;;  %v5940_v12 = vunpack.i.h.bf16 %v7572_v51  ;;  %v5945_v34 = vunpack.i.h.bf16 %v7569_v45  ;;  %v7623_v45 = vpop.f32.mrf.mxu1 }
 0x7f8   : > { %5479 = vmatprep.subr.mxu1 %v5954_v41  ;;  %5412 = vmatprep.subr.mxu0 %v4633_v19 }
 0x7f9   : > { %5480 = vmatpush3.msra.mxu1 %v5954_v41  ;;  %v7599_v47 = vpop.permute.xlu0 %5977  ;;  %5413 = vmatpush3.msra.mxu0 %v4633_v19  ;;  %v2392_v41 = vpop.permute.xlu1 %2391 }
 0x7fa   : > { %5481 = vmatprep.subr.mxu1 %v5959_v31  ;;  %5428 = vmatprep.subr.mxu0 %v5925_v43  ;;  %v5979_v13 = vunpack.i.l.bf16 %v7599_v47 }
 0x7fb   : > { %5482 = vmatpush3.msra.mxu1 %v5959_v31  ;;  %v5950_v31 = vunpack.i.h.bf16 %v7578_v53  ;;  %v5970_v53 = vunpack.i.h.bf16 %v7592_v35 }
 0x7fc   : > { %5483 = vmatprep.subr.mxu1 %v5964_v37 }
 0x7fd   : > { %5484 = vmatpush3.msra.mxu1 %v5964_v37  ;;  %v7606_v52 = vpop.permute.xlu0 %5987  ;;  %v2564_v51 = vpop.permute.xlu1 %2563  ;;  %v5965_v37 = vunpack.i.h.bf16 %v7587_v62 }
 0x7fe   : > { %5485 = vmatprep.subr.mxu1 %v5969_v49  ;;  %v5989_v59 = vunpack.i.l.bf16 %v7606_v52  ;;  %v5990_v46 = vunpack.i.h.bf16 %v7606_v52 }
 0x7ff   : > { %5486 = vmatpush3.msra.mxu1 %v5969_v49  ;;  %v7627_v49 = vpop.f32.mrf.mxu1 }
 0x800   : > { %5487 = vmatprep.subr.mxu1 %v5974_v15 }
 0x801   : > { %5488 = vmatpush3.msra.mxu1 %v5974_v15  ;;  %v2390_v19 = vpop.permute.xlu0 %2389  ;;  %v2672_v44 = vpop.permute.xlu1 %2671 }
 0x802   : > { %5489 = vmatprep.subr.mxu1 %v5979_v13 }
 0x803   : > { %5490 = vmatpush3.msra.mxu1 %v5979_v13  ;;  %v5980_v13 = vunpack.i.h.bf16 %v7599_v47 }
 0x804   : > { %5491 = vmatprep.subr.mxu1 %v5984_v57 }
 0x805   : > { %5492 = vmatpush3.msra.mxu1 %v5984_v57 }
 0x806   : > { %5493 = vmatprep.subr.mxu1 %v5989_v59 }
 0x807   : > { %5494 = vmatpush3.msra.mxu1 %v5989_v59  ;;  %v5985_v59 = vunpack.i.h.bf16 %v7603_v5 }
 0x808   : > { %5496 = vmatmul.mubr.f32.vlgmr.msra.gmra.mxu1 %v8182_v33 }
 0x8b2   : > { %v5405_v18 = vpop.f32.mrf.mxu0 }
 0x8b4   : > { %v2218_v36 = vpop.f32.mrf.mxu0 }
 0x8b5   : > { %5414 = vmatprep.mubr.msk.f32.mxu0 %vm1415_vm0, %v2218_v36  ;;  %v2668_v36 = vpop.permute.xlu1 %2667 }
 0x8b6   : > { %5415 = vmatmul.mubr.msk.f32.vlgmr.msra.gmra.mxu0 %vm1415_vm0, %v5405_v18 }
 0x8b7   : > { %5429 = vmatpush3.msra.mxu0 %v5925_v43  ;;  %5460 = vmatprep.mubr.f32.mxu0 %v8181_v29  ;;  %v7621_v43 = vpop.permute.xlu0 %2437 }
 0x8b8   : > { %5430 = vmatprep.subr.mxu0 %v5930_v54 }
 0x8b9   : > { %5431 = vmatpush3.msra.mxu0 %v5930_v54  ;;  %v2664_v5 = vpop.permute.xlu1 %2663 }
 0x8ba   : > { %5432 = vmatprep.subr.mxu0 %v5935_v1 }
 0x8bb   : > { %5433 = vmatpush3.msra.mxu0 %v5935_v1  ;;  %v2670_v15 = vpop.permute.xlu0 %2669 }
 0x8bc   : > { %5434 = vmatprep.subr.mxu0 %v5940_v12 }
 0x8bd   : > { %5435 = vmatpush3.msra.mxu0 %v5940_v12  ;;  %v2660_v52 = vpop.permute.xlu1 %2659 }
 0x8be   : > { %5436 = vmatprep.subr.mxu0 %v5945_v34 }
 0x8bf   : > { %5437 = vmatpush3.msra.mxu0 %v5945_v34  ;;  %v2666_v47 = vpop.permute.xlu0 %2665 }
 0x8c0   : > { %5438 = vmatprep.subr.mxu0 %v5950_v31 }
 0x8c1   : > { %5439 = vmatpush3.msra.mxu0 %v5950_v31  ;;  %v2656_v12 = vpop.permute.xlu1 %2655 }
 0x8c2   : > { %5440 = vmatprep.subr.mxu0 %v5955_v39 }
 0x8c3   : > { %5441 = vmatpush3.msra.mxu0 %v5955_v39  ;;  %v2662_v54 = vpop.permute.xlu0 %2661 }
 0x8c4   : > { %5442 = vmatprep.subr.mxu0 %v5960_v40 }
 0x8c5   : > { %5443 = vmatpush3.msra.mxu0 %v5960_v40 }
 0x8c6   : > { %5444 = vmatprep.subr.mxu0 %v5965_v37 }
 0x8c7   : > { %5445 = vmatpush3.msra.mxu0 %v5965_v37  ;;  %v2658_v1 = vpop.permute.xlu0 %2657 }
 0x8c8   : > { %5446 = vmatprep.subr.mxu0 %v5970_v53  ;;  %v5497_v57 = vpop.f32.mrf.mxu1 }
 0x8c9   : > { %5447 = vmatpush3.msra.mxu0 %v5970_v53  ;;  %v2638_v62 = vadd.f32 %v5497_v57, %v2564_v51 }
 0x8ca   : > { %5448 = vmatprep.subr.mxu0 %v5975_v6  ;;  %v2632_v35 = vpop.f32.mrf.mxu1 }
 0x8cb   : > { %5449 = vmatpush3.msra.mxu0 %v5975_v6  ;;  %v2633_v18 = vadd.f32 %v2632_v35, %v2564_v51  ;;  %5533 = vmatprep.subr.msk.mxu1 %vm1415_vm0, %v2638_v62  ;;  %v2654_v34 = vpop.permute.xlu0 %2653 }
 0x8cc   : > { %5450 = vmatprep.subr.mxu0 %v5980_v13  ;;  %5534 = vmatpush3.xpose.msk.msra.mxu1 %vm1415_vm0, %v2638_v62 }
 0x8cd   : > { %5451 = vmatpush3.msra.mxu0 %v5980_v13  ;;  %5535 = vmatprep.subr.msk.mxu1 %vm1415_vm0, %v2633_v18 }
 0x8ce   : > { %5452 = vmatprep.subr.mxu0 %v5985_v59 }
 0x8cf   : > { %5453 = vmatpush3.msra.mxu0 %v5985_v59 }
 0x8d0   : > { %5454 = vmatprep.subr.mxu0 %v5990_v46  ;;  %5536 = vmatpush3.xpose.msk.msra.mxu1 %vm1415_vm0, %v2633_v18 }
 0x8d1   : > { %5455 = vmatpush3.msra.mxu0 %v5990_v46  ;;  %v7652_v46 = vld [vmem:[%s8179_s0] ss:$0 sm:$0xff] }
 0x8d2   : > { %5456 = vmatprep.subr.mxu0 %v2392_v41 }
 0x8d3   : > { %5457 = vmatpush3.msra.mxu0 %v2392_v41  ;;  %v2652_v41 = vpop.permute.xlu1 %2651 }
 0x8d4   : > { %5458 = vmatprep.subr.mxu0 %v2390_v19 }
 0x8d5   : > { %5459 = vmatpush3.msra.mxu0 %v2390_v19  ;;  %v2650_v19 = vpop.permute.xlu0 %2649 }
 0x8d6   : > { %5461 = vmatmul.mubr.f32.vlgmr.msra.gmra.mxu0 %v8182_v33  ;;  %5498 = vmatprep.subr.mxu0 %v2672_v44 }
 0x8d7   : > { %5499 = vmatpush3.msra.mxu0 %v2672_v44  ;;  %5530 = vmatprep.mubr.f32.mxu0 %v8181_v29  ;;  %v2648_v31 = vpop.permute.xlu1 %2647 }
 0x8d8   : > { %5500 = vmatprep.subr.mxu0 %v2670_v15 }
 0x8d9   : > { %5501 = vmatpush3.msra.mxu0 %v2670_v15  ;;  %v2646_v39 = vpop.permute.xlu0 %2645 }
 0x8da   : > { %5502 = vmatprep.subr.mxu0 %v2668_v36 }
 0x8db   : > { %5503 = vmatpush3.msra.mxu0 %v2668_v36  ;;  %v2644_v40 = vpop.permute.xlu1 %2643 }
 0x8dc   : > { %5504 = vmatprep.subr.mxu0 %v2666_v47 }
 0x8dd   : > { %5505 = vmatpush3.msra.mxu0 %v2666_v47  ;;  %v2642_v51 = vpop.permute.xlu0 %2641 }
 0x8de   : > { %5506 = vmatprep.subr.mxu0 %v2664_v5 }
 0x8df   : > { %5507 = vmatpush3.msra.mxu0 %v2664_v5 }
 0x8e0   : > { %5508 = vmatprep.subr.mxu0 %v2662_v54 }
 0x8e1   : > { %5509 = vmatpush3.msra.mxu0 %v2662_v54 }
 0x8e2   : > { %5510 = vmatprep.subr.mxu0 %v2660_v52 }
 0x8e3   : > { %5511 = vmatpush3.msra.mxu0 %v2660_v52 }
 0x8e4   : > { %5512 = vmatprep.subr.mxu0 %v2658_v1 }
 0x8e5   : > { %5513 = vmatpush3.msra.mxu0 %v2658_v1  ;;  %v4818_v1 = vld [vmem:[%s8183_s11 + $0x20] sm:$0xff]  }
 0x8e6   : > { %5514 = vmatprep.subr.mxu0 %v2656_v12 }
 0x8e7   : > { %5515 = vmatpush3.msra.mxu0 %v2656_v12 }
 0x8e8   : > { %5516 = vmatprep.subr.mxu0 %v2654_v34 }
 0x8e9   : > { %5517 = vmatpush3.msra.mxu0 %v2654_v34 }
 0x8ea   : > { %5518 = vmatprep.subr.mxu0 %v2652_v41 }
 0x8eb   : > { %5519 = vmatpush3.msra.mxu0 %v2652_v41 }
 0x8ec   : > { %5520 = vmatprep.subr.mxu0 %v2650_v19 }
 0x8ed   : > { %5521 = vmatpush3.msra.mxu0 %v2650_v19 }
 0x8ee   : > { %5522 = vmatprep.subr.mxu0 %v2648_v31 }
 0x8ef   : > { %5523 = vmatpush3.msra.mxu0 %v2648_v31 }
 0x8f0   : > { %5524 = vmatprep.subr.mxu0 %v2646_v39 }
 0x8f1   : > { %5525 = vmatpush3.msra.mxu0 %v2646_v39 }
 0x8f2   : > { %5526 = vmatprep.subr.mxu0 %v2644_v40 }
 0x8f3   : > { %5527 = vmatpush3.msra.mxu0 %v2644_v40  ;;  %v4642_v40 = vunpack.c.h.bf16 %v4818_v1 }
 0x8f4   : > { %5528 = vmatprep.subr.mxu0 %v2642_v51 }
 0x8f5   : > { %5529 = vmatpush3.msra.mxu0 %v2642_v51 }
 0x8f6   : > { %5531 = vmatmul.mubr.f32.vlgmr.msra.gmra.mxu0 %v8182_v33 }
 0x8f7   : > { %5625 = vmatprep.mubr.f32.mxu0 %v8181_v29 }
 0x976   : > { %v7641_v37 = vpop.f32.mrf.mxu0 }
 0x978   : > { %v7643_v53 = vpop.f32.mrf.mxu0 }
 0x996   : > { %v5462_v44 = vpop.f32.mrf.mxu0 }
 0x997   : > { %v2512_v13 = vadd.f32 %v5462_v44, %v7621_v43  ;;  %v4641_v44 = vunpack.c.l.bf16 %v4818_v1 }
 0x998   : > { %v2506_v6 = vpop.f32.mrf.mxu0 }
 0x999   : > { %v2507_v15 = vadd.f32 %v2506_v6, %v7621_v43 }
 0x99b   : > { %5537 = vmatprep.mubr.msk.f32.mxu1 %vm1415_vm0, %v2507_v15 }
 0x99c   : > { %5538 = vmatmul.mubr.msk.f32.vlgmr.msra.gmra.mxu1 %vm1415_vm0, %v2512_v13 }
 0xa5c   : > { %v5539_v57 = vpop.f32.mrf.mxu1 }
 0xa5d   : > { %v2855_v62 = vmul.f32 0.17677669, %v5539_v57 }
 0xa5e   : > { %v2845_v59 = vpop.f32.mrf.mxu1 }
 0xa5f   : > { %v2854_v35 = vmul.f32 0.17677669, %v2845_v59  ;;  %v2859_v18 = vsel %vm1505_vm1, %v2855_v62, -inf }
 0xa60   : > { %2860 = vmax.xlane.f32.xlu0 %v2859_v18 }
 0xa61   : > { %v2856_v36 = vsel %vm1505_vm1, %v2854_v35, -inf }
 0xa62   : > { %2857 = vmax.xlane.f32.xlu1 %v2856_v36 }
 0xa73   : > { %2689 = vrot.lane.b32.xlu1 %v7652_v46, %s6539_s5 }
 0xa77   : > { %5997 = vrot.lane.b32.xlu1 %v7327_v17, %s6540_s22  ;;  %v6131_v17 = vld [vmem:[%s7010_s6] ss:$0 sm:$0xff] }
 0xa7b   : > { %6002 = vrot.lane.b32.xlu1 %v7333_v16, %s6540_s22 }
 0xa7f   : > { %6007 = vrot.lane.b32.xlu1 %v7343_v20, %s6540_s22 }
 0xa83   : > { %6017 = vrot.lane.b32.xlu1 %v7355_v8, %s6540_s22 }
 0xa87   : > { %6027 = vrot.lane.b32.xlu1 %v7367_v10, %s6540_s22 }
 0xa8b   : > { %6037 = vrot.lane.b32.xlu1 %v7379_v21, %s6540_s22 }
 0xa8f   : > { %6047 = vrot.lane.b32.xlu1 %v7391_v23, %s6540_s22 }
 0xa93   : > { %6057 = vrot.lane.b32.xlu1 %v7403_v27, %s6540_s22  ;;  %v7709_v27 = vld [vmem:[%s8183_s11 + $0x28] sm:$0xff]  }
 0xa94   : > { %v4645_v41 = vunpack.c.l.bf16 %v7709_v27 }
 0xa97   : > { %3044 = vrot.lane.b32.xlu1 %v7181_v55, %s6540_s22 }
 0xa9b   : > { %3216 = vrot.lane.b32.xlu1 %v6131_v17, %s6540_s22 }
 0xa9f   : > { %3324 = vrot.lane.b32.xlu1 %v7199_v61, %s6540_s22 }
 0xaa3   : > { %3320 = vrot.lane.b32.xlu1 %v7225_v26, %s6540_s22 }
 0xaa7   : > { %3316 = vrot.lane.b32.xlu1 %v7235_v32, %s6540_s22  ;;  %v5532_v32 = vpop.f32.mrf.mxu0 }
 0xaab   : > { %3312 = vrot.lane.b32.xlu1 %v7244_v42, %s6540_s22 }
 0xaaf   : > { %3308 = vrot.lane.b32.xlu1 %v7253_v50, %s6540_s22  ;;  %v2758_v50 = vpop.f32.mrf.mxu0 }
 0xab3   : > { %3304 = vrot.lane.b32.xlu1 %v7262_v60, %s6540_s22 }
 0xab7   : > { %3300 = vrot.lane.b32.xlu1 %v7271_v0, %s6540_s22 }
 0xabb   : > { %3296 = vrot.lane.b32.xlu1 %v7280_v3, %s6540_s22 }
 0xae9   : > { %v2861_v55 = vpop.xlane.xlu0 %2860 }
 0xaea   : > { %v2863_v61 = vsub.f32 %v2855_v62, %v2861_v55 }
 0xaeb   : > { %v2858_v26 = vpop.xlane.xlu1 %2857 }
 0xaec   : > { %v2862_v16 = vsub.f32 %v2854_v35, %v2858_v26  ;;  %v2866_v20 = vmul.f32 1.442695, %v2863_v61 }
 0xaee   : > { %v2864_v8 = vmul.f32 1.442695, %v2862_v16 }
 0xaef   : > { %v2690_v42 = vpop.permute.xlu1 %2689 }
 0xaf0   : > { %6086 = vpow2.f32 %v2864_v8  ;;  %v2764_v10 = vadd.f32 %v5532_v32, %v2690_v42  ;;  %v2759_v21 = vadd.f32 %v2758_v50, %v2690_v42 }
 0xaf1   : > { %6088 = vpow2.f32 %v2866_v20 }
 0xaf2   : > { %5540 = vmatprep.subr.mxu1 %v2764_v10 }
 0xaf3   : > { %5541 = vmatpush3.msra.mxu1 %v2764_v10 }
 0xaf4   : > { %5542 = vmatprep.subr.mxu1 %v2759_v21 }
 0xaf5   : > { %5543 = vmatpush3.msra.mxu1 %v2759_v21 }
 0xafd   : > { %v6087_v60 = vpop.eup %6086 }
 0xafe   : > { %v2868_v0 = vsel %vm1505_vm1, %v6087_v60, 0.0  ;;  %v6089_v3 = vpop.eup %6088 }
 0xaff   : > { %2869 = vadd.xlane.f32.xlu0 %v2868_v0  ;;  %v2871_v23 = vsel %vm1505_vm1, %v6089_v3, 0.0 }
 0xb03   : > { %2872 = vadd.xlane.f32.xlu0 %v2871_v23 }
 0xb19   : > { %5992 = vrot.lane.b32.xlu0 %v7337_v14, %s6540_s22  ;;  %v4646_v14 = vunpack.c.h.bf16 %v7709_v27 }
 0xb1b   : > { %5547 = vmatprep.subr.mxu1 %v4646_v14 }
 0xb1d   : > { %6012 = vrot.lane.b32.xlu0 %v7349_v7, %s6540_s22  ;;  %v6132_v7 = vld [vmem:[%s8184_s9] ss:$0 sm:$0xff] }
 0xb21   : > { %6022 = vrot.lane.b32.xlu0 %v7361_v9, %s6540_s22 }
 0xb25   : > { %6032 = vrot.lane.b32.xlu0 %v7373_v11, %s6540_s22 }
 0xb29   : > { %6042 = vrot.lane.b32.xlu0 %v7385_v22, %s6540_s22 }
 0xb2d   : > { %6052 = vrot.lane.b32.xlu0 %v7397_v25, %s6540_s22 }
 0xb31   : > { %6062 = vrot.lane.b32.xlu0 %v7409_v28, %s6540_s22 }
 0xb35   : > { %3042 = vrot.lane.b32.xlu0 %v7190_v58, %s6540_s22  ;;  %v7733_v58 = vpop.permute.xlu1 %5997 }
 0xb36   : > { %v6000_v15 = vunpack.i.h.bf16 %v7733_v58 }
 0xb39   : > { %3090 = vrot.lane.b32.xlu0 %v6132_v7, %s6540_s22 }
 0xb3d   : > { %3322 = vrot.lane.b32.xlu0 %v7221_v24, %s6540_s22  ;;  %v7735_v24 = vpop.permute.xlu1 %6002 }
 0xb3e   : > { %v6004_v22 = vunpack.i.l.bf16 %v7735_v24  ;;  %v6005_v20 = vunpack.i.h.bf16 %v7735_v24 }
 0xb41   : > { %3318 = vrot.lane.b32.xlu0 %v7231_v30, %s6540_s22 }
 0xb45   : > { %3314 = vrot.lane.b32.xlu0 %v7240_v38, %s6540_s22  ;;  %v7737_v38 = vpop.permute.xlu1 %6007 }
 0xb46   : > { %v6009_v43 = vunpack.i.l.bf16 %v7737_v38  ;;  %v6010_v8 = vunpack.i.h.bf16 %v7737_v38 }
 0xb49   : > { %3310 = vrot.lane.b32.xlu0 %v7249_v48, %s6540_s22  ;;  %v7739_v9 = vpop.permute.xlu1 %6017 }
 0xb4a   : > { %v6019_v12 = vunpack.i.l.bf16 %v7739_v9  ;;  %v6020_v10 = vunpack.i.h.bf16 %v7739_v9 }
 0xb4d   : > { %3306 = vrot.lane.b32.xlu0 %v7258_v56, %s6540_s22  ;;  %v7745_v28 = vpop.permute.xlu1 %6027 }
 0xb4e   : > { %v6029_v51 = vunpack.i.l.bf16 %v7745_v28  ;;  %v6030_v0 = vunpack.i.h.bf16 %v7745_v28 }
 0xb51   : > { %3302 = vrot.lane.b32.xlu0 %v7267_v63, %s6540_s22  ;;  %v7757_v31 = vpop.permute.xlu1 %6037 }
 0xb52   : > { %v6039_v62 = vunpack.i.l.bf16 %v7757_v31 }
 0xb55   : > { %3298 = vrot.lane.b32.xlu0 %v7276_v2, %s6540_s22  ;;  %v5999_v2 = vunpack.i.l.bf16 %v7733_v58  ;;  %v7766_v57 = vpop.permute.xlu1 %6047 }
 0xb56   : > { %v6049_v18 = vunpack.i.l.bf16 %v7766_v57  ;;  %v6050_v24 = vunpack.i.h.bf16 %v7766_v57 }
 0xb59   : > { %3294 = vrot.lane.b32.xlu0 %v7284_v4, %s6540_s22  ;;  %v7773_v36 = vpop.permute.xlu1 %6057 }
 0xb5a   : > { %v6059_v61 = vunpack.i.l.bf16 %v7773_v36  ;;  %v6060_v9 = vunpack.i.h.bf16 %v7773_v36 }
 0xb5d   : > { %v3045_v50 = vpop.permute.xlu1 %3044 }
 0xb61   : > { %v3217_v23 = vpop.permute.xlu1 %3216 }
 0xb65   : > { %v3325_v58 = vpop.permute.xlu1 %3324 }
 0xb88   : > { %v2870_v30 = vpop.xlane.xlu0 %2869 }
 0xb89   : > { %6090 = vrcp.f32 %v2870_v30 }
 0xb8c   : > { %v2873_v48 = vpop.xlane.xlu0 %2872 }
 0xb8d   : > { %6092 = vrcp.f32 %v2873_v48 }
 0xb90   : > { %v5993_v56 = vpop.permute.xlu0 %5992 }
 0xb91   : > { %v5995_v63 = vunpack.i.h.bf16 %v5993_v56  ;;  %v5994_v11 = vunpack.i.l.bf16 %v5993_v56 }
 0xb93   : > { %5593 = vmatprep.subr.mxu0 %v5994_v11 }
 0xb94   : > { %5594 = vmatpush3.msra.mxu0 %v5994_v11  ;;  %v7742_v4 = vpop.permute.xlu0 %6012 }
 0xb95   : > { %5595 = vmatprep.subr.mxu0 %v5995_v63  ;;  %v6014_v54 = vunpack.i.l.bf16 %v7742_v4  ;;  %v6015_v42 = vunpack.i.h.bf16 %v7742_v4 }
 0xb96   : > { %v6091_v25 = vpop.eup %6090  ;;  %5596 = vmatpush3.msra.mxu0 %v5995_v63 }
 0xb97   : > { %5597 = vmatprep.subr.mxu0 %v5999_v2  ;;  %v2876_v47 = vmul.f32 %v6091_v25, %v6087_v60 }
 0xb98   : > { %5598 = vmatpush3.msra.mxu0 %v5999_v2  ;;  %v7748_v5 = vpop.permute.xlu0 %6022  ;;  %v3321_v2 = vpop.permute.xlu1 %3320 }
 0xb99   : > { %5544 = vmatprep.mubr.msk.f32.mxu1 %vm1505_vm1, %v2876_v47  ;;  %5599 = vmatprep.subr.mxu0 %v6004_v22  ;;  %v6024_v39 = vunpack.i.l.bf16 %v7748_v5  ;;  %v6025_v60 = vunpack.i.h.bf16 %v7748_v5 }
 0xb9a   : > { %v6093_v52 = vpop.eup %6092  ;;  %5600 = vmatpush3.msra.mxu0 %v6004_v22 }
 0xb9b   : > { %5601 = vmatprep.subr.mxu0 %v6009_v43  ;;  %v2877_v34 = vmul.f32 %v6093_v52, %v6089_v3 }
 0xb9c   : > { %5602 = vmatpush3.msra.mxu0 %v6009_v43  ;;  %v7755_v19 = vpop.permute.xlu0 %6032  ;;  %v3317_v25 = vpop.permute.xlu1 %3316 }
 0xb9d   : > { %5545 = vmatmul.mubr.msk.f32.vlgmr.msra.gmra.mxu1 %vm1505_vm1, %v2877_v34  ;;  %5603 = vmatprep.subr.mxu0 %v6014_v54  ;;  %v6034_v13 = vunpack.i.l.bf16 %v7755_v19  ;;  %v6035_v3 = vunpack.i.h.bf16 %v7755_v19  ;;  %v2386_v19 = vadd.f32 %v7623_v45, %v7641_v37 }
 0xb9e   : > { %5604 = vmatpush3.msra.mxu0 %v6014_v54  ;;  %5548 = vmatpush3.msra.mxu1 %v4646_v14  ;;  %v6040_v14 = vunpack.i.h.bf16 %v7757_v31 }
 0xb9f   : > { %5605 = vmatprep.subr.mxu0 %v6019_v12  ;;  %5549 = vmatprep.subr.mxu1 %v4645_v41 }
 0xba0   : > { %5606 = vmatpush3.msra.mxu0 %v6019_v12  ;;  %v7762_v6 = vpop.permute.xlu0 %6042  ;;  %5550 = vmatpush3.msra.mxu1 %v4645_v41  ;;  %v3313_v43 = vpop.permute.xlu1 %3312 }
 0xba1   : > { %5607 = vmatprep.subr.mxu0 %v6024_v39  ;;  %5551 = vmatprep.subr.mxu1 %v4642_v40  ;;  %v6044_v35 = vunpack.i.l.bf16 %v7762_v6  ;;  %v6045_v7 = vunpack.i.h.bf16 %v7762_v6 }
 0xba2   : > { %5608 = vmatpush3.msra.mxu0 %v6024_v39  ;;  %5552 = vmatpush3.msra.mxu1 %v4642_v40  ;;  %v2381_v39 = vadd.f32 %v7627_v49, %v7643_v53 }
 0xba3   : > { %5609 = vmatprep.subr.mxu0 %v6029_v51  ;;  %5553 = vmatprep.subr.mxu1 %v4641_v44 }
 0xba4   : > { %5610 = vmatpush3.msra.mxu0 %v6029_v51  ;;  %v7769_v59 = vpop.permute.xlu0 %6052  ;;  %5554 = vmatpush3.msra.mxu1 %v4641_v44  ;;  %v3309_v5 = vpop.permute.xlu1 %3308 }
 0xba5   : > { %5611 = vmatprep.subr.mxu0 %v6034_v13  ;;  %5558 = vmatprep.subr.mxu1 %v6000_v15  ;;  %v6054_v17 = vunpack.i.l.bf16 %v7769_v59  ;;  %v6055_v38 = vunpack.i.h.bf16 %v7769_v59 }
 0xba6   : > { %5612 = vmatpush3.msra.mxu0 %v6034_v13 }
 0xba7   : > { %5613 = vmatprep.subr.mxu0 %v6039_v62 }
 0xba8   : > { %5614 = vmatpush3.msra.mxu0 %v6039_v62  ;;  %v7776_v55 = vpop.permute.xlu0 %6062  ;;  %v3305_v52 = vpop.permute.xlu1 %3304 }
 0xba9   : > { %5615 = vmatprep.subr.mxu0 %v6044_v35  ;;  %v6064_v26 = vunpack.i.l.bf16 %v7776_v55  ;;  %v6065_v4 = vunpack.i.h.bf16 %v7776_v55 }
 0xbaa   : > { %5616 = vmatpush3.msra.mxu0 %v6044_v35 }
 0xbab   : > { %5617 = vmatprep.subr.mxu0 %v6049_v18 }
 0xbac   : > { %5618 = vmatpush3.msra.mxu0 %v6049_v18  ;;  %v3043_v21 = vpop.permute.xlu0 %3042  ;;  %v3301_v1 = vpop.permute.xlu1 %3300 }
 0xbad   : > { %5619 = vmatprep.subr.mxu0 %v6054_v17 }
 0xbae   : > { %5620 = vmatpush3.msra.mxu0 %v6054_v17 }
 0xbaf   : > { %5621 = vmatprep.subr.mxu0 %v6059_v61 }
 0xbb0   : > { %5622 = vmatpush3.msra.mxu0 %v6059_v61  ;;  %v7791_v27 = vpop.permute.xlu0 %3090  ;;  %v3297_v34 = vpop.permute.xlu1 %3296 }
 0xbb1   : > { %5623 = vmatprep.subr.mxu0 %v6064_v26 }
 0xbb2   : > { %5624 = vmatpush3.msra.mxu0 %v6064_v26 }
 0xbb3   : > { %5626 = vmatmul.mubr.f32.vlgmr.msra.gmra.mxu0 %v8182_v33 }
 0xbb4   : > { %v3323_v30 = vpop.permute.xlu0 %3322 }
 0xbb8   : > { %v3319_v22 = vpop.permute.xlu0 %3318 }
 0xbbc   : > { %v3315_v28 = vpop.permute.xlu0 %3314 }
 0xbc0   : > { %v3311_v47 = vpop.permute.xlu0 %3310 }
 0xbc4   : > { %v3307_v54 = vpop.permute.xlu0 %3306 }
 0xc5d   : > { %v5546_v16 = vpop.f32.mrf.mxu1 }
 0xc5f   : > { %v2950_v32 = vpop.f32.mrf.mxu1 }
 0xc60   : > { %5555 = vmatprep.mubr.msk.f32.mxu1 %vm1415_vm0, %v2950_v32 }
 0xc61   : > { %5556 = vmatmul.mubr.msk.f32.vlgmr.msra.gmra.mxu1 %vm1415_vm0, %v5546_v16 }
 0xc62   : > { %5559 = vmatpush3.msra.mxu1 %v6000_v15  ;;  %5590 = vmatprep.mubr.f32.mxu1 %v8181_v29 }
 0xc63   : > { %5560 = vmatprep.subr.mxu1 %v6005_v20 }
 0xc64   : > { %5561 = vmatpush3.msra.mxu1 %v6005_v20 }
 0xc65   : > { %5562 = vmatprep.subr.mxu1 %v6010_v8 }
 0xc66   : > { %5563 = vmatpush3.msra.mxu1 %v6010_v8 }
 0xc67   : > { %5564 = vmatprep.subr.mxu1 %v6015_v42 }
 0xc68   : > { %5565 = vmatpush3.msra.mxu1 %v6015_v42 }
 0xc69   : > { %5566 = vmatprep.subr.mxu1 %v6020_v10 }
 0xc6a   : > { %5567 = vmatpush3.msra.mxu1 %v6020_v10 }
 0xc6b   : > { %5568 = vmatprep.subr.mxu1 %v6025_v60 }
 0xc6c   : > { %5569 = vmatpush3.msra.mxu1 %v6025_v60 }
 0xc6d   : > { %5570 = vmatprep.subr.mxu1 %v6030_v0 }
 0xc6e   : > { %5571 = vmatpush3.msra.mxu1 %v6030_v0 }
 0xc6f   : > { %5572 = vmatprep.subr.mxu1 %v6035_v3 }
 0xc70   : > { %5573 = vmatpush3.msra.mxu1 %v6035_v3 }
 0xc71   : > { %5574 = vmatprep.subr.mxu1 %v6040_v14 }
 0xc72   : > { %5575 = vmatpush3.msra.mxu1 %v6040_v14 }
 0xc73   : > { %5576 = vmatprep.subr.mxu1 %v6045_v7  ;;  %v5627_v48 = vpop.f32.mrf.mxu0 }
 0xc74   : > { %5577 = vmatpush3.msra.mxu1 %v6045_v7  ;;  %v3291_v56 = vadd.f32 %v5627_v48, %v3217_v23 }
 0xc75   : > { %5578 = vmatprep.subr.mxu1 %v6050_v24  ;;  %v3285_v63 = vpop.f32.mrf.mxu0 }
 0xc76   : > { %5579 = vmatpush3.msra.mxu1 %v6050_v24  ;;  %v3286_v11 = vadd.f32 %v3285_v63, %v3217_v23  ;;  %5663 = vmatprep.subr.msk.mxu0 %vm1415_vm0, %v3291_v56 }
 0xc77   : > { %5580 = vmatprep.subr.mxu1 %v6055_v38  ;;  %5664 = vmatpush3.xpose.msk.msra.mxu0 %vm1415_vm0, %v3291_v56  ;;  %v6134_v56 = vld [vmem:[#allocation2 + $0x8] sm:$0xff] }
 0xc78   : > { %5581 = vmatpush3.msra.mxu1 %v6055_v38  ;;  %5665 = vmatprep.subr.msk.mxu0 %vm1415_vm0, %v3286_v11  ;;  %v6133_v38 = vld [vmem:[#allocation2] sm:$0xff] }
 0xc79   : > { %5582 = vmatprep.subr.mxu1 %v6060_v9  ;;  %v3710_v48 = vmul.f32 %v6133_v38, %v6133_v38 }
 0xc7a   : > { %5583 = vmatpush3.msra.mxu1 %v6060_v9  ;;  %v3711_v9 = vmul.f32 %v6134_v56, %v6134_v56 }
 0xc7b   : > { %5584 = vmatprep.subr.mxu1 %v6065_v4  ;;  %5666 = vmatpush3.xpose.msk.msra.mxu0 %vm1415_vm0, %v3286_v11 }
 0xc7c   : > { %5585 = vmatpush3.msra.mxu1 %v6065_v4 }
 0xc7d   : > { %5586 = vmatprep.subr.mxu1 %v3045_v50 }
 0xc7e   : > { %5587 = vmatpush3.msra.mxu1 %v3045_v50  ;;  %v4821_v50 = vld [vmem:[%s8183_s11 + $0x38] sm:$0xff]  }
 0xc7f   : > { %5588 = vmatprep.subr.mxu1 %v3043_v21  ;;  %v4653_v7 = vunpack.c.l.bf16 %v4821_v50 }
 0xc80   : > { %5589 = vmatpush3.msra.mxu1 %v3043_v21  ;;  %v4654_v21 = vunpack.c.h.bf16 %v4821_v50  ;;  %v3779_v50 = vld [vmem:[%s8186_s23 + $0x58] sm:$0xff] }
 0xc81   : > { %5591 = vmatmul.mubr.f32.vlgmr.msra.gmra.mxu1 %v8182_v33  ;;  %5628 = vmatprep.subr.mxu1 %v3325_v58 }
 0xc82   : > { %5629 = vmatpush3.msra.mxu1 %v3325_v58  ;;  %5660 = vmatprep.mubr.f32.mxu1 %v8181_v29  ;;  %v3303_v29 = vpop.permute.xlu0 %3302  ;;  %v4820_v58 = vld [vmem:[%s8183_s11 + $0x30] sm:$0xff]  }
 0xc83   : > { %5630 = vmatprep.subr.mxu1 %v3323_v30  ;;  %v4650_v24 = vunpack.c.h.bf16 %v4820_v58 }
 0xc84   : > { %5631 = vmatpush3.msra.mxu1 %v3323_v30  ;;  %v4649_v30 = vunpack.c.l.bf16 %v4820_v58 }
 0xc85   : > { %5632 = vmatprep.subr.mxu1 %v3321_v2 }
 0xc86   : > { %5633 = vmatpush3.msra.mxu1 %v3321_v2  ;;  %v3299_v12 = vpop.permute.xlu0 %3298 }
 0xc87   : > { %5634 = vmatprep.subr.mxu1 %v3319_v22 }
 0xc88   : > { %5635 = vmatpush3.msra.mxu1 %v3319_v22 }
 0xc89   : > { %5636 = vmatprep.subr.mxu1 %v3317_v25 }
 0xc8a   : > { %5637 = vmatpush3.msra.mxu1 %v3317_v25  ;;  %v3295_v41 = vpop.permute.xlu0 %3294 }
 0xc8b   : > { %5638 = vmatprep.subr.mxu1 %v3315_v28 }
 0xc8c   : > { %5639 = vmatpush3.msra.mxu1 %v3315_v28  ;;  %v4605_v28 = vld [vmem:[%s976_s13] ss:$0 sm:$0xff] }
 0xc8d   : > { %5640 = vmatprep.subr.mxu1 %v3313_v43 }
 0xc8e   : > { %5641 = vmatpush3.msra.mxu1 %v3313_v43 }
 0xc8f   : > { %5642 = vmatprep.subr.mxu1 %v3311_v47 }
 0xc90   : > { %5643 = vmatpush3.msra.mxu1 %v3311_v47 }
 0xc91   : > { %5644 = vmatprep.subr.mxu1 %v3309_v5 }
 0xc92   : > { %5645 = vmatpush3.msra.mxu1 %v3309_v5 }
 0xc93   : > { %5646 = vmatprep.subr.mxu1 %v3307_v54 }
 0xc94   : > { %5647 = vmatpush3.msra.mxu1 %v3307_v54 }
 0xc95   : > { %5648 = vmatprep.subr.mxu1 %v3305_v52 }
 0xc96   : > { %5649 = vmatpush3.msra.mxu1 %v3305_v52 }
 0xc97   : > { %5650 = vmatprep.subr.mxu1 %v3303_v29 }
 0xc98   : > { %5651 = vmatpush3.msra.mxu1 %v3303_v29 }
 0xc99   : > { %5652 = vmatprep.subr.mxu1 %v3301_v1 }
 0xc9a   : > { %5653 = vmatpush3.msra.mxu1 %v3301_v1 }
 0xc9b   : > { %5654 = vmatprep.subr.mxu1 %v3299_v12 }
 0xc9c   : > { %5655 = vmatpush3.msra.mxu1 %v3299_v12 }
 0xc9d   : > { %5656 = vmatprep.subr.mxu1 %v3297_v34 }
 0xc9e   : > { %5657 = vmatpush3.msra.mxu1 %v3297_v34 }
 0xc9f   : > { %5658 = vmatprep.subr.mxu1 %v3295_v41 }
 0xca0   : > { %5659 = vmatpush3.msra.mxu1 %v3295_v41 }
 0xca1   : > { %5661 = vmatmul.mubr.f32.vlgmr.msra.gmra.mxu1 %v8182_v33 }
 0xd21   : > { %v5557_v31 = vpop.f32.mrf.mxu1 }
 0xd22   : > { %v7810_v40 = vadd.f32 %v5557_v31, %v2386_v19 }
 0xd23   : > { %v3031_v51 = vpop.f32.mrf.mxu1 }
 0xd24   : > { %v7812_v44 = vadd.f32 %v3031_v51, %v2381_v39 }
 0xd41   : > { %v5592_v6 = vpop.f32.mrf.mxu1 }
 0xd42   : > { %v3165_v57 = vadd.f32 %v5592_v6, %v7791_v27 }
 0xd43   : > { %v3159_v15 = vpop.f32.mrf.mxu1 }
 0xd44   : > { %v3160_v13 = vadd.f32 %v3159_v15, %v7791_v27 }
 0xd46   : > { %5667 = vmatprep.mubr.msk.f32.mxu0 %vm1415_vm0, %v3160_v13 }
 0xd47   : > { %5668 = vmatmul.mubr.msk.f32.vlgmr.msra.gmra.mxu0 %vm1415_vm0, %v3165_v57 }
 0xd61   : > { %v5662_v17 = vpop.f32.mrf.mxu1 }
 0xd63   : > { %v3411_v32 = vpop.f32.mrf.mxu1 }
 0xe07   : > { %v5669_v33 = vpop.f32.mrf.mxu0 }
 0xe08   : > { %v3508_v45 = vmul.f32 0.17677669, %v5669_v33  ;;  %v3783_v33 = vld [vmem:[%s8186_s23 + $0x78] sm:$0xff] }
 0xe09   : > { %v3498_v37 = vpop.f32.mrf.mxu0 }
 0xe0a   : > { %v3507_v62 = vmul.f32 0.17677669, %v3498_v37  ;;  %v3512_v49 = vsel %vm1505_vm1, %v3508_v45, -inf  ;;  %v3781_v37 = vld [vmem:[%s8186_s23 + $0x68] sm:$0xff] }
 0xe0b   : > { %3513 = vmax.xlane.f32.xlu0 %v3512_v49  ;;  %v3815_v49 = vunpack.c.h.bf16 %v3783_v33 }
 0xe0c   : > { %v3509_v53 = vsel %vm1505_vm1, %v3507_v62, -inf }
 0xe0d   : > { %3510 = vmax.xlane.f32.xlu1 %v3509_v53 }
 0xe1e   : > { %3342 = vrot.lane.b32.xlu1 %v7652_v46, %s6540_s22 }
 0xe94   : > { %v3514_v59 = vpop.xlane.xlu0 %3513 }
 0xe95   : > { %v3516_v35 = vsub.f32 %v3508_v45, %v3514_v59  ;;  %v3782_v45 = vld [vmem:[%s8186_s23 + $0x70] sm:$0xff] }
 0xe96   : > { %v3511_v18 = vpop.xlane.xlu1 %3510  ;;  %v3813_v53 = vunpack.c.h.bf16 %v3782_v45  ;;  %v3812_v59 = vunpack.c.l.bf16 %v3782_v45 }
 0xe97   : > { %v3515_v36 = vsub.f32 %v3507_v62, %v3511_v18  ;;  %v3519_v55 = vmul.f32 1.442695, %v3516_v35  ;;  %v3814_v62 = vunpack.c.l.bf16 %v3783_v33  ;;  %v3780_v35 = vld [vmem:[%s8186_s23 + $0x60] sm:$0xff]  ;;  %v3811_v18 = vunpack.c.h.bf16 %v3781_v37 }
 0xe99   : > { %v3517_v61 = vmul.f32 1.442695, %v3515_v36  ;;  %v3810_v36 = vunpack.c.l.bf16 %v3781_v37 }
 0xe9a   : > { %v3343_v26 = vpop.permute.xlu1 %3342 }
 0xe9b   : > { %6094 = vpow2.f32 %v3517_v61  ;;  %v3417_v16 = vadd.f32 %v5662_v17, %v3343_v26  ;;  %v3412_v20 = vadd.f32 %v3411_v32, %v3343_v26  ;;  %v3809_v17 = vunpack.c.h.bf16 %v3780_v35 }
 0xe9c   : > { %6096 = vpow2.f32 %v3519_v55  ;;  %v3808_v55 = vunpack.c.l.bf16 %v3780_v35 }
 0xe9d   : > { %5670 = vmatprep.subr.mxu0 %v3417_v16 }
 0xe9e   : > { %5671 = vmatpush3.msra.mxu0 %v3417_v16 }
 0xe9f   : > { %5672 = vmatprep.subr.mxu0 %v3412_v20 }
 0xea0   : > { %5673 = vmatpush3.msra.mxu0 %v3412_v20 }
 0xea1   : > { %5677 = vmatprep.subr.mxu0 %v4654_v21 }
 0xea8   : > { %v6095_v8 = vpop.eup %6094 }
 0xea9   : > { %v3521_v46 = vsel %vm1505_vm1, %v6095_v8, 0.0  ;;  %v6097_v42 = vpop.eup %6096 }
 0xeaa   : > { %3522 = vadd.xlane.f32.xlu0 %v3521_v46  ;;  %v3524_v10 = vsel %vm1505_vm1, %v6097_v42, 0.0 }
 0xeae   : > { %3525 = vadd.xlane.f32.xlu0 %v3524_v10 }
 0xeb2   : > { %3712 = vadd.xlane.f32.xlu0 %v3710_v48  ;;  %v3775_v48 = vld [vmem:[%s8186_s23 + $0x38] sm:$0xff] }
 0xeb6   : > { %3714 = vadd.xlane.f32.xlu0 %v3711_v9  ;;  %v3798_v9 = vunpack.c.l.bf16 %v3775_v48 }
 0xf33   : > { %v3523_v60 = vpop.xlane.xlu0 %3522 }
 0xf34   : > { %6098 = vrcp.f32 %v3523_v60  ;;  %v3806_v60 = vunpack.c.l.bf16 %v3779_v50 }
 0xf37   : > { %v3526_v0 = vpop.xlane.xlu0 %3525 }
 0xf38   : > { %6100 = vrcp.f32 %v3526_v0  ;;  %v3778_v0 = vld [vmem:[%s8186_s23 + $0x50] sm:$0xff] }
 0xf3b   : > { %v3713_v52 = vpop.xlane.xlu0 %3712 }
 0xf3c   : > { %v3716_v29 = vadd.f32 1e-06, %v3713_v52 }
 0xf3e   : > { %6102 = vrcp.f32 %v3716_v29  ;;  %v3770_v29 = vld [vmem:[%s8186_s23 + $0x10] sm:$0xff] }
 0xf3f   : > { %v3715_v1 = vpop.xlane.xlu0 %3714 }
 0xf40   : > { %v3717_v12 = vadd.f32 1e-06, %v3715_v1  ;;  %v3769_v1 = vld [vmem:[%s8186_s23 + $0x8] sm:$0xff] }
 0xf41   : > { %v6099_v3 = vpop.eup %6098 }
 0xf42   : > { %v3529_v23 = vmul.f32 %v6099_v3, %v6095_v8  ;;  %6104 = vrcp.f32 %v3717_v12  ;;  %v3788_v12 = vunpack.c.l.bf16 %v3770_v29 }
 0xf44   : > { %5674 = vmatprep.mubr.msk.f32.mxu0 %vm1505_vm1, %v3529_v23  ;;  %v3805_v23 = vunpack.c.h.bf16 %v3778_v0 }
 0xf45   : > { %v6101_v27 = vpop.eup %6100 }
 0xf46   : > { %v3530_v14 = vmul.f32 %v6101_v27, %v6097_v42  ;;  %v3804_v27 = vunpack.c.l.bf16 %v3778_v0 }
 0xf48   : > { %5675 = vmatmul.mubr.msk.f32.vlgmr.msra.gmra.mxu0 %vm1505_vm1, %v3530_v14  ;;  %v3777_v14 = vld [vmem:[%s8186_s23 + $0x48] sm:$0xff] }
 0xf49   : > { %5678 = vmatpush3.msra.mxu0 %v4654_v21  ;;  %v3807_v21 = vunpack.c.h.bf16 %v3779_v50  ;;  %v3802_v58 = vunpack.c.l.bf16 %v3777_v14 }
 0xf4a   : > { %5679 = vmatprep.subr.mxu0 %v4653_v7 }
 0xf4b   : > { %5680 = vmatpush3.msra.mxu0 %v4653_v7  ;;  %v6103_v34 = vpop.eup %6102  ;;  %v3803_v7 = vunpack.c.h.bf16 %v3777_v14 }
 0xf4c   : > { %5681 = vmatprep.subr.mxu0 %v4650_v24 }
 0xf4d   : > { %5682 = vmatpush3.msra.mxu0 %v4650_v24  ;;  %v3776_v24 = vld [vmem:[%s8186_s23 + $0x40] sm:$0xff] }
 0xf4e   : > { %5683 = vmatprep.subr.mxu0 %v4649_v30 }
 0xf4f   : > { %5684 = vmatpush3.msra.mxu0 %v4649_v30  ;;  %v6105_v31 = vpop.eup %6104  ;;  %v3801_v30 = vunpack.c.h.bf16 %v3776_v24 }
 0xf50   : > { %3828 = vmatprep.subr.mxu0 %v3815_v49  ;;  %v4606_v49 = vld [vmem:[%s979_s27] ss:$0 sm:$0xff] }
0x1008   : > { %v5676_v63 = vpop.f32.mrf.mxu0 }
0x100a   : > { %v3603_v11 = vpop.f32.mrf.mxu0 }
0x100b   : > { %5685 = vmatprep.mubr.msk.f32.mxu0 %vm1415_vm0, %v3603_v11 }
0x100c   : > { %5686 = vmatmul.mubr.msk.f32.vlgmr.msra.gmra.mxu0 %vm1415_vm0, %v5676_v63  ;;  %v3774_v63 = vld [vmem:[%s8186_s23 + $0x30] sm:$0xff] }
0x100d   : > { %3829 = vmatpush1.msra.mxu0 %v3814_v62  ;;  %v3797_v11 = vunpack.c.h.bf16 %v3774_v63 }
0x100e   : > { %3830 = vmatprep.subr.mxu0 %v3813_v53 }
0x100f   : > { %3831 = vmatpush1.msra.mxu0 %v3812_v59  ;;  %v4607_v59 = vld [vmem:[%s982_s4] ss:$0 sm:$0xff] }
0x1010   : > { %3832 = vmatprep.subr.mxu0 %v3811_v18 }
0x1011   : > { %3833 = vmatpush1.msra.mxu0 %v3810_v36 }
0x1012   : > { %3834 = vmatprep.subr.mxu0 %v3809_v17 }
0x1013   : > { %3835 = vmatpush1.msra.mxu0 %v3808_v55 }
0x1014   : > { %3836 = vmatprep.subr.mxu0 %v3807_v21 }
0x1015   : > { %3837 = vmatpush1.msra.mxu0 %v3806_v60 }
0x1016   : > { %3838 = vmatprep.subr.mxu0 %v3805_v23 }
0x1017   : > { %3839 = vmatpush1.msra.mxu0 %v3804_v27  ;;  %v4847_v27 = vld [vmem:[%s7040_s8 + $0x28] sm:$0xff]  }
0x1018   : > { %3840 = vmatprep.subr.mxu0 %v3803_v7  ;;  %v4774_v14 = vunpack.c.h.bf16 %v4847_v27 }
0x1019   : > { %3841 = vmatpush1.msra.mxu0 %v3802_v58  ;;  %v4773_v58 = vunpack.c.l.bf16 %v4847_v27 }
0x101a   : > { %3842 = vmatprep.subr.mxu0 %v3801_v30 }
0x10cc   : > { %v5687_v2 = vpop.f32.mrf.mxu0 }
0x10cd   : > { %v3694_v22 = vadd.f32 %v5687_v2, %v7810_v40  ;;  %v3796_v2 = vunpack.c.l.bf16 %v3774_v63  ;;  %v4853_v63 = vld [vmem:[%s7040_s8 + $0x58] sm:$0xff]  }
0x10ce   : > { %v3684_v4 = vpop.f32.mrf.mxu0 }
0x10cf   : > { %v3693_v25 = vadd.f32 %v3684_v4, %v7812_v44  ;;  %v3703_v47 = vadd.f32 %v4605_v28, %v3694_v22  ;;  %v3773_v4 = vld [vmem:[%s8186_s23 + $0x28] sm:$0xff] }
0x10d0   : > { %v3795_v22 = vunpack.c.h.bf16 %v3773_v4 }
0x10d1   : > { %v3702_v43 = vadd.f32 %v4605_v28, %v3693_v25  ;;  %v3705_v54 = vmul.f32 %v6134_v56, %v3703_v47  ;;  %v3723_v15 = vadd.f32 %v6134_v56, %v3703_v47  ;;  %v3794_v25 = vunpack.c.l.bf16 %v3773_v4  ;;  %v3772_v28 = vld [vmem:[%s8186_s23 + $0x20] sm:$0xff] }
0x10d2   : > { %v3792_v47 = vunpack.c.l.bf16 %v3772_v28 }
0x10d3   : > { %v3704_v5 = vmul.f32 %v6133_v38, %v3702_v43  ;;  %v3722_v39 = vadd.f32 %v6133_v38, %v3702_v43  ;;  %v3793_v43 = vunpack.c.h.bf16 %v3772_v28  ;;  %v4852_v28 = vld [vmem:[%s7040_s8 + $0x50] sm:$0xff]  }
0x10d5   : > { %3706 = vadd.xlane.f32.xlu0 %v3704_v5  ;;  %v3771_v5 = vld [vmem:[%s8186_s23 + $0x18] sm:$0xff] }
0x10d6   : > { %v3791_v52 = vunpack.c.h.bf16 %v3771_v5 }
0x10d9   : > { %3708 = vadd.xlane.f32.xlu0 %v3705_v54  ;;  %v3790_v54 = vunpack.c.l.bf16 %v3771_v5 }
0x115e   : > { %v3707_v41 = vpop.xlane.xlu0 %3706 }
0x115f   : > { %v3720_v19 = vmul.f32 %v6103_v34, %v3707_v41  ;;  %v3789_v34 = vunpack.c.h.bf16 %v3770_v29  ;;  %v3768_v41 = vld [vmem:[%s8186_s23] sm:$0xff] }
0x1160   : > { %v4851_v29 = vld [vmem:[%s7040_s8 + $0x48] sm:$0xff]  }
0x1161   : > { %v3724_v40 = vmul.f32 %v6133_v38, %v3720_v19  ;;  %v3800_v38 = vunpack.c.l.bf16 %v3776_v24  ;;  %v6541_v19 = vmov 0.0   ;;  %v4854_v24 = vld [vmem:[%s7040_s8 + $0x60] sm:$0xff]  }
0x1162   : > { %v3709_v51 = vpop.xlane.xlu0 %3708  ;;  %3892 = vmatprep.mubr.f32.mxu0 %v6541_v19  ;;  %v4802_v30 = vunpack.c.h.bf16 %v4854_v24 }
0x1163   : > { %v7837_v44 = vsub.f32 %v3722_v39, %v3724_v40  ;;  %v3721_v6 = vmul.f32 %v6105_v31, %v3709_v51  ;;  %3843 = vmatpush1.msra.mxu0 %v3800_v38  ;;  %v3787_v31 = vunpack.c.h.bf16 %v3769_v1  ;;  %v3786_v39 = vunpack.c.l.bf16 %v3769_v1  ;;  %v4846_v38 = vld [vmem:[%s7040_s8 + $0x20] sm:$0xff]  }
0x1164   : > { %v3785_v40 = vunpack.c.h.bf16 %v3768_v41  ;;  %v3784_v51 = vunpack.c.l.bf16 %v3768_v41  ;;  %v4790_v1 = vunpack.c.h.bf16 %v4851_v29  ;;  %v4789_v41 = vunpack.c.l.bf16 %v4851_v29 }
0x1165   : > { %v3725_v13 = vmul.f32 %v6134_v56, %v3721_v6  ;;  %3730 = vadd.xlane.f32.xlu1 %v7837_v44  ;;  %v4165_v10 = vmul.f32 %v7837_v44, %v7837_v44  ;;  %v3799_v56 = vunpack.c.h.bf16 %v3775_v48  ;;  %v4770_v48 = vunpack.c.h.bf16 %v4846_v38 }
0x1167   : > { %v7840_v57 = vsub.f32 %v3723_v15, %v3725_v13  ;;  %3844 = vmatprep.subr.mxu0 %v3799_v56  ;;  %v4801_v56 = vunpack.c.l.bf16 %v4854_v24 }
0x1168   : > { %3845 = vmatpush1.msra.mxu0 %v3798_v9  ;;  %v4769_v9 = vunpack.c.l.bf16 %v4846_v38 }
0x1169   : > { %3732 = vadd.xlane.f32.xlu0 %v7840_v57  ;;  %v4166_v3 = vmul.f32 %v7840_v57, %v7840_v57  ;;  %3846 = vmatprep.subr.mxu0 %v3797_v11  ;;  %v4798_v11 = vunpack.c.h.bf16 %v4853_v63 }
0x116a   : > { %3847 = vmatpush1.msra.mxu0 %v3796_v2  ;;  %v4845_v2 = vld [vmem:[%s7040_s8 + $0x18] sm:$0xff]  }
0x116b   : > { %3848 = vmatprep.subr.mxu0 %v3795_v22  ;;  %v4766_v4 = vunpack.c.h.bf16 %v4845_v2  ;;  %v4797_v22 = vunpack.c.l.bf16 %v4853_v63 }
0x116c   : > { %3849 = vmatpush1.msra.mxu0 %v3794_v25  ;;  %v4765_v25 = vunpack.c.l.bf16 %v4845_v2 }
0x116d   : > { %3850 = vmatprep.subr.mxu0 %v3793_v43  ;;  %v4794_v43 = vunpack.c.h.bf16 %v4852_v28 }
0x116e   : > { %3851 = vmatpush1.msra.mxu0 %v3792_v47  ;;  %v4844_v47 = vld [vmem:[%s7040_s8 + $0x10] sm:$0xff]  }
0x116f   : > { %3852 = vmatprep.subr.mxu0 %v3791_v52  ;;  %v4762_v5 = vunpack.c.h.bf16 %v4844_v47  ;;  %v4761_v52 = vunpack.c.l.bf16 %v4844_v47 }
0x1170   : > { %3853 = vmatpush1.msra.mxu0 %v3790_v54  ;;  %v4793_v54 = vunpack.c.l.bf16 %v4852_v28 }
0x1171   : > { %3854 = vmatprep.subr.mxu0 %v3789_v34 }
0x1172   : > { %3855 = vmatpush1.msra.mxu0 %v3788_v12  ;;  %v4843_v12 = vld [vmem:[%s7040_s8 + $0x8] sm:$0xff]  }
0x1173   : > { %3856 = vmatprep.subr.mxu0 %v3787_v31  ;;  %v4758_v34 = vunpack.c.h.bf16 %v4843_v12  ;;  %v4850_v31 = vld [vmem:[%s7040_s8 + $0x40] sm:$0xff]  }
0x1174   : > { %3857 = vmatpush1.msra.mxu0 %v3786_v39  ;;  %v4752_v39 = vld [vmem:[%s7040_s8] sm:$0xff]  }
0x1175   : > { %3858 = vmatprep.subr.mxu0 %v3785_v40  ;;  %v4786_v40 = vunpack.c.h.bf16 %v4850_v31 }
0x1176   : > { %3859 = vmatpush1.msra.mxu0 %v3784_v51  ;;  %v4754_v51 = vunpack.c.h.bf16 %v4752_v39 }
0x11ee   : > { %v3731_v61 = vpop.xlane.xlu1 %3730 }
0x11ef   : > { %v3734_v26 = vmul.f32 0.0078125, %v3731_v61 }
0x11f1   : > { %v7848_v16 = vsub.f32 %v7837_v44, %v3734_v26  ;;  %v4857_v26 = vld [vmem:[%s7040_s8 + $0x78] sm:$0xff]  }
0x11f2   : > { %v3733_v32 = vpop.xlane.xlu0 %3732 }
0x11f3   : > { %v3738_v20 = vmul.f32 %v7848_v16, %v7848_v16  ;;  %v3735_v8 = vmul.f32 0.0078125, %v3733_v32  ;;  %v4814_v32 = vunpack.c.h.bf16 %v4857_v26 }
0x11f5   : > { %v7853_v46 = vsub.f32 %v7840_v57, %v3735_v8  ;;  %3740 = vadd.xlane.f32.xlu0 %v3738_v20  ;;  %5130 = vmatprep.subr.mxu1 %v4814_v32  ;;  %v4813_v8 = vunpack.c.l.bf16 %v4857_v26 }
0x11f7   : > { %v3739_v42 = vmul.f32 %v7853_v46, %v7853_v46 }
0x11f9   : > { %3742 = vadd.xlane.f32.xlu0 %v3739_v42 }
0x11fd   : > { %4167 = vadd.xlane.f32.xlu0 %v4165_v10  ;;  %v4856_v10 = vld [vmem:[%s7040_s8 + $0x70] sm:$0xff]  }
0x11fe   : > { %v4810_v50 = vunpack.c.h.bf16 %v4856_v10  ;;  %v4809_v60 = vunpack.c.l.bf16 %v4856_v10 }
0x1201   : > { %4169 = vadd.xlane.f32.xlu0 %v4166_v3  ;;  %v4855_v3 = vld [vmem:[%s7040_s8 + $0x68] sm:$0xff]  }
0x1202   : > { %v4806_v23 = vunpack.c.h.bf16 %v4855_v3  ;;  %v4805_v7 = vunpack.c.l.bf16 %v4855_v3 }
0x127e   : > { %v3741_v6 = vpop.xlane.xlu0 %3740 }
0x127f   : > { %v3744_v15 = vmul.f32 0.0078125, %v3741_v6  ;;  %v4785_v6 = vunpack.c.l.bf16 %v4850_v31 }
0x1281   : > { %v3746_v13 = vadd.f32 1e-12, %v3744_v15  ;;  %v4753_v15 = vunpack.c.l.bf16 %v4752_v39 }
0x1282   : > { %v3743_v33 = vpop.xlane.xlu0 %3742 }
0x1283   : > { %6106 = vrsqrt.f32 %v3746_v13  ;;  %v3745_v45 = vmul.f32 0.0078125, %v3743_v33  ;;  %v3818_v13 = vlaneseq }
0x1285   : > { %v3747_v37 = vadd.f32 1e-12, %v3745_v45  ;;  %v3819_v33 = vshrl.u32 %v3818_v13, 7 }
0x1287   : > { %6108 = vrsqrt.f32 %v3747_v37  ;;  %v3820_v45 = vsub.s32 0, %v3819_v33  ;;  %v3816_v37 = vld [vmem:[%s7038_s17] sm:$0x3] }
0x1290   : > { %v6107_v62 = vpop.eup %6106 }
0x1291   : > { %v3750_v53 = vmul.f32 %v6107_v62, %v7848_v16  ;;  %v4849_v16 = vld [vmem:[%s7040_s8 + $0x38] sm:$0xff]   ;;  %v3824_v62 = vsub.s32 1, %v3819_v33 }
0x1292   : > { %v4782_v20 = vunpack.c.h.bf16 %v4849_v16  ;;  %v4781_v42 = vunpack.c.l.bf16 %v4849_v16 }
0x1293   : > { %v3758_v35 = vmul.f32 %v4606_v49, %v3750_v53  ;;  %v3825_v53 = vrot.slane %v3816_v37, %v3824_v62 }
0x1294   : > { %v6109_v18 = vpop.eup %6108  ;;  %5131 = vmatpush3.msra.mxu1 %v4782_v20 }
0x1295   : > { %v3766_v36 = vadd.f32 %v4607_v59, %v3758_v35  ;;  %v3751_v17 = vmul.f32 %v6109_v18, %v7853_v46  ;;  %5132 = vmatprep.subr.mxu1 %v4813_v8  ;;  %v4848_v46 = vld [vmem:[%s7040_s8 + $0x30] sm:$0xff]  }
0x1296   : > { %5133 = vmatpush3.msra.mxu1 %v4781_v42  ;;  %v4778_v21 = vunpack.c.h.bf16 %v4848_v46  ;;  %v4777_v0 = vunpack.c.l.bf16 %v4848_v46 }
0x1297   : > { %3893 = vmatmul.mubr.f32.vlgmr.msra.gmra.mxu0 %v3766_v36  ;;  %v3759_v55 = vmul.f32 %v4606_v49, %v3751_v17  ;;  %5134 = vmatprep.subr.mxu1 %v4810_v50  ;;  %v3821_v49 = vrot.slane %v3816_v37, %v3820_v45 }
0x1298   : > { %3898 = vmatprep.mubr.f32.mxu0 %v6541_v19  ;;  %5135 = vmatpush3.msra.mxu1 %v4778_v21  ;;  %v4757_v19 = vunpack.c.l.bf16 %v4843_v12 }
0x1299   : > { %v3767_v61 = vadd.f32 %v4607_v59, %v3759_v55  ;;  %5136 = vmatprep.subr.mxu1 %v4809_v60 }
0x129a   : > { %5137 = vmatpush3.msra.mxu1 %v4777_v0 }
0x129b   : > { %3899 = vmatmul.mubr.f32.gmra.mxu0 %v3767_v61  ;;  %5138 = vmatprep.subr.mxu1 %v4806_v23 }
0x129c   : > { %5139 = vmatpush3.msra.mxu1 %v4774_v14 }
0x129d   : > { %5140 = vmatprep.subr.mxu1 %v4805_v7 }
0x129e   : > { %5141 = vmatpush3.msra.mxu1 %v4773_v58 }
0x129f   : > { %5142 = vmatprep.subr.mxu1 %v4802_v30 }
0x12a0   : > { %5143 = vmatpush3.msra.mxu1 %v4770_v48 }
0x12a1   : > { %5144 = vmatprep.subr.mxu1 %v4801_v56 }
0x12a2   : > { %5145 = vmatpush3.msra.mxu1 %v4769_v9 }
0x12a3   : > { %5146 = vmatprep.subr.mxu1 %v4798_v11 }
0x12a4   : > { %5147 = vmatpush3.msra.mxu1 %v4766_v4 }
0x12a5   : > { %5148 = vmatprep.subr.mxu1 %v4797_v22 }
0x12a6   : > { %5149 = vmatpush3.msra.mxu1 %v4765_v25 }
0x12a7   : > { %5150 = vmatprep.subr.mxu1 %v4794_v43 }
0x12a8   : > { %5151 = vmatpush3.msra.mxu1 %v4762_v5 }
0x12a9   : > { %5152 = vmatprep.subr.mxu1 %v4793_v54 }
0x12aa   : > { %5153 = vmatpush3.msra.mxu1 %v4761_v52 }
0x12ab   : > { %5154 = vmatprep.subr.mxu1 %v4790_v1 }
0x12ac   : > { %5155 = vmatpush3.msra.mxu1 %v4758_v34 }
0x12ad   : > { %5156 = vmatprep.subr.mxu1 %v4789_v41 }
0x12ae   : > { %5157 = vmatpush3.msra.mxu1 %v4757_v19 }
0x12af   : > { %5158 = vmatprep.subr.mxu1 %v4786_v40 }
0x12b0   : > { %5159 = vmatpush3.msra.mxu1 %v4754_v51 }
0x12b1   : > { %5160 = vmatprep.subr.mxu1 %v4785_v6 }
0x12b2   : > { %5161 = vmatpush3.msra.mxu1 %v4753_v15 }
0x1357   : > { %v3894_v59 = vpop.f32.mrf.mxu0 }
0x1358   : > { %v7902_v35 = vadd.f32 %v3894_v59, %v3821_v49 }
0x1359   : > { %v3896_v18 = vpop.f32.mrf.mxu0 }
0x135a   : > { %v7905_v36 = vmul.f32 0.70710677, %v7902_v35  ;;  %v7907_v17 = vadd.f32 %v3896_v18, %v3825_v53 }
0x135b   : > { %v3900_v55 = vpop.f32.mrf.mxu0 }
0x135c   : > { %v3921_v61 = vand.u32 2147483647, %v7905_v36  ;;  %v7911_v26 = vmul.f32 0.70710677, %v7907_v17  ;;  %v7913_v32 = vadd.f32 %v3900_v55, %v3821_v49  ;;  %vm3913_vm2 = vcmp.ge.f32.partialorder %v7905_v36, 0.0 }
0x135d   : > { %v3902_v16 = vpop.f32.mrf.mxu0 }
0x135e   : > { %v3925_v20 = vmul.f32 0.3275911, %v3921_v61  ;;  %v3922_v8 = vand.u32 2147483647, %v7911_v26  ;;  %v7917_v42 = vmul.f32 0.70710677, %v7913_v32  ;;  %v7919_v10 = vadd.f32 %v3902_v16, %v3825_v53 }
0x135f   : > { %v3977_v7 = vsub.f32 0.0, %v3921_v61  ;;  %vm3914_vm3 = vcmp.ge.f32.partialorder %v7911_v26, 0.0  ;;  %v3906_v26 = vmul.f32 0.5, %v7907_v17 }
0x1360   : > { %v3929_v50 = vadd.f32 1.0, %v3925_v20  ;;  %v3926_v46 = vmul.f32 0.3275911, %v3922_v8  ;;  %v3923_v21 = vand.u32 2147483647, %v7917_v42  ;;  %v3978_v24 = vsub.f32 0.0, %v3922_v8 }
0x1361   : > { %v7923_v60 = vmul.f32 0.70710677, %v7919_v10  ;;  %v3981_v30 = vmul.f32 %v3977_v7, %v3921_v61  ;;  %v6542_v7 = vmov -1.0   ;;  %vm3915_vm4 = vcmp.ge.f32.partialorder %v7917_v42, 0.0 }
0x1362   : > { %6110 = vrcp.f32 %v3929_v50  ;;  %v3930_v0 = vadd.f32 1.0, %v3926_v46  ;;  %v3927_v3 = vmul.f32 0.3275911, %v3923_v21  ;;  %v3979_v38 = vsub.f32 0.0, %v3923_v21 }
0x1363   : > { %v3924_v23 = vand.u32 2147483647, %v7923_v60  ;;  %v3982_v56 = vmul.f32 %v3978_v24, %v3922_v8  ;;  %v3985_v63 = vmul.f32 1.442695, %v3981_v30  ;;  %vm3916_vm5 = vcmp.ge.f32.partialorder %v7923_v60, 0.0 }
0x1364   : > { %6112 = vrcp.f32 %v3930_v0  ;;  %v3931_v27 = vadd.f32 1.0, %v3927_v3  ;;  %v3983_v2 = vmul.f32 %v3979_v38, %v3923_v21  ;;  %v3920_v42 = vsel %vm3916_vm5, 1.0, %v6542_v7 }
0x1365   : > { %v3928_v14 = vmul.f32 0.3275911, %v3924_v23  ;;  %v3980_v11 = vsub.f32 0.0, %v3924_v23  ;;  %v3987_v25 = vmul.f32 1.442695, %v3982_v56  ;;  %v3907_v60 = vmul.f32 0.5, %v7913_v32 }
0x1366   : > { %6114 = vrcp.f32 %v3931_v27  ;;  %v3989_v54 = vmul.f32 1.442695, %v3983_v2 }
0x1367   : > { %v3932_v58 = vadd.f32 1.0, %v3928_v14  ;;  %v3984_v5 = vmul.f32 %v3980_v11, %v3924_v23 }
0x1369   : > { %6116 = vrcp.f32 %v3932_v58  ;;  %v3991_v31 = vmul.f32 1.442695, %v3984_v5  ;;  %v3917_v58 = vsel %vm3913_vm2, 1.0, %v6542_v7 }
0x136a   : > { %6118 = vpow2.f32 %v3985_v63  ;;  %v3918_v63 = vsel %vm3914_vm3, 1.0, %v6542_v7 }
0x136b   : > { %6120 = vpow2.f32 %v3987_v25 }
0x136c   : > { %6122 = vpow2.f32 %v3989_v54  ;;  %v3905_v54 = vmul.f32 0.5, %v7902_v35  ;;  %v4608_v35 = vld [vmem:[%s989_s24] ss:$0 sm:$0xff]  ;;  %s8190_s24 = sld [smem:[#allocation30_spill]] }
0x136d   : > { %6124 = vpow2.f32 %v3991_v31 }
0x136f   : > { %v6111_v48 = vpop.eup %6110 }
0x1370   : > { %v3941_v9 = vmul.f32 1.0614054, %v6111_v48 }
0x1371   : > { %v6113_v4 = vpop.eup %6112 }
0x1372   : > { %v3945_v22 = vadd.f32 -1.4531521, %v3941_v9  ;;  %v3942_v28 = vmul.f32 1.0614054, %v6113_v4  ;;  %p4609_p10 = scmp.ne.s32.totalorder %s8190_s24, 1 }
0x1373   : > { %v6115_v43 = vpop.eup %6114 }
0x1374   : > { %v3949_v47 = vmul.f32 %v6111_v48, %v3945_v22  ;;  %v3946_v52 = vadd.f32 -1.4531521, %v3942_v28  ;;  %v3943_v29 = vmul.f32 1.0614054, %v6115_v43  ;;  %v3919_v28 = vsel %vm3915_vm4, 1.0, %v6542_v7 }
0x1376   : > { %v3953_v1 = vadd.f32 1.4214138, %v3949_v47  ;;  %v6117_v12 = vpop.eup %6116  ;;  %v3950_v34 = vmul.f32 %v6113_v4, %v3946_v52  ;;  %v3947_v41 = vadd.f32 -1.4531521, %v3943_v29 }
0x1377   : > { %v3944_v39 = vmul.f32 1.0614054, %v6117_v12  ;;  %v6119_v20 = vpop.eup %6118 }
0x1378   : > { %v3957_v19 = vmul.f32 %v6111_v48, %v3953_v1  ;;  %v3954_v40 = vadd.f32 1.4214138, %v3950_v34  ;;  %v3951_v51 = vmul.f32 %v6115_v43, %v3947_v41  ;;  %v6121_v23 = vpop.eup %6120  ;;  %v3908_v41 = vmul.f32 0.5, %v7919_v10 }
0x1379   : > { %v3948_v15 = vadd.f32 -1.4531521, %v3944_v39  ;;  %v6123_v38 = vpop.eup %6122 }
0x137a   : > { %v3961_v6 = vadd.f32 -0.28449672, %v3957_v19  ;;  %v3958_v13 = vmul.f32 %v6113_v4, %v3954_v40  ;;  %v3955_v33 = vadd.f32 1.4214138, %v3951_v51  ;;  %v6125_v2 = vpop.eup %6124 }
0x137b   : > { %v3952_v37 = vmul.f32 %v6117_v12, %v3948_v15 }
0x137c   : > { %v3965_v45 = vmul.f32 %v6111_v48, %v3961_v6  ;;  %v3962_v62 = vadd.f32 -0.28449672, %v3958_v13  ;;  %v3959_v49 = vmul.f32 %v6115_v43, %v3955_v33 }
0x137d   : > { %v3956_v59 = vadd.f32 1.4214138, %v3952_v37  ;;  %v4168_v37 = vpop.xlane.xlu0 %4167 }
0x137e   : > { %v3969_v53 = vadd.f32 0.2548296, %v3965_v45  ;;  %v3966_v18 = vmul.f32 %v6113_v4, %v3962_v62  ;;  %v3963_v55 = vadd.f32 -0.28449672, %v3959_v49  ;;  %v4171_v62 = vadd.f32 1e-06, %v4168_v37 }
0x137f   : > { %v3960_v16 = vmul.f32 %v6117_v12, %v3956_v59 }
0x1380   : > { %v3973_v61 = vmul.f32 %v6111_v48, %v3969_v53  ;;  %v3970_v8 = vadd.f32 0.2548296, %v3966_v18  ;;  %v3967_v50 = vmul.f32 %v6115_v43, %v3963_v55  ;;  %6126 = vrcp.f32 %v4171_v62 }
0x1381   : > { %v3964_v21 = vadd.f32 -0.28449672, %v3960_v16  ;;  %v4170_v49 = vpop.xlane.xlu0 %4169 }
0x1382   : > { %v3993_v46 = vmul.f32 %v6119_v20, %v3973_v61  ;;  %v3974_v0 = vmul.f32 %v6113_v4, %v3970_v8  ;;  %v3971_v3 = vadd.f32 0.2548296, %v3967_v50  ;;  %v4172_v53 = vadd.f32 1e-06, %v4170_v49 }
0x1383   : > { %v3968_v14 = vmul.f32 %v6117_v12, %v3964_v21 }
0x1384   : > { %v3997_v27 = vsub.f32 1.0, %v3993_v46  ;;  %v3994_v24 = vmul.f32 %v6121_v23, %v3974_v0  ;;  %v3975_v30 = vmul.f32 %v6115_v43, %v3971_v3  ;;  %6128 = vrcp.f32 %v4172_v53 }
0x1385   : > { %v3972_v56 = vadd.f32 0.2548296, %v3968_v14 }
0x1386   : > { %v4001_v48 = vmul.f32 %v3997_v27, %v3917_v58  ;;  %v3998_v9 = vsub.f32 1.0, %v3994_v24  ;;  %v3995_v36 = vmul.f32 %v6123_v38, %v3975_v30 }
0x1387   : > { %v3976_v11 = vmul.f32 %v6117_v12, %v3972_v56 }
0x1388   : > { %v4002_v4 = vmul.f32 %v3998_v9, %v3918_v63  ;;  %v3999_v22 = vsub.f32 1.0, %v3995_v36  ;;  %v4005_v25 = vadd.f32 1.0, %v4001_v48 }
0x1389   : > { %v3996_v47 = vmul.f32 %v6125_v2, %v3976_v11 }
0x138a   : > { %v4006_v43 = vadd.f32 1.0, %v4002_v4  ;;  %v4003_v5 = vmul.f32 %v3999_v22, %v3919_v28  ;;  %v4009_v1 = vmul.f32 %v4005_v25, %v3905_v54 }
0x138b   : > { %v4000_v52 = vsub.f32 1.0, %v3996_v47 }
0x138c   : > { %v4010_v29 = vmul.f32 %v4006_v43, %v3906_v26  ;;  %v4007_v34 = vadd.f32 1.0, %v4003_v5 }
0x138d   : > { %v4004_v12 = vmul.f32 %v4000_v52, %v3920_v42  ;;  %v6127_v59 = vpop.eup %6126 }
0x138e   : > { %4148 = vmatprep.mubr.f32.mxu1 %v4010_v29  ;;  %v4011_v17 = vmul.f32 %v4007_v34, %v3907_v60 }
0x138f   : > { %4149 = vmatmul.mubr.f32.vlgmr.msra.gmra.mxu1 %v4009_v1  ;;  %v4008_v19 = vadd.f32 1.0, %v4004_v12 }
0x1391   : > { %v4012_v31 = vmul.f32 %v4008_v19, %v3908_v41  ;;  %v6129_v20 = vpop.eup %6128 }
0x1393   : > { %4153 = vmatprep.mubr.f32.mxu1 %v4012_v31 }
0x1394   : > { %4154 = vmatmul.mubr.f32.gmra.mxu1 %v4011_v17 }
0x144f   : > { %v5162_v39 = vpop.f32.mrf.mxu1 }
0x1451   : > { %v5163_v40 = vpop.f32.mrf.mxu1 }
0x1452   : > { %v5164_v51 = vadd.f32 %v5163_v40, %v5162_v39 }
0x1454   : > { %v4151_v6 = vadd.f32 %v5164_v51, %v4608_v35  ;;  %v5165_v15 = vpop.f32.mrf.mxu1 }
0x1456   : > { %v5166_v13 = vpop.f32.mrf.mxu1  ;;  %v4159_v10 = vmul.f32 %v4151_v6, %v7837_v44  ;;  %v4177_v61 = vadd.f32 %v4151_v6, %v7837_v44 }
0x1457   : > { %v5167_v33 = vadd.f32 %v5166_v13, %v5165_v15 }
0x1458   : > { %4161 = vadd.xlane.f32.xlu0 %v4159_v10 }
0x1459   : > { %v4156_v32 = vadd.f32 %v5167_v33, %v4608_v35 }
0x145b   : > { %v4160_v45 = vmul.f32 %v4156_v32, %v7840_v57  ;;  %v4178_v21 = vadd.f32 %v4156_v32, %v7840_v57 }
0x145d   : > { %4163 = vadd.xlane.f32.xlu0 %v4160_v45 }
0x14e1   : > { %v4162_v18 = vpop.xlane.xlu0 %4161 }
0x14e2   : > { %v4175_v55 = vmul.f32 %v6127_v59, %v4162_v18 }
0x14e4   : > { %v4179_v16 = vmul.f32 %v4175_v55, %v7837_v44 }
0x14e6   : > { %v4181_v8 = vsub.f32 %v4177_v61, %v4179_v16  ;;  %v4164_v50 = vpop.xlane.xlu0 %4163 }
0x14e7   : > { %v4176_v46 = vmul.f32 %v6129_v20, %v4164_v50 }
0x14e8   : > { %4183 = vst [vmem:[#allocation2] sm:$0xff] %v4181_v8 }
0x14e9   : > { %v4180_v0 = vmul.f32 %v4176_v46, %v7840_v57  ;;  %4188 = sbr.rel (%p4609_p10) target bundleno = 5359 (0x14ef), region = 132 }
0x14eb   : > { %v4182_v3 = vsub.f32 %v4178_v21, %v4180_v0 }
0x14ed   : > { %4184 = vst [vmem:[#allocation2 + $0x8] sm:$0xff] %v4182_v3 }
0x14ee   : > { %4189 = vst [vmem:[%s7044_s16] sm:$0xff] %v4181_v8  ;;  %4190 = vst [vmem:[%s7044_s16 + $0x8] sm:$0xff] %v4182_v3 }
0x14ef PF: > { %s8191_s26 = sld [smem:[#allocation31_spill]]  ;;  %s4205_s0 = sshll.u32 %s7044_s16, 4  ;;  %s7955_s0 = int_to_ptr.vmem [resolvable:$true] %s4205_s0 }
0x14f0   : > { %s8193_s25 = sld [smem:[#allocation66_spill]]  ;;  %s4192_s20 = scalar_lea.sflag [#allocation5], %s6952_s30 }
0x14f1   : > { %s6387_s7 = scalar_lea.vmem %s7955_s0, 256  ;;  %s6543_s11 = smov [#allocation18]  }
0x14f2   : > { %p6388_p7 = scmp.ne.s32.totalorder %s7955_s0, %s6387_s7  ;;  %s6391_s5 = sshll.u32 %s6543_s11, 4  ;;  %s6392_s5 = int_to_ptr.vmem [resolvable:$false] %s6391_s5 }
0x14f3   : > { %s6393_s22 = scalar_lea.vmem %s6392_s5, 512  ;;  %p6394_p1 = scmp.lt.s32.totalorder %s7955_s0, %s6392_s5 }
0x14f4   : > { %p6389_p8 = pnand %p6388_p7, %p6841_p0  ;;  %p6395_p2 = scmp.lt.s32.totalorder %s6393_s22, %s6387_s7 }
0x14f5   : > { %s4622_s2 = sshll.u32 %s8191_s26, 8 }
0x14f6   : > { %s8194_s14 = smov %s8193_s25  ;;  %s7952_s19 = scalar_lea.hbm %s8193_s25, %s4622_s2 }
0x14f7   : > { %p6390_p3 = pneg %p6389_p8  ;;  %p6396_p5 = por %p6395_p2, %p6394_p1 }
0x14f9   : > { %p6397_p11 = pnand %p6396_p5, %p6390_p3 }
0x14fb   : > { %6400 = shalt.err (!%p6397_p11)
}
0x14fc   : > { %s6401_s16 = scalar_lea.hbm %s7952_s19, 256  ;;  %s6405_s6 = scalar_lea.hbm %s8194_s14, 512 }
0x14fd   : > { %p6402_p4 = scmp.ne.s32.totalorder %s7952_s19, %s6401_s16  ;;  %p6406_p12 = scmp.lt.s32.totalorder %s7952_s19, %s8194_s14 }
0x14fe   : > { %p6407_p13 = scmp.lt.s32.totalorder %s6405_s6, %s6401_s16 }
0x14ff   : > { %p6403_p6 = pnand %p6402_p4, %p6841_p0 }
0x1500   : > { %p6408_p10 = por %p6407_p13, %p6406_p12 }
0x1501   : > { %p6404_p9 = pneg %p6403_p6 }
0x1503   : > { %p6409_p7 = pnand %p6408_p10, %p6404_p9 }
0x1505   : > { %6412 = shalt.err (!%p6409_p7)
}
0x1506   : > { %s6544_s13 = smov 128   ;;  %s6545_s12 = smov 8  }
0x1507   : > { %5706 = dma.vmem_to_hbm [thread:$0]  (%p6841_p0), %s7955_s0, 256, %s7952_s19, %s4192_s20, %s6544_s13, %s6544_s13, %s6545_s12  }
0x1508 PF: > { %s8195_s3 = sld [smem:[#allocation34_spill]] }
0x1509   : > { %s8196_s10 = sld [smem:[#allocation27_spill]] }
0x150a   : > { %s8197_s21 = sld [smem:[#allocation42_spill]] }
0x150e   : > { %p5741_p8 = scmp.ge.s32.totalorder %s8195_s3, 2 }
0x150f   : > { %s4220_s18 = sand.u32 1, %s8196_s10  }
0x1510   : > { %p8198_p3 = scmp.ne.s32.totalorder %s8197_s21, 0  ;;  %s4221_s27 = scalar_lea.sflag [#allocation5], %s4220_s18 }
0x1512   : > { %p5737_p1 = pnand %p5741_p8, %p8198_p3 }
0x1514   : > { %p5738_p2 = pneg %p5737_p1 }
0x1516   : > { %6478 = dma.done.wait (%p5738_p2), %s4221_s27, 256  }
0x1517   : > { %6480 = vsyncadd (%p5738_p2), %s4221_s27, 4294967040  ;;  %s45_s1 = sadd.s32 1, %s8195_s3   ;;  %s8199_s24 = sld [smem:[#allocation25_spill]] }
0x1518   : > { %p42_p5 = scmp.ge.s32.totalorder %s45_s1, 6   ;;  %s8200_s25 = sld [smem:[#allocation26_spill]] }
0x1519   : > { %s8201_s26 = sld [smem:[#allocation37_spill]] }
0x151a   : > { %s8202_s27 = sld [smem:[#allocation28_spill]] }
0x151b   : > { %s8203_s28 = sld [smem:[#allocation29_spill]] }
0x151c   : > { %s8204_s29 = sld [smem:[#allocation43_spill]]  ;;  %44 = sbr.rel (!%p42_p5) target bundleno = 36 (0x24), region = 261 }
0x151d   : > { %s8205_s0 = sld [smem:[#allocation32_spill]] }
0x151e   : > { %s8206_s30 = sld [smem:[#allocation33_spill]] }
0x151f   : > { %s8207_s18 = sld [smem:[#allocation35_spill]] }
0x1520   : > { %s8208_s19 = sld [smem:[#allocation41_spill]] }
0x1521   :  { %4226 = vsyncpa [#allocation4], 1 }
0x1522   :  { %4228 = vsyncpa [#allocation4 + $0x1], 1 }
0x1523   :  { %4229 = vsyncpa [#allocation7], 1 }
0x1524   :  { %4231 = vsyncpa [#allocation7 + $0x1], 1 }
0x1525   :  { %4232 = vsyncpa [#allocation10], 1 }
0x1526   :  { %4234 = vsyncpa [#allocation10 + $0x1], 1 }
0x1527   :  { %4235 = vsyncpa [#allocation13], 1 }
0x1528   :  { %4237 = vsyncpa [#allocation13 + $0x1], 1 }
0x1529   :  { %4238 = vsyncpa [#allocation16], 1 }
0x152a   :  { %4240 = vsyncpa [#allocation16 + $0x1], 1 }
0x152b   :  { %4241 = vsyncpa [#allocation5], 1 }
0x152c   :  { %4243 = vsyncpa [#allocation5 + $0x1], 1 }

</bundles_post_ra>
